<compile_context>
chip_gen: v7x
topology: tpu7x:2x2x1
jax: 0.10.0
libtpu: 0.0.40
codegen_flags: <defaults>
</compile_context>

<pallas_src>
import functools

import jax
import jax.numpy as jnp
from jax.experimental import pallas as pl
from jax.experimental.pallas import tpu as pltpu

_VMEM_LIMIT = 32 * 1024 * 1024


# ----------------------------------------------------------------------------
# Kernel 1: fused multi-layer bidirectional LSTM (whole stack in one launch)
# ----------------------------------------------------------------------------
def _lstm_cell(g, c_prev, hidden):
    """g: (B, 4H) pre-activation gates (PyTorch order i, f, g, o)."""
    H = hidden
    # Full-width non-linearities (EUP) + one lane-mask select, then plain extracts.
    lane = jax.lax.broadcasted_iota(jnp.int32, g.shape, dimension=1)
    is_g = (lane >= 2 * H) & (lane < 3 * H)
    act = jnp.where(is_g, jnp.tanh(g), jax.nn.sigmoid(g))
    i = act[:, 0:H]
    f = act[:, H:2 * H]
    gg = act[:, 2 * H:3 * H]
    o = act[:, 3 * H:4 * H]
    c = f * c_prev + i * gg
    return o * jnp.tanh(c), c


def _lstm_stack_kernel(*refs, n_layers, seq_len, batch, hidden):
    T, B, H = seq_len, batch, hidden
    x_ref = refs[0]
    o_ref = refs[-1]

    cur = x_ref[...]                                  # (T*B, D_in0) f32, time-major rows

    for l in range(n_layers):
        wih_ref = refs[1 + 3 * l]
        whh_ref = refs[2 + 3 * l]
        b_ref = refs[3 + 3 * l]

        # Hoisted input projection for BOTH directions: (T*B, D) @ (D, 8H).
        gates_in = jnp.dot(cur.astype(jnp.bfloat16), wih_ref[...],
                           preferred_element_type=jnp.float32) + b_ref[...]   # (T*B, 8H)
        whh = whh_ref[...]                            # (H, 8H) bf16: [:, :4H] fwd, [:, 4H:] bwd

        h_f = jnp.zeros((B, H), jnp.float32)
        c_f = jnp.zeros((B, H), jnp.float32)
        h_b = jnp.zeros((B, H), jnp.float32)
        c_b = jnp.zeros((B, H), jnp.float32)
        fwd = [None] * T
        bwd = [None] * T

        # Fully unrolled (static, small T).  Only the tiny recurrent dots are serial;
        # no per-step hidden-state concat on the critical path.
        for t in range(T):
            rt = T - 1 - t
            rec_f = jnp.dot(h_f.astype(jnp.bfloat16), whh[:, 0:4 * H],
                            preferred_element_type=jnp.float32)
            rec_b = jnp.dot(h_b.astype(jnp.bfloat16), whh[:, 4 * H:8 * H],
                            preferred_element_type=jnp.float32)
            h_f, c_f = _lstm_cell(gates_in[t * B:(t + 1) * B, 0:4 * H] + rec_f, c_f, H)
            h_b, c_b = _lstm_cell(gates_in[rt * B:(rt + 1) * B, 4 * H:8 * H] + rec_b, c_b, H)
            fwd[t] = h_f
            bwd[rt] = h_b                             # bwd hidden belongs to seq position rt

        if l + 1 < n_layers:
            # Next layer consumes time-major (T*B, 2H): three concats, no reshuffles.
            cur = jnp.concatenate(
                [jnp.concatenate(fwd, axis=0), jnp.concatenate(bwd, axis=0)], axis=-1)
        else:
            # Final output: batch-major (B, T*2H) lane-dense single full-block store.
            pieces = []
            for s in range(T):
                pieces.append(fwd[s])
                pieces.append(bwd[s])
            o_ref[...] = jnp.concatenate(pieces, axis=-1)       # (B, T*2H)


def lstm_stack(x_tm, layers, *, seq_len, batch, hidden):
    """x_tm: (T*B, D_in) time-major flattened input -> (B, T*2H) batch-major output."""
    n_layers = len(layers)
    flat = []
    for (wih, whh, b) in layers:
        flat += [wih, whh, b]
    vmem = pl.BlockSpec(memory_space=pltpu.MemorySpace.VMEM)
    return pl.pallas_call(
        functools.partial(_lstm_stack_kernel, n_layers=n_layers,
                          seq_len=seq_len, batch=batch, hidden=hidden),
        out_shape=jax.ShapeDtypeStruct((batch, seq_len * 2 * hidden), jnp.float32),
        in_specs=[vmem] * (1 + 3 * n_layers),
        out_specs=vmem,
        compiler_params=pltpu.CompilerParams(vmem_limit_bytes=_VMEM_LIMIT),
    )(x_tm, *flat)


# ----------------------------------------------------------------------------
# Kernel 2: attention + LN1 + FFN + LN2 + date/amount + combine + pool + head
#           (grid over batch; one batch element per grid step)
# ----------------------------------------------------------------------------
def _attn_head_kernel(x_ref, da_ref,
                      wqkv_ref, bqkv_ref, wo_ref, bo_ref,
                      g1_ref, be1_ref, w1_ref, b1_ref, w2_ref, b2_ref,
                      g2_ref, be2_ref,
                      wda_ref, bda_ref, wcx_ref, wcf_ref, bc_ref,
                      wf1_ref, bf1_ref, wf2_ref, bf2_ref, wf3_ref, bf3_ref,
                      o_ref, *, num_heads, eps):
    _, T, D2 = x_ref.shape
    hd = D2 // num_heads
    scale = 1.0 / float(hd) ** 0.5
    bf16 = jnp.bfloat16

    x = x_ref[0]                                      # (T, D2) f32 — one batch element
    xb = x.astype(bf16)

    # Fused Q|K|V projection.
    qkv = jnp.dot(xb, wqkv_ref[...], preferred_element_type=jnp.float32) + bqkv_ref[...]
    q = qkv[:, 0:D2]
    k = qkv[:, D2:2 * D2]
    v = qkv[:, 2 * D2:3 * D2]

    # Heads as a static loop of plain 2D MXU dots (batch handled by the grid).
    heads = []
    for h in range(num_heads):
        lo, hi = h * hd, (h + 1) * hd
        qh = q[:, lo:hi].astype(bf16)
        kh = k[:, lo:hi].astype(bf16)
        vh = v[:, lo:hi].astype(bf16)
        s = jnp.einsum('qd,kd->qk', qh, kh, preferred_element_type=jnp.float32) * scale
        s = s - jnp.max(s, axis=-1, keepdims=True)
        p = jnp.exp(s)
        p = p * pl.reciprocal(jnp.sum(p, axis=-1, keepdims=True), approx=True)
        heads.append(jnp.dot(p.astype(bf16), vh, preferred_element_type=jnp.float32))
    attn = jnp.concatenate(heads, axis=-1)            # (T, D2)
    attn_out = jnp.dot(attn.astype(bf16), wo_ref[...],
                       preferred_element_type=jnp.float32) + bo_ref[...]

    def _ln(y, g, b):
        mu = jnp.mean(y, axis=-1, keepdims=True)
        var = jnp.mean((y - mu) ** 2, axis=-1, keepdims=True)
        return (y - mu) * jax.lax.rsqrt(var + eps) * g + b

    out1 = _ln(x + attn_out, g1_ref[...], be1_ref[...])                       # LN1
    h1 = jnp.maximum(
        jnp.dot(out1.astype(bf16), w1_ref[...],
                preferred_element_type=jnp.float32) + b1_ref[...], 0.0)       # FF1 + ReLU
    ff = jnp.dot(h1.astype(bf16), w2_ref[...],
                 preferred_element_type=jnp.float32) + b2_ref[...]            # FF2
    out2 = _ln(out1 + ff, g2_ref[...], be2_ref[...])                          # LN2, (T, D2)

    # date/amount features: padded 8-lane input, lanes [0:H]=date_fc, [H:2H]=amount_fc.
    da = da_ref[0].astype(bf16)                                               # (T, 8)
    feat = jnp.maximum(
        jnp.dot(da, wda_ref[...], preferred_element_type=jnp.float32) + bda_ref[...], 0.0)

    # combine_features: cat([out2, feat]) @ Wc  ==  out2 @ Wc[:D2] + feat @ Wc[D2:]
    comb = (jnp.dot(out2.astype(bf16), wcx_ref[...], preferred_element_type=jnp.float32)
            + jnp.dot(feat.astype(bf16), wcf_ref[...], preferred_element_type=jnp.float32)
            + bc_ref[...])                                                    # (T, D2)
    pooled = jnp.max(comb, axis=0, keepdims=True)                             # (1, D2)

    z1 = jnp.maximum(
        jnp.dot(pooled.astype(bf16), wf1_ref[...],
                preferred_element_type=jnp.float32) + bf1_ref[...], 0.0)
    z2 = jnp.maximum(
        jnp.dot(z1.astype(bf16), wf2_ref[...],
                preferred_element_type=jnp.float32) + bf2_ref[...], 0.0)
    logits = jnp.dot(z2.astype(bf16), wf3_ref[...],
                     preferred_element_type=jnp.float32) + bf3_ref[...]       # (1, P)
    o_ref[...] = logits.reshape(1, 1, -1)


def attention_head_block(x, da, fp, *, num_heads):
    B, T, D2 = x.shape
    F = da.shape[-1]
    wqkv, bqkv = fp["qkv"]
    wo, bo = fp["attn_o"]
    g1, be1 = fp["ln1"]
    w1, b1 = fp["ff1"]
    w2, b2 = fp["ff2"]
    g2, be2 = fp["ln2"]
    wda, bda = fp["da"]
    wcx, wcf, bc = fp["combine_x"], fp["combine_f"], fp["combine_b"]
    wf1, bf1 = fp["fc1"]
    wf2, bf2 = fp["fc2"]
    wf3, bf3 = fp["fc3"]
    P = wf3.shape[1]

    weights = [wqkv, bqkv, wo, bo, g1, be1, w1, b1, w2, b2, g2, be2,
               wda, bda, wcx, wcf, bc, wf1, bf1, wf2, bf2, wf3, bf3]

    def _const(arr):
        nd = arr.ndim
        return pl.BlockSpec(arr.shape, lambda b, _nd=nd: (0,) * _nd)

    in_specs = ([pl.BlockSpec((1, T, D2), lambda b: (b, 0, 0)),
                 pl.BlockSpec((1, T, F), lambda b: (b, 0, 0))]
                + [_const(w) for w in weights])

    return pl.pallas_call(
        functools.partial(_attn_head_kernel, num_heads=num_heads, eps=1e-5),
        grid=(B,),
        out_shape=jax.ShapeDtypeStruct((B, 1, P), jnp.float32),
        in_specs=in_specs,
        out_specs=pl.BlockSpec((1, 1, P), lambda b: (b, 0, 0)),
        compiler_params=pltpu.CompilerParams(
            dimension_semantics=("parallel",),
            vmem_limit_bytes=_VMEM_LIMIT),
    )(x, da, *weights)


# ----------------------------------------------------------------------------
# Parameter initialization (synthetic) + one-time fusion into kernel layouts
# ----------------------------------------------------------------------------
def init_params(key, vocab_size, embedding_dim, hidden_dim, output_dim,
                n_layers, num_heads, num_tokens, max_transactions):
    state = {"key": key}

    def nxt():
        state["key"], sub = jax.random.split(state["key"])
        return sub

    def dense(in_f, out_f):
        w = jax.random.normal(nxt(), (in_f, out_f), jnp.float32) * 0.05
        b = jax.random.normal(nxt(), (out_f,), jnp.float32) * 0.05
        return (w, b)

    p = {}
    p["embedding"] = jax.random.normal(nxt(), (vocab_size, embedding_dim), jnp.float32) * 0.05
    p["pos_embedding"] = jax.random.normal(nxt(), (max_transactions, embedding_dim), jnp.float32) * 0.05
    p["date_fc"] = dense(6, hidden_dim)
    p["amount_fc"] = dense(1, hidden_dim)

    # NOTE: a real PyTorch port must transpose weight_ih/weight_hh ((4H, in) -> (in, 4H));
    # gate order i, f, g, o matches nn.LSTM; both b_ih and b_hh are generated and summed later.
    lstm_layers = []
    in_dim = embedding_dim * num_tokens
    for _ in range(n_layers):
        layer = {}
        for d in ("fwd", "bwd"):
            wih = jax.random.normal(nxt(), (in_dim, 4 * hidden_dim), jnp.float32) * 0.05
            whh = jax.random.normal(nxt(), (hidden_dim, 4 * hidden_dim), jnp.float32) * 0.05
            bih = jax.random.normal(nxt(), (4 * hidden_dim,), jnp.float32) * 0.05
            bhh = jax.random.normal(nxt(), (4 * hidden_dim,), jnp.float32) * 0.05
            layer[d] = (wih, whh, bih, bhh)
        lstm_layers.append(layer)
        in_dim = 2 * hidden_dim
    p["lstm"] = lstm_layers

    D = 2 * hidden_dim
    p["attn_q"] = dense(D, D)
    p["attn_k"] = dense(D, D)
    p["attn_v"] = dense(D, D)
    p["attn_o"] = dense(D, D)
    p["ln1"] = (jnp.ones((D,), jnp.float32), jnp.zeros((D,), jnp.float32))
    p["ln2"] = (jnp.ones((D,), jnp.float32), jnp.zeros((D,), jnp.float32))
    p["ff1"] = dense(D, 2 * D)
    p["ff2"] = dense(2 * D, D)
    p["combine"] = dense(4 * hidden_dim, D)
    p["fc1"] = dense(D, hidden_dim)
    p["fc2"] = dense(hidden_dim, hidden_dim // 2)
    p["fc3"] = dense(hidden_dim // 2, output_dim)
    return p


def fuse_params(p, hidden_dim):
    """One-time (outside jit) repack into fused, lane-padded bf16 layouts."""
    H = hidden_dim
    D2 = 2 * H
    bf16 = jnp.bfloat16
    fp = {"embedding": p["embedding"], "pos_embedding": p["pos_embedding"]}

    # date_fc (6->H) + amount_fc (1->H) merged block-diagonally; input padded to 8 lanes.
    wd, bd = p["date_fc"]
    wa, ba = p["amount_fc"]
    wda = jnp.zeros((8, D2), jnp.float32).at[:6, :H].set(wd).at[6:7, H:].set(wa)
    fp["da"] = (wda.astype(bf16), jnp.concatenate([bd, ba]).reshape(1, D2))

    # LSTM: concat W_ih / W_hh along N per direction; sum b_ih + b_hh.
    layers = []
    for layer in p["lstm"]:
        wih_f, whh_f, bih_f, bhh_f = layer["fwd"]
        wih_b, whh_b, bih_b, bhh_b = layer["bwd"]
        wih = jnp.concatenate([wih_f, wih_b], axis=1).astype(bf16)            # (D_in, 8H)
        whh = jnp.concatenate([whh_f, whh_b], axis=1).astype(bf16)            # (H, 8H)
        b = jnp.concatenate([bih_f + bhh_f, bih_b + bhh_b]).reshape(1, 8 * H)
        layers.append((wih, whh, b))
    fp["lstm"] = layers

    # Fused QKV projection.
    (wq, bq), (wk, bk), (wv, bv) = p["attn_q"], p["attn_k"], p["attn_v"]
    fp["qkv"] = (jnp.concatenate([wq, wk, wv], axis=1).astype(bf16),
                 jnp.concatenate([bq, bk, bv]).reshape(1, 3 * D2))
    wo, bo = p["attn_o"]
    fp["attn_o"] = (wo.astype(bf16), bo.reshape(1, D2))
    fp["ln1"] = (p["ln1"][0].reshape(1, D2), p["ln1"][1].reshape(1, D2))
    fp["ln2"] = (p["ln2"][0].reshape(1, D2), p["ln2"][1].reshape(1, D2))
    w, b = p["ff1"];     fp["ff1"] = (w.astype(bf16), b.reshape(1, 4 * H))
    w, b = p["ff2"];     fp["ff2"] = (w.astype(bf16), b.reshape(1, D2))

    # combine_features split into the [out | date/amount-feature] halves.
    wc, bc = p["combine"]
    fp["combine_x"] = wc[:D2].astype(bf16)
    fp["combine_f"] = wc[D2:].astype(bf16)
    fp["combine_b"] = bc.reshape(1, D2)

    w, b = p["fc1"];     fp["fc1"] = (w.astype(bf16), b.reshape(1, H))
    w, b = p["fc2"];     fp["fc2"] = (w.astype(bf16), b.reshape(1, H // 2))

    # fc3 padded to a lane-dense 128-wide output (sliced back outside the kernel).
    w3, b3 = p["fc3"]
    out_dim = w3.shape[1]
    P = max(128, ((out_dim + 127) // 128) * 128)
    w3p = jnp.zeros((H // 2, P), jnp.float32).at[:, :out_dim].set(w3)
    b3p = jnp.zeros((P,), jnp.float32).at[:out_dim].set(b3)
    fp["fc3"] = (w3p.astype(bf16), b3p.reshape(1, P))
    return fp


# ----------------------------------------------------------------------------
# Forward pass (2 pallas_call launches total)
# ----------------------------------------------------------------------------
def forward(fp, dates, input_ids, amounts, *, hidden_dim, num_heads, output_dim):
    B, T, num_tokens = input_ids.shape
    E = fp["embedding"].shape[1]
    H = hidden_dim
    D2 = 2 * H

    # token + position embeddings (gather stays as XLA glue); dropout = identity (eval).
    token_embed = fp["embedding"][input_ids]                   # (B, T, nt, E)
    pos_embed = fp["pos_embedding"][jnp.arange(T)]             # (T, E)
    embedded = (token_embed + pos_embed[None, :, None, :]).reshape(B, T, num_tokens * E)

    # Fused LSTM stack: time-major input, batch-major (B, T*2H) output (no post-transpose).
    x_tm = jnp.transpose(embedded, (1, 0, 2)).reshape(T * B, num_tokens * E)
    lstm_flat = lstm_stack(x_tm, fp["lstm"], seq_len=T, batch=B, hidden=H)   # (B, T*2H)
    lstm_out = lstm_flat.reshape(B, T, D2)                     # free, layout-preserving

    # date/amount features input, padded to 8 lanes.
    da = jnp.concatenate([dates, amounts[..., None],
                          jnp.zeros((B, T, 1), dates.dtype)], axis=-1)        # (B, T, 8)

    # Fused attention + LN + FFN + LN + features + combine + max-pool + classifier.
    logits_p = attention_head_block(lstm_out, da, fp, num_heads=num_heads)    # (B, 1, P)
    return logits_p.reshape(B, -1)[:, :output_dim]


# ----------------------------------------------------------------------------
if __name__ == "__main__":
    vocab_size, embedding_dim, hidden_dim, output_dim = 50, 8, 32, 3
    n_layers, num_heads, num_tokens, max_transactions = 2, 4, 15, 100
    B, T = 2, 8

    key = jax.random.PRNGKey(0)
    kp, kd, ki, ka = jax.random.split(key, 4)
    params = init_params(kp, vocab_size, embedding_dim, hidden_dim, output_dim,
                         n_layers, num_heads, num_tokens, max_transactions)
    fused = fuse_params(params, hidden_dim)

    dates = jax.random.normal(kd, (B, T, 6), jnp.float32)
    input_ids = jax.random.randint(ki, (B, T, num_tokens), 0, vocab_size, dtype=jnp.int32)
    amounts = jax.random.normal(ka, (B, T), jnp.float32)

    fwd = jax.jit(functools.partial(forward, hidden_dim=hidden_dim,
                                    num_heads=num_heads, output_dim=output_dim))
    logits = fwd(fused, dates, input_ids, amounts)
    jax.block_until_ready(logits)
    assert logits.shape == (B, output_dim), logits.shape
    print("KERNEL_OK")
</pallas_src>

<mosaic_0001>
module attributes {stable_mosaic.version = 11 : i64} {
  func.func @_lstm_stack_kernel(%arg0: memref<16x120xf32, #tpu.memory_space<vmem>>, %arg1: memref<120x256xbf16, #tpu.memory_space<vmem>>, %arg2: memref<32x256xbf16, #tpu.memory_space<vmem>>, %arg3: memref<1x256xf32, #tpu.memory_space<vmem>>, %arg4: memref<64x256xbf16, #tpu.memory_space<vmem>>, %arg5: memref<32x256xbf16, #tpu.memory_space<vmem>>, %arg6: memref<1x256xf32, #tpu.memory_space<vmem>>, %arg7: memref<2x512xf32, #tpu.memory_space<vmem>>) attributes {dimension_semantics = [], scalar_prefetch = 0 : i64, scratch_operands = 0 : i64, tpu.core_type = #tpu.core_type<tc>} {
    %c0 = arith.constant 0 : index
    %c0_0 = arith.constant 0 : index
    %0 = vector.load %arg0[%c0, %c0_0] : memref<16x120xf32, #tpu.memory_space<vmem>>, vector<16x120xf32>
    %1 = arith.truncf %0 : vector<16x120xf32> to vector<16x120xbf16>
    %c0_1 = arith.constant 0 : index
    %c0_2 = arith.constant 0 : index
    %2 = vector.load %arg1[%c0_1, %c0_2] : memref<120x256xbf16, #tpu.memory_space<vmem>>, vector<120x256xbf16>
    %cst = arith.constant dense<0.000000e+00> : vector<16x256xf32>
    %3 = tpu.matmul %1, %2, %cst {dimension_numbers = #tpu.dot_dimension_numbers<[1], [0], [0], [1], [0, 0, 1, 1], [], []>} : vector<16x120xbf16>, vector<120x256xbf16>, vector<16x256xf32> -> vector<16x256xf32>
    %c0_3 = arith.constant 0 : index
    %c0_4 = arith.constant 0 : index
    %4 = vector.load %arg3[%c0_3, %c0_4] : memref<1x256xf32, #tpu.memory_space<vmem>>, vector<1x256xf32>
    %5 = vector.broadcast %4 : vector<1x256xf32> to vector<16x256xf32>
    %6 = arith.addf %3, %5 : vector<16x256xf32>
    %c0_5 = arith.constant 0 : index
    %c0_6 = arith.constant 0 : index
    %7 = vector.load %arg2[%c0_5, %c0_6] : memref<32x256xbf16, #tpu.memory_space<vmem>>, vector<32x256xbf16>
    %cst_7 = arith.constant 0.000000e+00 : f32
    %8 = vector.broadcast %cst_7 : f32 to vector<2x32xf32>
    %cst_8 = arith.constant 0.000000e+00 : f32
    %9 = vector.broadcast %cst_8 : f32 to vector<2x32xf32>
    %cst_9 = arith.constant 0.000000e+00 : f32
    %10 = vector.broadcast %cst_9 : f32 to vector<2x32xf32>
    %cst_10 = arith.constant 0.000000e+00 : f32
    %11 = vector.broadcast %cst_10 : f32 to vector<2x32xf32>
    %12 = arith.truncf %8 : vector<2x32xf32> to vector<2x32xbf16>
    %13 = vector.extract_strided_slice %7 {offsets = [0, 0], sizes = [32, 128], strides = [1, 1]} : vector<32x256xbf16> to vector<32x128xbf16>
    %cst_11 = arith.constant dense<0.000000e+00> : vector<2x128xf32>
    %14 = tpu.matmul %12, %13, %cst_11 {dimension_numbers = #tpu.dot_dimension_numbers<[1], [0], [0], [1], [0, 0, 1, 1], [], []>} : vector<2x32xbf16>, vector<32x128xbf16>, vector<2x128xf32> -> vector<2x128xf32>
    %15 = arith.truncf %10 : vector<2x32xf32> to vector<2x32xbf16>
    %16 = vector.extract_strided_slice %7 {offsets = [0, 128], sizes = [32, 128], strides = [1, 1]} : vector<32x256xbf16> to vector<32x128xbf16>
    %cst_12 = arith.constant dense<0.000000e+00> : vector<2x128xf32>
    %17 = tpu.matmul %15, %16, %cst_12 {dimension_numbers = #tpu.dot_dimension_numbers<[1], [0], [0], [1], [0, 0, 1, 1], [], []>} : vector<2x32xbf16>, vector<32x128xbf16>, vector<2x128xf32> -> vector<2x128xf32>
    %18 = vector.extract_strided_slice %6 {offsets = [0, 0], sizes = [2, 128], strides = [1, 1]} : vector<16x256xf32> to vector<2x128xf32>
    %19 = arith.addf %18, %14 : vector<2x128xf32>
    %20 = tpu.iota {dimensions = array<i32: 1>} : vector<2x128xi32>
    %c64_i32 = arith.constant 64 : i32
    %21 = vector.broadcast %c64_i32 : i32 to vector<2x128xi32>
    %22 = arith.cmpi sge, %20, %21 : vector<2x128xi32>
    %c96_i32 = arith.constant 96 : i32
    %23 = vector.broadcast %c96_i32 : i32 to vector<2x128xi32>
    %24 = arith.cmpi slt, %20, %23 : vector<2x128xi32>
    %25 = arith.andi %22, %24 : vector<2x128xi1>
    %26 = math.tanh %19 : vector<2x128xf32>
    %27 = arith.negf %19 : vector<2x128xf32>
    %28 = math.exp %27 : vector<2x128xf32>
    %cst_13 = arith.constant 1.000000e+00 : f32
    %29 = vector.broadcast %cst_13 : f32 to vector<2x128xf32>
    %30 = arith.addf %29, %28 : vector<2x128xf32>
    %31 = arith.divf %29, %30 : vector<2x128xf32>
    %32 = arith.select %25, %26, %31 : vector<2x128xi1>, vector<2x128xf32>
    %33 = vector.extract_strided_slice %32 {offsets = [0, 0], sizes = [2, 32], strides = [1, 1]} : vector<2x128xf32> to vector<2x32xf32>
    %34 = vector.extract_strided_slice %32 {offsets = [0, 32], sizes = [2, 32], strides = [1, 1]} : vector<2x128xf32> to vector<2x32xf32>
    %35 = vector.extract_strided_slice %32 {offsets = [0, 64], sizes = [2, 32], strides = [1, 1]} : vector<2x128xf32> to vector<2x32xf32>
    %36 = vector.extract_strided_slice %32 {offsets = [0, 96], sizes = [2, 32], strides = [1, 1]} : vector<2x128xf32> to vector<2x32xf32>
    %37 = arith.mulf %34, %9 : vector<2x32xf32>
    %38 = arith.mulf %33, %35 : vector<2x32xf32>
    %39 = arith.addf %37, %38 : vector<2x32xf32>
    %40 = math.tanh %39 : vector<2x32xf32>
    %41 = arith.mulf %36, %40 : vector<2x32xf32>
    %42 = vector.extract_strided_slice %6 {offsets = [14, 128], sizes = [2, 128], strides = [1, 1]} : vector<16x256xf32> to vector<2x128xf32>
    %43 = arith.addf %42, %17 : vector<2x128xf32>
    %44 = tpu.iota {dimensions = array<i32: 1>} : vector<2x128xi32>
    %c64_i32_14 = arith.constant 64 : i32
    %45 = vector.broadcast %c64_i32_14 : i32 to vector<2x128xi32>
    %46 = arith.cmpi sge, %44, %45 : vector<2x128xi32>
    %c96_i32_15 = arith.constant 96 : i32
    %47 = vector.broadcast %c96_i32_15 : i32 to vector<2x128xi32>
    %48 = arith.cmpi slt, %44, %47 : vector<2x128xi32>
    %49 = arith.andi %46, %48 : vector<2x128xi1>
    %50 = math.tanh %43 : vector<2x128xf32>
    %51 = arith.negf %43 : vector<2x128xf32>
    %52 = math.exp %51 : vector<2x128xf32>
    %cst_16 = arith.constant 1.000000e+00 : f32
    %53 = vector.broadcast %cst_16 : f32 to vector<2x128xf32>
    %54 = arith.addf %53, %52 : vector<2x128xf32>
    %55 = arith.divf %53, %54 : vector<2x128xf32>
    %56 = arith.select %49, %50, %55 : vector<2x128xi1>, vector<2x128xf32>
    %57 = vector.extract_strided_slice %56 {offsets = [0, 0], sizes = [2, 32], strides = [1, 1]} : vector<2x128xf32> to vector<2x32xf32>
    %58 = vector.extract_strided_slice %56 {offsets = [0, 32], sizes = [2, 32], strides = [1, 1]} : vector<2x128xf32> to vector<2x32xf32>
    %59 = vector.extract_strided_slice %56 {offsets = [0, 64], sizes = [2, 32], strides = [1, 1]} : vector<2x128xf32> to vector<2x32xf32>
    %60 = vector.extract_strided_slice %56 {offsets = [0, 96], sizes = [2, 32], strides = [1, 1]} : vector<2x128xf32> to vector<2x32xf32>
    %61 = arith.mulf %58, %11 : vector<2x32xf32>
    %62 = arith.mulf %57, %59 : vector<2x32xf32>
    %63 = arith.addf %61, %62 : vector<2x32xf32>
    %64 = math.tanh %63 : vector<2x32xf32>
    %65 = arith.mulf %60, %64 : vector<2x32xf32>
    %66 = arith.truncf %41 : vector<2x32xf32> to vector<2x32xbf16>
    %67 = vector.extract_strided_slice %7 {offsets = [0, 0], sizes = [32, 128], strides = [1, 1]} : vector<32x256xbf16> to vector<32x128xbf16>
    %cst_17 = arith.constant dense<0.000000e+00> : vector<2x128xf32>
    %68 = tpu.matmul %66, %67, %cst_17 {dimension_numbers = #tpu.dot_dimension_numbers<[1], [0], [0], [1], [0, 0, 1, 1], [], []>} : vector<2x32xbf16>, vector<32x128xbf16>, vector<2x128xf32> -> vector<2x128xf32>
    %69 = arith.truncf %65 : vector<2x32xf32> to vector<2x32xbf16>
    %70 = vector.extract_strided_slice %7 {offsets = [0, 128], sizes = [32, 128], strides = [1, 1]} : vector<32x256xbf16> to vector<32x128xbf16>
    %cst_18 = arith.constant dense<0.000000e+00> : vector<2x128xf32>
    %71 = tpu.matmul %69, %70, %cst_18 {dimension_numbers = #tpu.dot_dimension_numbers<[1], [0], [0], [1], [0, 0, 1, 1], [], []>} : vector<2x32xbf16>, vector<32x128xbf16>, vector<2x128xf32> -> vector<2x128xf32>
    %72 = vector.extract_strided_slice %6 {offsets = [2, 0], sizes = [2, 128], strides = [1, 1]} : vector<16x256xf32> to vector<2x128xf32>
    %73 = arith.addf %72, %68 : vector<2x128xf32>
    %74 = tpu.iota {dimensions = array<i32: 1>} : vector<2x128xi32>
    %c64_i32_19 = arith.constant 64 : i32
    %75 = vector.broadcast %c64_i32_19 : i32 to vector<2x128xi32>
    %76 = arith.cmpi sge, %74, %75 : vector<2x128xi32>
    %c96_i32_20 = arith.constant 96 : i32
    %77 = vector.broadcast %c96_i32_20 : i32 to vector<2x128xi32>
    %78 = arith.cmpi slt, %74, %77 : vector<2x128xi32>
    %79 = arith.andi %76, %78 : vector<2x128xi1>
    %80 = math.tanh %73 : vector<2x128xf32>
    %81 = arith.negf %73 : vector<2x128xf32>
    %82 = math.exp %81 : vector<2x128xf32>
    %cst_21 = arith.constant 1.000000e+00 : f32
    %83 = vector.broadcast %cst_21 : f32 to vector<2x128xf32>
    %84 = arith.addf %83, %82 : vector<2x128xf32>
    %85 = arith.divf %83, %84 : vector<2x128xf32>
    %86 = arith.select %79, %80, %85 : vector<2x128xi1>, vector<2x128xf32>
    %87 = vector.extract_strided_slice %86 {offsets = [0, 0], sizes = [2, 32], strides = [1, 1]} : vector<2x128xf32> to vector<2x32xf32>
    %88 = vector.extract_strided_slice %86 {offsets = [0, 32], sizes = [2, 32], strides = [1, 1]} : vector<2x128xf32> to vector<2x32xf32>
    %89 = vector.extract_strided_slice %86 {offsets = [0, 64], sizes = [2, 32], strides = [1, 1]} : vector<2x128xf32> to vector<2x32xf32>
    %90 = vector.extract_strided_slice %86 {offsets = [0, 96], sizes = [2, 32], strides = [1, 1]} : vector<2x128xf32> to vector<2x32xf32>
    %91 = arith.mulf %88, %39 : vector<2x32xf32>
    %92 = arith.mulf %87, %89 : vector<2x32xf32>
    %93 = arith.addf %91, %92 : vector<2x32xf32>
    %94 = math.tanh %93 : vector<2x32xf32>
    %95 = arith.mulf %90, %94 : vector<2x32xf32>
    %96 = vector.extract_strided_slice %6 {offsets = [12, 128], sizes = [2, 128], strides = [1, 1]} : vector<16x256xf32> to vector<2x128xf32>
    %97 = arith.addf %96, %71 : vector<2x128xf32>
    %98 = tpu.iota {dimensions = array<i32: 1>} : vector<2x128xi32>
    %c64_i32_22 = arith.constant 64 : i32
    %99 = vector.broadcast %c64_i32_22 : i32 to vector<2x128xi32>
    %100 = arith.cmpi sge, %98, %99 : vector<2x128xi32>
    %c96_i32_23 = arith.constant 96 : i32
    %101 = vector.broadcast %c96_i32_23 : i32 to vector<2x128xi32>
    %102 = arith.cmpi slt, %98, %101 : vector<2x128xi32>
    %103 = arith.andi %100, %102 : vector<2x128xi1>
    %104 = math.tanh %97 : vector<2x128xf32>
    %105 = arith.negf %97 : vector<2x128xf32>
    %106 = math.exp %105 : vector<2x128xf32>
    %cst_24 = arith.constant 1.000000e+00 : f32
    %107 = vector.broadcast %cst_24 : f32 to vector<2x128xf32>
    %108 = arith.addf %107, %106 : vector<2x128xf32>
    %109 = arith.divf %107, %108 : vector<2x128xf32>
    %110 = arith.select %103, %104, %109 : vector<2x128xi1>, vector<2x128xf32>
    %111 = vector.extract_strided_slice %110 {offsets = [0, 0], sizes = [2, 32], strides = [1, 1]} : vector<2x128xf32> to vector<2x32xf32>
    %112 = vector.extract_strided_slice %110 {offsets = [0, 32], sizes = [2, 32], strides = [1, 1]} : vector<2x128xf32> to vector<2x32xf32>
    %113 = vector.extract_strided_slice %110 {offsets = [0, 64], sizes = [2, 32], strides = [1, 1]} : vector<2x128xf32> to vector<2x32xf32>
    %114 = vector.extract_strided_slice %110 {offsets = [0, 96], sizes = [2, 32], strides = [1, 1]} : vector<2x128xf32> to vector<2x32xf32>
    %115 = arith.mulf %112, %63 : vector<2x32xf32>
    %116 = arith.mulf %111, %113 : vector<2x32xf32>
    %117 = arith.addf %115, %116 : vector<2x32xf32>
    %118 = math.tanh %117 : vector<2x32xf32>
    %119 = arith.mulf %114, %118 : vector<2x32xf32>
    %120 = arith.truncf %95 : vector<2x32xf32> to vector<2x32xbf16>
    %121 = vector.extract_strided_slice %7 {offsets = [0, 0], sizes = [32, 128], strides = [1, 1]} : vector<32x256xbf16> to vector<32x128xbf16>
    %cst_25 = arith.constant dense<0.000000e+00> : vector<2x128xf32>
    %122 = tpu.matmul %120, %121, %cst_25 {dimension_numbers = #tpu.dot_dimension_numbers<[1], [0], [0], [1], [0, 0, 1, 1], [], []>} : vector<2x32xbf16>, vector<32x128xbf16>, vector<2x128xf32> -> vector<2x128xf32>
    %123 = arith.truncf %119 : vector<2x32xf32> to vector<2x32xbf16>
    %124 = vector.extract_strided_slice %7 {offsets = [0, 128], sizes = [32, 128], strides = [1, 1]} : vector<32x256xbf16> to vector<32x128xbf16>
    %cst_26 = arith.constant dense<0.000000e+00> : vector<2x128xf32>
    %125 = tpu.matmul %123, %124, %cst_26 {dimension_numbers = #tpu.dot_dimension_numbers<[1], [0], [0], [1], [0, 0, 1, 1], [], []>} : vector<2x32xbf16>, vector<32x128xbf16>, vector<2x128xf32> -> vector<2x128xf32>
    %126 = vector.extract_strided_slice %6 {offsets = [4, 0], sizes = [2, 128], strides = [1, 1]} : vector<16x256xf32> to vector<2x128xf32>
    %127 = arith.addf %126, %122 : vector<2x128xf32>
    %128 = tpu.iota {dimensions = array<i32: 1>} : vector<2x128xi32>
    %c64_i32_27 = arith.constant 64 : i32
    %129 = vector.broadcast %c64_i32_27 : i32 to vector<2x128xi32>
    %130 = arith.cmpi sge, %128, %129 : vector<2x128xi32>
    %c96_i32_28 = arith.constant 96 : i32
    %131 = vector.broadcast %c96_i32_28 : i32 to vector<2x128xi32>
    %132 = arith.cmpi slt, %128, %131 : vector<2x128xi32>
    %133 = arith.andi %130, %132 : vector<2x128xi1>
    %134 = math.tanh %127 : vector<2x128xf32>
    %135 = arith.negf %127 : vector<2x128xf32>
    %136 = math.exp %135 : vector<2x128xf32>
    %cst_29 = arith.constant 1.000000e+00 : f32
    %137 = vector.broadcast %cst_29 : f32 to vector<2x128xf32>
    %138 = arith.addf %137, %136 : vector<2x128xf32>
    %139 = arith.divf %137, %138 : vector<2x128xf32>
    %140 = arith.select %133, %134, %139 : vector<2x128xi1>, vector<2x128xf32>
    %141 = vector.extract_strided_slice %140 {offsets = [0, 0], sizes = [2, 32], strides = [1, 1]} : vector<2x128xf32> to vector<2x32xf32>
    %142 = vector.extract_strided_slice %140 {offsets = [0, 32], sizes = [2, 32], strides = [1, 1]} : vector<2x128xf32> to vector<2x32xf32>
    %143 = vector.extract_strided_slice %140 {offsets = [0, 64], sizes = [2, 32], strides = [1, 1]} : vector<2x128xf32> to vector<2x32xf32>
    %144 = vector.extract_strided_slice %140 {offsets = [0, 96], sizes = [2, 32], strides = [1, 1]} : vector<2x128xf32> to vector<2x32xf32>
    %145 = arith.mulf %142, %93 : vector<2x32xf32>
    %146 = arith.mulf %141, %143 : vector<2x32xf32>
    %147 = arith.addf %145, %146 : vector<2x32xf32>
    %148 = math.tanh %147 : vector<2x32xf32>
    %149 = arith.mulf %144, %148 : vector<2x32xf32>
    %150 = vector.extract_strided_slice %6 {offsets = [10, 128], sizes = [2, 128], strides = [1, 1]} : vector<16x256xf32> to vector<2x128xf32>
    %151 = arith.addf %150, %125 : vector<2x128xf32>
    %152 = tpu.iota {dimensions = array<i32: 1>} : vector<2x128xi32>
    %c64_i32_30 = arith.constant 64 : i32
    %153 = vector.broadcast %c64_i32_30 : i32 to vector<2x128xi32>
    %154 = arith.cmpi sge, %152, %153 : vector<2x128xi32>
    %c96_i32_31 = arith.constant 96 : i32
    %155 = vector.broadcast %c96_i32_31 : i32 to vector<2x128xi32>
    %156 = arith.cmpi slt, %152, %155 : vector<2x128xi32>
    %157 = arith.andi %154, %156 : vector<2x128xi1>
    %158 = math.tanh %151 : vector<2x128xf32>
    %159 = arith.negf %151 : vector<2x128xf32>
    %160 = math.exp %159 : vector<2x128xf32>
    %cst_32 = arith.constant 1.000000e+00 : f32
    %161 = vector.broadcast %cst_32 : f32 to vector<2x128xf32>
    %162 = arith.addf %161, %160 : vector<2x128xf32>
    %163 = arith.divf %161, %162 : vector<2x128xf32>
    %164 = arith.select %157, %158, %163 : vector<2x128xi1>, vector<2x128xf32>
    %165 = vector.extract_strided_slice %164 {offsets = [0, 0], sizes = [2, 32], strides = [1, 1]} : vector<2x128xf32> to vector<2x32xf32>
    %166 = vector.extract_strided_slice %164 {offsets = [0, 32], sizes = [2, 32], strides = [1, 1]} : vector<2x128xf32> to vector<2x32xf32>
    %167 = vector.extract_strided_slice %164 {offsets = [0, 64], sizes = [2, 32], strides = [1, 1]} : vector<2x128xf32> to vector<2x32xf32>
    %168 = vector.extract_strided_slice %164 {offsets = [0, 96], sizes = [2, 32], strides = [1, 1]} : vector<2x128xf32> to vector<2x32xf32>
    %169 = arith.mulf %166, %117 : vector<2x32xf32>
    %170 = arith.mulf %165, %167 : vector<2x32xf32>
    %171 = arith.addf %169, %170 : vector<2x32xf32>
    %172 = math.tanh %171 : vector<2x32xf32>
    %173 = arith.mulf %168, %172 : vector<2x32xf32>
    %174 = arith.truncf %149 : vector<2x32xf32> to vector<2x32xbf16>
    %175 = vector.extract_strided_slice %7 {offsets = [0, 0], sizes = [32, 128], strides = [1, 1]} : vector<32x256xbf16> to vector<32x128xbf16>
    %cst_33 = arith.constant dense<0.000000e+00> : vector<2x128xf32>
    %176 = tpu.matmul %174, %175, %cst_33 {dimension_numbers = #tpu.dot_dimension_numbers<[1], [0], [0], [1], [0, 0, 1, 1], [], []>} : vector<2x32xbf16>, vector<32x128xbf16>, vector<2x128xf32> -> vector<2x128xf32>
    %177 = arith.truncf %173 : vector<2x32xf32> to vector<2x32xbf16>
    %178 = vector.extract_strided_slice %7 {offsets = [0, 128], sizes = [32, 128], strides = [1, 1]} : vector<32x256xbf16> to vector<32x128xbf16>
    %cst_34 = arith.constant dense<0.000000e+00> : vector<2x128xf32>
    %179 = tpu.matmul %177, %178, %cst_34 {dimension_numbers = #tpu.dot_dimension_numbers<[1], [0], [0], [1], [0, 0, 1, 1], [], []>} : vector<2x32xbf16>, vector<32x128xbf16>, vector<2x128xf32> -> vector<2x128xf32>
    %180 = vector.extract_strided_slice %6 {offsets = [6, 0], sizes = [2, 128], strides = [1, 1]} : vector<16x256xf32> to vector<2x128xf32>
    %181 = arith.addf %180, %176 : vector<2x128xf32>
    %182 = tpu.iota {dimensions = array<i32: 1>} : vector<2x128xi32>
    %c64_i32_35 = arith.constant 64 : i32
    %183 = vector.broadcast %c64_i32_35 : i32 to vector<2x128xi32>
    %184 = arith.cmpi sge, %182, %183 : vector<2x128xi32>
    %c96_i32_36 = arith.constant 96 : i32
    %185 = vector.broadcast %c96_i32_36 : i32 to vector<2x128xi32>
    %186 = arith.cmpi slt, %182, %185 : vector<2x128xi32>
    %187 = arith.andi %184, %186 : vector<2x128xi1>
    %188 = math.tanh %181 : vector<2x128xf32>
    %189 = arith.negf %181 : vector<2x128xf32>
    %190 = math.exp %189 : vector<2x128xf32>
    %cst_37 = arith.constant 1.000000e+00 : f32
    %191 = vector.broadcast %cst_37 : f32 to vector<2x128xf32>
    %192 = arith.addf %191, %190 : vector<2x128xf32>
    %193 = arith.divf %191, %192 : vector<2x128xf32>
    %194 = arith.select %187, %188, %193 : vector<2x128xi1>, vector<2x128xf32>
    %195 = vector.extract_strided_slice %194 {offsets = [0, 0], sizes = [2, 32], strides = [1, 1]} : vector<2x128xf32> to vector<2x32xf32>
    %196 = vector.extract_strided_slice %194 {offsets = [0, 32], sizes = [2, 32], strides = [1, 1]} : vector<2x128xf32> to vector<2x32xf32>
    %197 = vector.extract_strided_slice %194 {offsets = [0, 64], sizes = [2, 32], strides = [1, 1]} : vector<2x128xf32> to vector<2x32xf32>
    %198 = vector.extract_strided_slice %194 {offsets = [0, 96], sizes = [2, 32], strides = [1, 1]} : vector<2x128xf32> to vector<2x32xf32>
    %199 = arith.mulf %196, %147 : vector<2x32xf32>
    %200 = arith.mulf %195, %197 : vector<2x32xf32>
    %201 = arith.addf %199, %200 : vector<2x32xf32>
    %202 = math.tanh %201 : vector<2x32xf32>
    %203 = arith.mulf %198, %202 : vector<2x32xf32>
    %204 = vector.extract_strided_slice %6 {offsets = [8, 128], sizes = [2, 128], strides = [1, 1]} : vector<16x256xf32> to vector<2x128xf32>
    %205 = arith.addf %204, %179 : vector<2x128xf32>
    %206 = tpu.iota {dimensions = array<i32: 1>} : vector<2x128xi32>
    %c64_i32_38 = arith.constant 64 : i32
    %207 = vector.broadcast %c64_i32_38 : i32 to vector<2x128xi32>
    %208 = arith.cmpi sge, %206, %207 : vector<2x128xi32>
    %c96_i32_39 = arith.constant 96 : i32
    %209 = vector.broadcast %c96_i32_39 : i32 to vector<2x128xi32>
    %210 = arith.cmpi slt, %206, %209 : vector<2x128xi32>
    %211 = arith.andi %208, %210 : vector<2x128xi1>
    %212 = math.tanh %205 : vector<2x128xf32>
    %213 = arith.negf %205 : vector<2x128xf32>
    %214 = math.exp %213 : vector<2x128xf32>
    %cst_40 = arith.constant 1.000000e+00 : f32
    %215 = vector.broadcast %cst_40 : f32 to vector<2x128xf32>
    %216 = arith.addf %215, %214 : vector<2x128xf32>
    %217 = arith.divf %215, %216 : vector<2x128xf32>
    %218 = arith.select %211, %212, %217 : vector<2x128xi1>, vector<2x128xf32>
    %219 = vector.extract_strided_slice %218 {offsets = [0, 0], sizes = [2, 32], strides = [1, 1]} : vector<2x128xf32> to vector<2x32xf32>
    %220 = vector.extract_strided_slice %218 {offsets = [0, 32], sizes = [2, 32], strides = [1, 1]} : vector<2x128xf32> to vector<2x32xf32>
    %221 = vector.extract_strided_slice %218 {offsets = [0, 64], sizes = [2, 32], strides = [1, 1]} : vector<2x128xf32> to vector<2x32xf32>
    %222 = vector.extract_strided_slice %218 {offsets = [0, 96], sizes = [2, 32], strides = [1, 1]} : vector<2x128xf32> to vector<2x32xf32>
    %223 = arith.mulf %220, %171 : vector<2x32xf32>
    %224 = arith.mulf %219, %221 : vector<2x32xf32>
    %225 = arith.addf %223, %224 : vector<2x32xf32>
    %226 = math.tanh %225 : vector<2x32xf32>
    %227 = arith.mulf %222, %226 : vector<2x32xf32>
    %228 = arith.truncf %203 : vector<2x32xf32> to vector<2x32xbf16>
    %229 = vector.extract_strided_slice %7 {offsets = [0, 0], sizes = [32, 128], strides = [1, 1]} : vector<32x256xbf16> to vector<32x128xbf16>
    %cst_41 = arith.constant dense<0.000000e+00> : vector<2x128xf32>
    %230 = tpu.matmul %228, %229, %cst_41 {dimension_numbers = #tpu.dot_dimension_numbers<[1], [0], [0], [1], [0, 0, 1, 1], [], []>} : vector<2x32xbf16>, vector<32x128xbf16>, vector<2x128xf32> -> vector<2x128xf32>
    %231 = arith.truncf %227 : vector<2x32xf32> to vector<2x32xbf16>
    %232 = vector.extract_strided_slice %7 {offsets = [0, 128], sizes = [32, 128], strides = [1, 1]} : vector<32x256xbf16> to vector<32x128xbf16>
    %cst_42 = arith.constant dense<0.000000e+00> : vector<2x128xf32>
    %233 = tpu.matmul %231, %232, %cst_42 {dimension_numbers = #tpu.dot_dimension_numbers<[1], [0], [0], [1], [0, 0, 1, 1], [], []>} : vector<2x32xbf16>, vector<32x128xbf16>, vector<2x128xf32> -> vector<2x128xf32>
    %234 = vector.extract_strided_slice %6 {offsets = [8, 0], sizes = [2, 128], strides = [1, 1]} : vector<16x256xf32> to vector<2x128xf32>
    %235 = arith.addf %234, %230 : vector<2x128xf32>
    %236 = tpu.iota {dimensions = array<i32: 1>} : vector<2x128xi32>
    %c64_i32_43 = arith.constant 64 : i32
    %237 = vector.broadcast %c64_i32_43 : i32 to vector<2x128xi32>
    %238 = arith.cmpi sge, %236, %237 : vector<2x128xi32>
    %c96_i32_44 = arith.constant 96 : i32
    %239 = vector.broadcast %c96_i32_44 : i32 to vector<2x128xi32>
    %240 = arith.cmpi slt, %236, %239 : vector<2x128xi32>
    %241 = arith.andi %238, %240 : vector<2x128xi1>
    %242 = math.tanh %235 : vector<2x128xf32>
    %243 = arith.negf %235 : vector<2x128xf32>
    %244 = math.exp %243 : vector<2x128xf32>
    %cst_45 = arith.constant 1.000000e+00 : f32
    %245 = vector.broadcast %cst_45 : f32 to vector<2x128xf32>
    %246 = arith.addf %245, %244 : vector<2x128xf32>
    %247 = arith.divf %245, %246 : vector<2x128xf32>
    %248 = arith.select %241, %242, %247 : vector<2x128xi1>, vector<2x128xf32>
    %249 = vector.extract_strided_slice %248 {offsets = [0, 0], sizes = [2, 32], strides = [1, 1]} : vector<2x128xf32> to vector<2x32xf32>
    %250 = vector.extract_strided_slice %248 {offsets = [0, 32], sizes = [2, 32], strides = [1, 1]} : vector<2x128xf32> to vector<2x32xf32>
    %251 = vector.extract_strided_slice %248 {offsets = [0, 64], sizes = [2, 32], strides = [1, 1]} : vector<2x128xf32> to vector<2x32xf32>
    %252 = vector.extract_strided_slice %248 {offsets = [0, 96], sizes = [2, 32], strides = [1, 1]} : vector<2x128xf32> to vector<2x32xf32>
    %253 = arith.mulf %250, %201 : vector<2x32xf32>
    %254 = arith.mulf %249, %251 : vector<2x32xf32>
    %255 = arith.addf %253, %254 : vector<2x32xf32>
    %256 = math.tanh %255 : vector<2x32xf32>
    %257 = arith.mulf %252, %256 : vector<2x32xf32>
    %258 = vector.extract_strided_slice %6 {offsets = [6, 128], sizes = [2, 128], strides = [1, 1]} : vector<16x256xf32> to vector<2x128xf32>
    %259 = arith.addf %258, %233 : vector<2x128xf32>
    %260 = tpu.iota {dimensions = array<i32: 1>} : vector<2x128xi32>
    %c64_i32_46 = arith.constant 64 : i32
    %261 = vector.broadcast %c64_i32_46 : i32 to vector<2x128xi32>
    %262 = arith.cmpi sge, %260, %261 : vector<2x128xi32>
    %c96_i32_47 = arith.constant 96 : i32
    %263 = vector.broadcast %c96_i32_47 : i32 to vector<2x128xi32>
    %264 = arith.cmpi slt, %260, %263 : vector<2x128xi32>
    %265 = arith.andi %262, %264 : vector<2x128xi1>
    %266 = math.tanh %259 : vector<2x128xf32>
    %267 = arith.negf %259 : vector<2x128xf32>
    %268 = math.exp %267 : vector<2x128xf32>
    %cst_48 = arith.constant 1.000000e+00 : f32
    %269 = vector.broadcast %cst_48 : f32 to vector<2x128xf32>
    %270 = arith.addf %269, %268 : vector<2x128xf32>
    %271 = arith.divf %269, %270 : vector<2x128xf32>
    %272 = arith.select %265, %266, %271 : vector<2x128xi1>, vector<2x128xf32>
    %273 = vector.extract_strided_slice %272 {offsets = [0, 0], sizes = [2, 32], strides = [1, 1]} : vector<2x128xf32> to vector<2x32xf32>
    %274 = vector.extract_strided_slice %272 {offsets = [0, 32], sizes = [2, 32], strides = [1, 1]} : vector<2x128xf32> to vector<2x32xf32>
    %275 = vector.extract_strided_slice %272 {offsets = [0, 64], sizes = [2, 32], strides = [1, 1]} : vector<2x128xf32> to vector<2x32xf32>
    %276 = vector.extract_strided_slice %272 {offsets = [0, 96], sizes = [2, 32], strides = [1, 1]} : vector<2x128xf32> to vector<2x32xf32>
    %277 = arith.mulf %274, %225 : vector<2x32xf32>
    %278 = arith.mulf %273, %275 : vector<2x32xf32>
    %279 = arith.addf %277, %278 : vector<2x32xf32>
    %280 = math.tanh %279 : vector<2x32xf32>
    %281 = arith.mulf %276, %280 : vector<2x32xf32>
    %282 = arith.truncf %257 : vector<2x32xf32> to vector<2x32xbf16>
    %283 = vector.extract_strided_slice %7 {offsets = [0, 0], sizes = [32, 128], strides = [1, 1]} : vector<32x256xbf16> to vector<32x128xbf16>
    %cst_49 = arith.constant dense<0.000000e+00> : vector<2x128xf32>
    %284 = tpu.matmul %282, %283, %cst_49 {dimension_numbers = #tpu.dot_dimension_numbers<[1], [0], [0], [1], [0, 0, 1, 1], [], []>} : vector<2x32xbf16>, vector<32x128xbf16>, vector<2x128xf32> -> vector<2x128xf32>
    %285 = arith.truncf %281 : vector<2x32xf32> to vector<2x32xbf16>
    %286 = vector.extract_strided_slice %7 {offsets = [0, 128], sizes = [32, 128], strides = [1, 1]} : vector<32x256xbf16> to vector<32x128xbf16>
    %cst_50 = arith.constant dense<0.000000e+00> : vector<2x128xf32>
    %287 = tpu.matmul %285, %286, %cst_50 {dimension_numbers = #tpu.dot_dimension_numbers<[1], [0], [0], [1], [0, 0, 1, 1], [], []>} : vector<2x32xbf16>, vector<32x128xbf16>, vector<2x128xf32> -> vector<2x128xf32>
    %288 = vector.extract_strided_slice %6 {offsets = [10, 0], sizes = [2, 128], strides = [1, 1]} : vector<16x256xf32> to vector<2x128xf32>
    %289 = arith.addf %288, %284 : vector<2x128xf32>
    %290 = tpu.iota {dimensions = array<i32: 1>} : vector<2x128xi32>
    %c64_i32_51 = arith.constant 64 : i32
    %291 = vector.broadcast %c64_i32_51 : i32 to vector<2x128xi32>
    %292 = arith.cmpi sge, %290, %291 : vector<2x128xi32>
    %c96_i32_52 = arith.constant 96 : i32
    %293 = vector.broadcast %c96_i32_52 : i32 to vector<2x128xi32>
    %294 = arith.cmpi slt, %290, %293 : vector<2x128xi32>
    %295 = arith.andi %292, %294 : vector<2x128xi1>
    %296 = math.tanh %289 : vector<2x128xf32>
    %297 = arith.negf %289 : vector<2x128xf32>
    %298 = math.exp %297 : vector<2x128xf32>
    %cst_53 = arith.constant 1.000000e+00 : f32
    %299 = vector.broadcast %cst_53 : f32 to vector<2x128xf32>
    %300 = arith.addf %299, %298 : vector<2x128xf32>
    %301 = arith.divf %299, %300 : vector<2x128xf32>
    %302 = arith.select %295, %296, %301 : vector<2x128xi1>, vector<2x128xf32>
    %303 = vector.extract_strided_slice %302 {offsets = [0, 0], sizes = [2, 32], strides = [1, 1]} : vector<2x128xf32> to vector<2x32xf32>
    %304 = vector.extract_strided_slice %302 {offsets = [0, 32], sizes = [2, 32], strides = [1, 1]} : vector<2x128xf32> to vector<2x32xf32>
    %305 = vector.extract_strided_slice %302 {offsets = [0, 64], sizes = [2, 32], strides = [1, 1]} : vector<2x128xf32> to vector<2x32xf32>
    %306 = vector.extract_strided_slice %302 {offsets = [0, 96], sizes = [2, 32], strides = [1, 1]} : vector<2x128xf32> to vector<2x32xf32>
    %307 = arith.mulf %304, %255 : vector<2x32xf32>
    %308 = arith.mulf %303, %305 : vector<2x32xf32>
    %309 = arith.addf %307, %308 : vector<2x32xf32>
    %310 = math.tanh %309 : vector<2x32xf32>
    %311 = arith.mulf %306, %310 : vector<2x32xf32>
    %312 = vector.extract_strided_slice %6 {offsets = [4, 128], sizes = [2, 128], strides = [1, 1]} : vector<16x256xf32> to vector<2x128xf32>
    %313 = arith.addf %312, %287 : vector<2x128xf32>
    %314 = tpu.iota {dimensions = array<i32: 1>} : vector<2x128xi32>
    %c64_i32_54 = arith.constant 64 : i32
    %315 = vector.broadcast %c64_i32_54 : i32 to vector<2x128xi32>
    %316 = arith.cmpi sge, %314, %315 : vector<2x128xi32>
    %c96_i32_55 = arith.constant 96 : i32
    %317 = vector.broadcast %c96_i32_55 : i32 to vector<2x128xi32>
    %318 = arith.cmpi slt, %314, %317 : vector<2x128xi32>
    %319 = arith.andi %316, %318 : vector<2x128xi1>
    %320 = math.tanh %313 : vector<2x128xf32>
    %321 = arith.negf %313 : vector<2x128xf32>
    %322 = math.exp %321 : vector<2x128xf32>
    %cst_56 = arith.constant 1.000000e+00 : f32
    %323 = vector.broadcast %cst_56 : f32 to vector<2x128xf32>
    %324 = arith.addf %323, %322 : vector<2x128xf32>
    %325 = arith.divf %323, %324 : vector<2x128xf32>
    %326 = arith.select %319, %320, %325 : vector<2x128xi1>, vector<2x128xf32>
    %327 = vector.extract_strided_slice %326 {offsets = [0, 0], sizes = [2, 32], strides = [1, 1]} : vector<2x128xf32> to vector<2x32xf32>
    %328 = vector.extract_strided_slice %326 {offsets = [0, 32], sizes = [2, 32], strides = [1, 1]} : vector<2x128xf32> to vector<2x32xf32>
    %329 = vector.extract_strided_slice %326 {offsets = [0, 64], sizes = [2, 32], strides = [1, 1]} : vector<2x128xf32> to vector<2x32xf32>
    %330 = vector.extract_strided_slice %326 {offsets = [0, 96], sizes = [2, 32], strides = [1, 1]} : vector<2x128xf32> to vector<2x32xf32>
    %331 = arith.mulf %328, %279 : vector<2x32xf32>
    %332 = arith.mulf %327, %329 : vector<2x32xf32>
    %333 = arith.addf %331, %332 : vector<2x32xf32>
    %334 = math.tanh %333 : vector<2x32xf32>
    %335 = arith.mulf %330, %334 : vector<2x32xf32>
    %336 = arith.truncf %311 : vector<2x32xf32> to vector<2x32xbf16>
    %337 = vector.extract_strided_slice %7 {offsets = [0, 0], sizes = [32, 128], strides = [1, 1]} : vector<32x256xbf16> to vector<32x128xbf16>
    %cst_57 = arith.constant dense<0.000000e+00> : vector<2x128xf32>
    %338 = tpu.matmul %336, %337, %cst_57 {dimension_numbers = #tpu.dot_dimension_numbers<[1], [0], [0], [1], [0, 0, 1, 1], [], []>} : vector<2x32xbf16>, vector<32x128xbf16>, vector<2x128xf32> -> vector<2x128xf32>
    %339 = arith.truncf %335 : vector<2x32xf32> to vector<2x32xbf16>
    %340 = vector.extract_strided_slice %7 {offsets = [0, 128], sizes = [32, 128], strides = [1, 1]} : vector<32x256xbf16> to vector<32x128xbf16>
    %cst_58 = arith.constant dense<0.000000e+00> : vector<2x128xf32>
    %341 = tpu.matmul %339, %340, %cst_58 {dimension_numbers = #tpu.dot_dimension_numbers<[1], [0], [0], [1], [0, 0, 1, 1], [], []>} : vector<2x32xbf16>, vector<32x128xbf16>, vector<2x128xf32> -> vector<2x128xf32>
    %342 = vector.extract_strided_slice %6 {offsets = [12, 0], sizes = [2, 128], strides = [1, 1]} : vector<16x256xf32> to vector<2x128xf32>
    %343 = arith.addf %342, %338 : vector<2x128xf32>
    %344 = tpu.iota {dimensions = array<i32: 1>} : vector<2x128xi32>
    %c64_i32_59 = arith.constant 64 : i32
    %345 = vector.broadcast %c64_i32_59 : i32 to vector<2x128xi32>
    %346 = arith.cmpi sge, %344, %345 : vector<2x128xi32>
    %c96_i32_60 = arith.constant 96 : i32
    %347 = vector.broadcast %c96_i32_60 : i32 to vector<2x128xi32>
    %348 = arith.cmpi slt, %344, %347 : vector<2x128xi32>
    %349 = arith.andi %346, %348 : vector<2x128xi1>
    %350 = math.tanh %343 : vector<2x128xf32>
    %351 = arith.negf %343 : vector<2x128xf32>
    %352 = math.exp %351 : vector<2x128xf32>
    %cst_61 = arith.constant 1.000000e+00 : f32
    %353 = vector.broadcast %cst_61 : f32 to vector<2x128xf32>
    %354 = arith.addf %353, %352 : vector<2x128xf32>
    %355 = arith.divf %353, %354 : vector<2x128xf32>
    %356 = arith.select %349, %350, %355 : vector<2x128xi1>, vector<2x128xf32>
    %357 = vector.extract_strided_slice %356 {offsets = [0, 0], sizes = [2, 32], strides = [1, 1]} : vector<2x128xf32> to vector<2x32xf32>
    %358 = vector.extract_strided_slice %356 {offsets = [0, 32], sizes = [2, 32], strides = [1, 1]} : vector<2x128xf32> to vector<2x32xf32>
    %359 = vector.extract_strided_slice %356 {offsets = [0, 64], sizes = [2, 32], strides = [1, 1]} : vector<2x128xf32> to vector<2x32xf32>
    %360 = vector.extract_strided_slice %356 {offsets = [0, 96], sizes = [2, 32], strides = [1, 1]} : vector<2x128xf32> to vector<2x32xf32>
    %361 = arith.mulf %358, %309 : vector<2x32xf32>
    %362 = arith.mulf %357, %359 : vector<2x32xf32>
    %363 = arith.addf %361, %362 : vector<2x32xf32>
    %364 = math.tanh %363 : vector<2x32xf32>
    %365 = arith.mulf %360, %364 : vector<2x32xf32>
    %366 = vector.extract_strided_slice %6 {offsets = [2, 128], sizes = [2, 128], strides = [1, 1]} : vector<16x256xf32> to vector<2x128xf32>
    %367 = arith.addf %366, %341 : vector<2x128xf32>
    %368 = tpu.iota {dimensions = array<i32: 1>} : vector<2x128xi32>
    %c64_i32_62 = arith.constant 64 : i32
    %369 = vector.broadcast %c64_i32_62 : i32 to vector<2x128xi32>
    %370 = arith.cmpi sge, %368, %369 : vector<2x128xi32>
    %c96_i32_63 = arith.constant 96 : i32
    %371 = vector.broadcast %c96_i32_63 : i32 to vector<2x128xi32>
    %372 = arith.cmpi slt, %368, %371 : vector<2x128xi32>
    %373 = arith.andi %370, %372 : vector<2x128xi1>
    %374 = math.tanh %367 : vector<2x128xf32>
    %375 = arith.negf %367 : vector<2x128xf32>
    %376 = math.exp %375 : vector<2x128xf32>
    %cst_64 = arith.constant 1.000000e+00 : f32
    %377 = vector.broadcast %cst_64 : f32 to vector<2x128xf32>
    %378 = arith.addf %377, %376 : vector<2x128xf32>
    %379 = arith.divf %377, %378 : vector<2x128xf32>
    %380 = arith.select %373, %374, %379 : vector<2x128xi1>, vector<2x128xf32>
    %381 = vector.extract_strided_slice %380 {offsets = [0, 0], sizes = [2, 32], strides = [1, 1]} : vector<2x128xf32> to vector<2x32xf32>
    %382 = vector.extract_strided_slice %380 {offsets = [0, 32], sizes = [2, 32], strides = [1, 1]} : vector<2x128xf32> to vector<2x32xf32>
    %383 = vector.extract_strided_slice %380 {offsets = [0, 64], sizes = [2, 32], strides = [1, 1]} : vector<2x128xf32> to vector<2x32xf32>
    %384 = vector.extract_strided_slice %380 {offsets = [0, 96], sizes = [2, 32], strides = [1, 1]} : vector<2x128xf32> to vector<2x32xf32>
    %385 = arith.mulf %382, %333 : vector<2x32xf32>
    %386 = arith.mulf %381, %383 : vector<2x32xf32>
    %387 = arith.addf %385, %386 : vector<2x32xf32>
    %388 = math.tanh %387 : vector<2x32xf32>
    %389 = arith.mulf %384, %388 : vector<2x32xf32>
    %390 = arith.truncf %365 : vector<2x32xf32> to vector<2x32xbf16>
    %391 = vector.extract_strided_slice %7 {offsets = [0, 0], sizes = [32, 128], strides = [1, 1]} : vector<32x256xbf16> to vector<32x128xbf16>
    %cst_65 = arith.constant dense<0.000000e+00> : vector<2x128xf32>
    %392 = tpu.matmul %390, %391, %cst_65 {dimension_numbers = #tpu.dot_dimension_numbers<[1], [0], [0], [1], [0, 0, 1, 1], [], []>} : vector<2x32xbf16>, vector<32x128xbf16>, vector<2x128xf32> -> vector<2x128xf32>
    %393 = arith.truncf %389 : vector<2x32xf32> to vector<2x32xbf16>
    %394 = vector.extract_strided_slice %7 {offsets = [0, 128], sizes = [32, 128], strides = [1, 1]} : vector<32x256xbf16> to vector<32x128xbf16>
    %cst_66 = arith.constant dense<0.000000e+00> : vector<2x128xf32>
    %395 = tpu.matmul %393, %394, %cst_66 {dimension_numbers = #tpu.dot_dimension_numbers<[1], [0], [0], [1], [0, 0, 1, 1], [], []>} : vector<2x32xbf16>, vector<32x128xbf16>, vector<2x128xf32> -> vector<2x128xf32>
    %396 = vector.extract_strided_slice %6 {offsets = [14, 0], sizes = [2, 128], strides = [1, 1]} : vector<16x256xf32> to vector<2x128xf32>
    %397 = arith.addf %396, %392 : vector<2x128xf32>
    %398 = tpu.iota {dimensions = array<i32: 1>} : vector<2x128xi32>
    %c64_i32_67 = arith.constant 64 : i32
    %399 = vector.broadcast %c64_i32_67 : i32 to vector<2x128xi32>
    %400 = arith.cmpi sge, %398, %399 : vector<2x128xi32>
    %c96_i32_68 = arith.constant 96 : i32
    %401 = vector.broadcast %c96_i32_68 : i32 to vector<2x128xi32>
    %402 = arith.cmpi slt, %398, %401 : vector<2x128xi32>
    %403 = arith.andi %400, %402 : vector<2x128xi1>
    %404 = math.tanh %397 : vector<2x128xf32>
    %405 = arith.negf %397 : vector<2x128xf32>
    %406 = math.exp %405 : vector<2x128xf32>
    %cst_69 = arith.constant 1.000000e+00 : f32
    %407 = vector.broadcast %cst_69 : f32 to vector<2x128xf32>
    %408 = arith.addf %407, %406 : vector<2x128xf32>
    %409 = arith.divf %407, %408 : vector<2x128xf32>
    %410 = arith.select %403, %404, %409 : vector<2x128xi1>, vector<2x128xf32>
    %411 = vector.extract_strided_slice %410 {offsets = [0, 0], sizes = [2, 32], strides = [1, 1]} : vector<2x128xf32> to vector<2x32xf32>
    %412 = vector.extract_strided_slice %410 {offsets = [0, 32], sizes = [2, 32], strides = [1, 1]} : vector<2x128xf32> to vector<2x32xf32>
    %413 = vector.extract_strided_slice %410 {offsets = [0, 64], sizes = [2, 32], strides = [1, 1]} : vector<2x128xf32> to vector<2x32xf32>
    %414 = vector.extract_strided_slice %410 {offsets = [0, 96], sizes = [2, 32], strides = [1, 1]} : vector<2x128xf32> to vector<2x32xf32>
    %415 = arith.mulf %412, %363 : vector<2x32xf32>
    %416 = arith.mulf %411, %413 : vector<2x32xf32>
    %417 = arith.addf %415, %416 : vector<2x32xf32>
    %418 = math.tanh %417 : vector<2x32xf32>
    %419 = arith.mulf %414, %418 : vector<2x32xf32>
    %420 = vector.extract_strided_slice %6 {offsets = [0, 128], sizes = [2, 128], strides = [1, 1]} : vector<16x256xf32> to vector<2x128xf32>
    %421 = arith.addf %420, %395 : vector<2x128xf32>
    %422 = tpu.iota {dimensions = array<i32: 1>} : vector<2x128xi32>
    %c64_i32_70 = arith.constant 64 : i32
    %423 = vector.broadcast %c64_i32_70 : i32 to vector<2x128xi32>
    %424 = arith.cmpi sge, %422, %423 : vector<2x128xi32>
    %c96_i32_71 = arith.constant 96 : i32
    %425 = vector.broadcast %c96_i32_71 : i32 to vector<2x128xi32>
    %426 = arith.cmpi slt, %422, %425 : vector<2x128xi32>
    %427 = arith.andi %424, %426 : vector<2x128xi1>
    %428 = math.tanh %421 : vector<2x128xf32>
    %429 = arith.negf %421 : vector<2x128xf32>
    %430 = math.exp %429 : vector<2x128xf32>
    %cst_72 = arith.constant 1.000000e+00 : f32
    %431 = vector.broadcast %cst_72 : f32 to vector<2x128xf32>
    %432 = arith.addf %431, %430 : vector<2x128xf32>
    %433 = arith.divf %431, %432 : vector<2x128xf32>
    %434 = arith.select %427, %428, %433 : vector<2x128xi1>, vector<2x128xf32>
    %435 = vector.extract_strided_slice %434 {offsets = [0, 0], sizes = [2, 32], strides = [1, 1]} : vector<2x128xf32> to vector<2x32xf32>
    %436 = vector.extract_strided_slice %434 {offsets = [0, 32], sizes = [2, 32], strides = [1, 1]} : vector<2x128xf32> to vector<2x32xf32>
    %437 = vector.extract_strided_slice %434 {offsets = [0, 64], sizes = [2, 32], strides = [1, 1]} : vector<2x128xf32> to vector<2x32xf32>
    %438 = vector.extract_strided_slice %434 {offsets = [0, 96], sizes = [2, 32], strides = [1, 1]} : vector<2x128xf32> to vector<2x32xf32>
    %439 = arith.mulf %436, %387 : vector<2x32xf32>
    %440 = arith.mulf %435, %437 : vector<2x32xf32>
    %441 = arith.addf %439, %440 : vector<2x32xf32>
    %442 = math.tanh %441 : vector<2x32xf32>
    %443 = arith.mulf %438, %442 : vector<2x32xf32>
    %444 = tpu.concatenate %41, %95, %149, %203, %257, %311, %365, %419 in 0 : vector<2x32xf32>, vector<2x32xf32>, vector<2x32xf32>, vector<2x32xf32>, vector<2x32xf32>, vector<2x32xf32>, vector<2x32xf32>, vector<2x32xf32> -> vector<16x32xf32>
    %445 = tpu.concatenate %443, %389, %335, %281, %227, %173, %119, %65 in 0 : vector<2x32xf32>, vector<2x32xf32>, vector<2x32xf32>, vector<2x32xf32>, vector<2x32xf32>, vector<2x32xf32>, vector<2x32xf32>, vector<2x32xf32> -> vector<16x32xf32>
    %446 = tpu.concatenate %444, %445 in 1 : vector<16x32xf32>, vector<16x32xf32> -> vector<16x64xf32>
    %447 = arith.truncf %446 : vector<16x64xf32> to vector<16x64xbf16>
    %c0_73 = arith.constant 0 : index
    %c0_74 = arith.constant 0 : index
    %448 = vector.load %arg4[%c0_73, %c0_74] : memref<64x256xbf16, #tpu.memory_space<vmem>>, vector<64x256xbf16>
    %cst_75 = arith.constant dense<0.000000e+00> : vector<16x256xf32>
    %449 = tpu.matmul %447, %448, %cst_75 {dimension_numbers = #tpu.dot_dimension_numbers<[1], [0], [0], [1], [0, 0, 1, 1], [], []>} : vector<16x64xbf16>, vector<64x256xbf16>, vector<16x256xf32> -> vector<16x256xf32>
    %c0_76 = arith.constant 0 : index
    %c0_77 = arith.constant 0 : index
    %450 = vector.load %arg6[%c0_76, %c0_77] : memref<1x256xf32, #tpu.memory_space<vmem>>, vector<1x256xf32>
    %451 = vector.broadcast %450 : vector<1x256xf32> to vector<16x256xf32>
    %452 = arith.addf %449, %451 : vector<16x256xf32>
    %c0_78 = arith.constant 0 : index
    %c0_79 = arith.constant 0 : index
    %453 = vector.load %arg5[%c0_78, %c0_79] : memref<32x256xbf16, #tpu.memory_space<vmem>>, vector<32x256xbf16>
    %cst_80 = arith.constant 0.000000e+00 : f32
    %454 = vector.broadcast %cst_80 : f32 to vector<2x32xf32>
    %cst_81 = arith.constant 0.000000e+00 : f32
    %455 = vector.broadcast %cst_81 : f32 to vector<2x32xf32>
    %cst_82 = arith.constant 0.000000e+00 : f32
    %456 = vector.broadcast %cst_82 : f32 to vector<2x32xf32>
    %cst_83 = arith.constant 0.000000e+00 : f32
    %457 = vector.broadcast %cst_83 : f32 to vector<2x32xf32>
    %458 = arith.truncf %454 : vector<2x32xf32> to vector<2x32xbf16>
    %459 = vector.extract_strided_slice %453 {offsets = [0, 0], sizes = [32, 128], strides = [1, 1]} : vector<32x256xbf16> to vector<32x128xbf16>
    %cst_84 = arith.constant dense<0.000000e+00> : vector<2x128xf32>
    %460 = tpu.matmul %458, %459, %cst_84 {dimension_numbers = #tpu.dot_dimension_numbers<[1], [0], [0], [1], [0, 0, 1, 1], [], []>} : vector<2x32xbf16>, vector<32x128xbf16>, vector<2x128xf32> -> vector<2x128xf32>
    %461 = arith.truncf %456 : vector<2x32xf32> to vector<2x32xbf16>
    %462 = vector.extract_strided_slice %453 {offsets = [0, 128], sizes = [32, 128], strides = [1, 1]} : vector<32x256xbf16> to vector<32x128xbf16>
    %cst_85 = arith.constant dense<0.000000e+00> : vector<2x128xf32>
    %463 = tpu.matmul %461, %462, %cst_85 {dimension_numbers = #tpu.dot_dimension_numbers<[1], [0], [0], [1], [0, 0, 1, 1], [], []>} : vector<2x32xbf16>, vector<32x128xbf16>, vector<2x128xf32> -> vector<2x128xf32>
    %464 = vector.extract_strided_slice %452 {offsets = [0, 0], sizes = [2, 128], strides = [1, 1]} : vector<16x256xf32> to vector<2x128xf32>
    %465 = arith.addf %464, %460 : vector<2x128xf32>
    %466 = tpu.iota {dimensions = array<i32: 1>} : vector<2x128xi32>
    %c64_i32_86 = arith.constant 64 : i32
    %467 = vector.broadcast %c64_i32_86 : i32 to vector<2x128xi32>
    %468 = arith.cmpi sge, %466, %467 : vector<2x128xi32>
    %c96_i32_87 = arith.constant 96 : i32
    %469 = vector.broadcast %c96_i32_87 : i32 to vector<2x128xi32>
    %470 = arith.cmpi slt, %466, %469 : vector<2x128xi32>
    %471 = arith.andi %468, %470 : vector<2x128xi1>
    %472 = math.tanh %465 : vector<2x128xf32>
    %473 = arith.negf %465 : vector<2x128xf32>
    %474 = math.exp %473 : vector<2x128xf32>
    %cst_88 = arith.constant 1.000000e+00 : f32
    %475 = vector.broadcast %cst_88 : f32 to vector<2x128xf32>
    %476 = arith.addf %475, %474 : vector<2x128xf32>
    %477 = arith.divf %475, %476 : vector<2x128xf32>
    %478 = arith.select %471, %472, %477 : vector<2x128xi1>, vector<2x128xf32>
    %479 = vector.extract_strided_slice %478 {offsets = [0, 0], sizes = [2, 32], strides = [1, 1]} : vector<2x128xf32> to vector<2x32xf32>
    %480 = vector.extract_strided_slice %478 {offsets = [0, 32], sizes = [2, 32], strides = [1, 1]} : vector<2x128xf32> to vector<2x32xf32>
    %481 = vector.extract_strided_slice %478 {offsets = [0, 64], sizes = [2, 32], strides = [1, 1]} : vector<2x128xf32> to vector<2x32xf32>
    %482 = vector.extract_strided_slice %478 {offsets = [0, 96], sizes = [2, 32], strides = [1, 1]} : vector<2x128xf32> to vector<2x32xf32>
    %483 = arith.mulf %480, %455 : vector<2x32xf32>
    %484 = arith.mulf %479, %481 : vector<2x32xf32>
    %485 = arith.addf %483, %484 : vector<2x32xf32>
    %486 = math.tanh %485 : vector<2x32xf32>
    %487 = arith.mulf %482, %486 : vector<2x32xf32>
    %488 = vector.extract_strided_slice %452 {offsets = [14, 128], sizes = [2, 128], strides = [1, 1]} : vector<16x256xf32> to vector<2x128xf32>
    %489 = arith.addf %488, %463 : vector<2x128xf32>
    %490 = tpu.iota {dimensions = array<i32: 1>} : vector<2x128xi32>
    %c64_i32_89 = arith.constant 64 : i32
    %491 = vector.broadcast %c64_i32_89 : i32 to vector<2x128xi32>
    %492 = arith.cmpi sge, %490, %491 : vector<2x128xi32>
    %c96_i32_90 = arith.constant 96 : i32
    %493 = vector.broadcast %c96_i32_90 : i32 to vector<2x128xi32>
    %494 = arith.cmpi slt, %490, %493 : vector<2x128xi32>
    %495 = arith.andi %492, %494 : vector<2x128xi1>
    %496 = math.tanh %489 : vector<2x128xf32>
    %497 = arith.negf %489 : vector<2x128xf32>
    %498 = math.exp %497 : vector<2x128xf32>
    %cst_91 = arith.constant 1.000000e+00 : f32
    %499 = vector.broadcast %cst_91 : f32 to vector<2x128xf32>
    %500 = arith.addf %499, %498 : vector<2x128xf32>
    %501 = arith.divf %499, %500 : vector<2x128xf32>
    %502 = arith.select %495, %496, %501 : vector<2x128xi1>, vector<2x128xf32>
    %503 = vector.extract_strided_slice %502 {offsets = [0, 0], sizes = [2, 32], strides = [1, 1]} : vector<2x128xf32> to vector<2x32xf32>
    %504 = vector.extract_strided_slice %502 {offsets = [0, 32], sizes = [2, 32], strides = [1, 1]} : vector<2x128xf32> to vector<2x32xf32>
    %505 = vector.extract_strided_slice %502 {offsets = [0, 64], sizes = [2, 32], strides = [1, 1]} : vector<2x128xf32> to vector<2x32xf32>
    %506 = vector.extract_strided_slice %502 {offsets = [0, 96], sizes = [2, 32], strides = [1, 1]} : vector<2x128xf32> to vector<2x32xf32>
    %507 = arith.mulf %504, %457 : vector<2x32xf32>
    %508 = arith.mulf %503, %505 : vector<2x32xf32>
    %509 = arith.addf %507, %508 : vector<2x32xf32>
    %510 = math.tanh %509 : vector<2x32xf32>
    %511 = arith.mulf %506, %510 : vector<2x32xf32>
    %512 = arith.truncf %487 : vector<2x32xf32> to vector<2x32xbf16>
    %513 = vector.extract_strided_slice %453 {offsets = [0, 0], sizes = [32, 128], strides = [1, 1]} : vector<32x256xbf16> to vector<32x128xbf16>
    %cst_92 = arith.constant dense<0.000000e+00> : vector<2x128xf32>
    %514 = tpu.matmul %512, %513, %cst_92 {dimension_numbers = #tpu.dot_dimension_numbers<[1], [0], [0], [1], [0, 0, 1, 1], [], []>} : vector<2x32xbf16>, vector<32x128xbf16>, vector<2x128xf32> -> vector<2x128xf32>
    %515 = arith.truncf %511 : vector<2x32xf32> to vector<2x32xbf16>
    %516 = vector.extract_strided_slice %453 {offsets = [0, 128], sizes = [32, 128], strides = [1, 1]} : vector<32x256xbf16> to vector<32x128xbf16>
    %cst_93 = arith.constant dense<0.000000e+00> : vector<2x128xf32>
    %517 = tpu.matmul %515, %516, %cst_93 {dimension_numbers = #tpu.dot_dimension_numbers<[1], [0], [0], [1], [0, 0, 1, 1], [], []>} : vector<2x32xbf16>, vector<32x128xbf16>, vector<2x128xf32> -> vector<2x128xf32>
    %518 = vector.extract_strided_slice %452 {offsets = [2, 0], sizes = [2, 128], strides = [1, 1]} : vector<16x256xf32> to vector<2x128xf32>
    %519 = arith.addf %518, %514 : vector<2x128xf32>
    %520 = tpu.iota {dimensions = array<i32: 1>} : vector<2x128xi32>
    %c64_i32_94 = arith.constant 64 : i32
    %521 = vector.broadcast %c64_i32_94 : i32 to vector<2x128xi32>
    %522 = arith.cmpi sge, %520, %521 : vector<2x128xi32>
    %c96_i32_95 = arith.constant 96 : i32
    %523 = vector.broadcast %c96_i32_95 : i32 to vector<2x128xi32>
    %524 = arith.cmpi slt, %520, %523 : vector<2x128xi32>
    %525 = arith.andi %522, %524 : vector<2x128xi1>
    %526 = math.tanh %519 : vector<2x128xf32>
    %527 = arith.negf %519 : vector<2x128xf32>
    %528 = math.exp %527 : vector<2x128xf32>
    %cst_96 = arith.constant 1.000000e+00 : f32
    %529 = vector.broadcast %cst_96 : f32 to vector<2x128xf32>
    %530 = arith.addf %529, %528 : vector<2x128xf32>
    %531 = arith.divf %529, %530 : vector<2x128xf32>
    %532 = arith.select %525, %526, %531 : vector<2x128xi1>, vector<2x128xf32>
    %533 = vector.extract_strided_slice %532 {offsets = [0, 0], sizes = [2, 32], strides = [1, 1]} : vector<2x128xf32> to vector<2x32xf32>
    %534 = vector.extract_strided_slice %532 {offsets = [0, 32], sizes = [2, 32], strides = [1, 1]} : vector<2x128xf32> to vector<2x32xf32>
    %535 = vector.extract_strided_slice %532 {offsets = [0, 64], sizes = [2, 32], strides = [1, 1]} : vector<2x128xf32> to vector<2x32xf32>
    %536 = vector.extract_strided_slice %532 {offsets = [0, 96], sizes = [2, 32], strides = [1, 1]} : vector<2x128xf32> to vector<2x32xf32>
    %537 = arith.mulf %534, %485 : vector<2x32xf32>
    %538 = arith.mulf %533, %535 : vector<2x32xf32>
    %539 = arith.addf %537, %538 : vector<2x32xf32>
    %540 = math.tanh %539 : vector<2x32xf32>
    %541 = arith.mulf %536, %540 : vector<2x32xf32>
    %542 = vector.extract_strided_slice %452 {offsets = [12, 128], sizes = [2, 128], strides = [1, 1]} : vector<16x256xf32> to vector<2x128xf32>
    %543 = arith.addf %542, %517 : vector<2x128xf32>
    %544 = tpu.iota {dimensions = array<i32: 1>} : vector<2x128xi32>
    %c64_i32_97 = arith.constant 64 : i32
    %545 = vector.broadcast %c64_i32_97 : i32 to vector<2x128xi32>
    %546 = arith.cmpi sge, %544, %545 : vector<2x128xi32>
    %c96_i32_98 = arith.constant 96 : i32
    %547 = vector.broadcast %c96_i32_98 : i32 to vector<2x128xi32>
    %548 = arith.cmpi slt, %544, %547 : vector<2x128xi32>
    %549 = arith.andi %546, %548 : vector<2x128xi1>
    %550 = math.tanh %543 : vector<2x128xf32>
    %551 = arith.negf %543 : vector<2x128xf32>
    %552 = math.exp %551 : vector<2x128xf32>
    %cst_99 = arith.constant 1.000000e+00 : f32
    %553 = vector.broadcast %cst_99 : f32 to vector<2x128xf32>
    %554 = arith.addf %553, %552 : vector<2x128xf32>
    %555 = arith.divf %553, %554 : vector<2x128xf32>
    %556 = arith.select %549, %550, %555 : vector<2x128xi1>, vector<2x128xf32>
    %557 = vector.extract_strided_slice %556 {offsets = [0, 0], sizes = [2, 32], strides = [1, 1]} : vector<2x128xf32> to vector<2x32xf32>
    %558 = vector.extract_strided_slice %556 {offsets = [0, 32], sizes = [2, 32], strides = [1, 1]} : vector<2x128xf32> to vector<2x32xf32>
    %559 = vector.extract_strided_slice %556 {offsets = [0, 64], sizes = [2, 32], strides = [1, 1]} : vector<2x128xf32> to vector<2x32xf32>
    %560 = vector.extract_strided_slice %556 {offsets = [0, 96], sizes = [2, 32], strides = [1, 1]} : vector<2x128xf32> to vector<2x32xf32>
    %561 = arith.mulf %558, %509 : vector<2x32xf32>
    %562 = arith.mulf %557, %559 : vector<2x32xf32>
    %563 = arith.addf %561, %562 : vector<2x32xf32>
    %564 = math.tanh %563 : vector<2x32xf32>
    %565 = arith.mulf %560, %564 : vector<2x32xf32>
    %566 = arith.truncf %541 : vector<2x32xf32> to vector<2x32xbf16>
    %567 = vector.extract_strided_slice %453 {offsets = [0, 0], sizes = [32, 128], strides = [1, 1]} : vector<32x256xbf16> to vector<32x128xbf16>
    %cst_100 = arith.constant dense<0.000000e+00> : vector<2x128xf32>
    %568 = tpu.matmul %566, %567, %cst_100 {dimension_numbers = #tpu.dot_dimension_numbers<[1], [0], [0], [1], [0, 0, 1, 1], [], []>} : vector<2x32xbf16>, vector<32x128xbf16>, vector<2x128xf32> -> vector<2x128xf32>
    %569 = arith.truncf %565 : vector<2x32xf32> to vector<2x32xbf16>
    %570 = vector.extract_strided_slice %453 {offsets = [0, 128], sizes = [32, 128], strides = [1, 1]} : vector<32x256xbf16> to vector<32x128xbf16>
    %cst_101 = arith.constant dense<0.000000e+00> : vector<2x128xf32>
    %571 = tpu.matmul %569, %570, %cst_101 {dimension_numbers = #tpu.dot_dimension_numbers<[1], [0], [0], [1], [0, 0, 1, 1], [], []>} : vector<2x32xbf16>, vector<32x128xbf16>, vector<2x128xf32> -> vector<2x128xf32>
    %572 = vector.extract_strided_slice %452 {offsets = [4, 0], sizes = [2, 128], strides = [1, 1]} : vector<16x256xf32> to vector<2x128xf32>
    %573 = arith.addf %572, %568 : vector<2x128xf32>
    %574 = tpu.iota {dimensions = array<i32: 1>} : vector<2x128xi32>
    %c64_i32_102 = arith.constant 64 : i32
    %575 = vector.broadcast %c64_i32_102 : i32 to vector<2x128xi32>
    %576 = arith.cmpi sge, %574, %575 : vector<2x128xi32>
    %c96_i32_103 = arith.constant 96 : i32
    %577 = vector.broadcast %c96_i32_103 : i32 to vector<2x128xi32>
    %578 = arith.cmpi slt, %574, %577 : vector<2x128xi32>
    %579 = arith.andi %576, %578 : vector<2x128xi1>
    %580 = math.tanh %573 : vector<2x128xf32>
    %581 = arith.negf %573 : vector<2x128xf32>
    %582 = math.exp %581 : vector<2x128xf32>
    %cst_104 = arith.constant 1.000000e+00 : f32
    %583 = vector.broadcast %cst_104 : f32 to vector<2x128xf32>
    %584 = arith.addf %583, %582 : vector<2x128xf32>
    %585 = arith.divf %583, %584 : vector<2x128xf32>
    %586 = arith.select %579, %580, %585 : vector<2x128xi1>, vector<2x128xf32>
    %587 = vector.extract_strided_slice %586 {offsets = [0, 0], sizes = [2, 32], strides = [1, 1]} : vector<2x128xf32> to vector<2x32xf32>
    %588 = vector.extract_strided_slice %586 {offsets = [0, 32], sizes = [2, 32], strides = [1, 1]} : vector<2x128xf32> to vector<2x32xf32>
    %589 = vector.extract_strided_slice %586 {offsets = [0, 64], sizes = [2, 32], strides = [1, 1]} : vector<2x128xf32> to vector<2x32xf32>
    %590 = vector.extract_strided_slice %586 {offsets = [0, 96], sizes = [2, 32], strides = [1, 1]} : vector<2x128xf32> to vector<2x32xf32>
    %591 = arith.mulf %588, %539 : vector<2x32xf32>
    %592 = arith.mulf %587, %589 : vector<2x32xf32>
    %593 = arith.addf %591, %592 : vector<2x32xf32>
    %594 = math.tanh %593 : vector<2x32xf32>
    %595 = arith.mulf %590, %594 : vector<2x32xf32>
    %596 = vector.extract_strided_slice %452 {offsets = [10, 128], sizes = [2, 128], strides = [1, 1]} : vector<16x256xf32> to vector<2x128xf32>
    %597 = arith.addf %596, %571 : vector<2x128xf32>
    %598 = tpu.iota {dimensions = array<i32: 1>} : vector<2x128xi32>
    %c64_i32_105 = arith.constant 64 : i32
    %599 = vector.broadcast %c64_i32_105 : i32 to vector<2x128xi32>
    %600 = arith.cmpi sge, %598, %599 : vector<2x128xi32>
    %c96_i32_106 = arith.constant 96 : i32
    %601 = vector.broadcast %c96_i32_106 : i32 to vector<2x128xi32>
    %602 = arith.cmpi slt, %598, %601 : vector<2x128xi32>
    %603 = arith.andi %600, %602 : vector<2x128xi1>
    %604 = math.tanh %597 : vector<2x128xf32>
    %605 = arith.negf %597 : vector<2x128xf32>
    %606 = math.exp %605 : vector<2x128xf32>
    %cst_107 = arith.constant 1.000000e+00 : f32
    %607 = vector.broadcast %cst_107 : f32 to vector<2x128xf32>
    %608 = arith.addf %607, %606 : vector<2x128xf32>
    %609 = arith.divf %607, %608 : vector<2x128xf32>
    %610 = arith.select %603, %604, %609 : vector<2x128xi1>, vector<2x128xf32>
    %611 = vector.extract_strided_slice %610 {offsets = [0, 0], sizes = [2, 32], strides = [1, 1]} : vector<2x128xf32> to vector<2x32xf32>
    %612 = vector.extract_strided_slice %610 {offsets = [0, 32], sizes = [2, 32], strides = [1, 1]} : vector<2x128xf32> to vector<2x32xf32>
    %613 = vector.extract_strided_slice %610 {offsets = [0, 64], sizes = [2, 32], strides = [1, 1]} : vector<2x128xf32> to vector<2x32xf32>
    %614 = vector.extract_strided_slice %610 {offsets = [0, 96], sizes = [2, 32], strides = [1, 1]} : vector<2x128xf32> to vector<2x32xf32>
    %615 = arith.mulf %612, %563 : vector<2x32xf32>
    %616 = arith.mulf %611, %613 : vector<2x32xf32>
    %617 = arith.addf %615, %616 : vector<2x32xf32>
    %618 = math.tanh %617 : vector<2x32xf32>
    %619 = arith.mulf %614, %618 : vector<2x32xf32>
    %620 = arith.truncf %595 : vector<2x32xf32> to vector<2x32xbf16>
    %621 = vector.extract_strided_slice %453 {offsets = [0, 0], sizes = [32, 128], strides = [1, 1]} : vector<32x256xbf16> to vector<32x128xbf16>
    %cst_108 = arith.constant dense<0.000000e+00> : vector<2x128xf32>
    %622 = tpu.matmul %620, %621, %cst_108 {dimension_numbers = #tpu.dot_dimension_numbers<[1], [0], [0], [1], [0, 0, 1, 1], [], []>} : vector<2x32xbf16>, vector<32x128xbf16>, vector<2x128xf32> -> vector<2x128xf32>
    %623 = arith.truncf %619 : vector<2x32xf32> to vector<2x32xbf16>
    %624 = vector.extract_strided_slice %453 {offsets = [0, 128], sizes = [32, 128], strides = [1, 1]} : vector<32x256xbf16> to vector<32x128xbf16>
    %cst_109 = arith.constant dense<0.000000e+00> : vector<2x128xf32>
    %625 = tpu.matmul %623, %624, %cst_109 {dimension_numbers = #tpu.dot_dimension_numbers<[1], [0], [0], [1], [0, 0, 1, 1], [], []>} : vector<2x32xbf16>, vector<32x128xbf16>, vector<2x128xf32> -> vector<2x128xf32>
    %626 = vector.extract_strided_slice %452 {offsets = [6, 0], sizes = [2, 128], strides = [1, 1]} : vector<16x256xf32> to vector<2x128xf32>
    %627 = arith.addf %626, %622 : vector<2x128xf32>
    %628 = tpu.iota {dimensions = array<i32: 1>} : vector<2x128xi32>
    %c64_i32_110 = arith.constant 64 : i32
    %629 = vector.broadcast %c64_i32_110 : i32 to vector<2x128xi32>
    %630 = arith.cmpi sge, %628, %629 : vector<2x128xi32>
    %c96_i32_111 = arith.constant 96 : i32
    %631 = vector.broadcast %c96_i32_111 : i32 to vector<2x128xi32>
    %632 = arith.cmpi slt, %628, %631 : vector<2x128xi32>
    %633 = arith.andi %630, %632 : vector<2x128xi1>
    %634 = math.tanh %627 : vector<2x128xf32>
    %635 = arith.negf %627 : vector<2x128xf32>
    %636 = math.exp %635 : vector<2x128xf32>
    %cst_112 = arith.constant 1.000000e+00 : f32
    %637 = vector.broadcast %cst_112 : f32 to vector<2x128xf32>
    %638 = arith.addf %637, %636 : vector<2x128xf32>
    %639 = arith.divf %637, %638 : vector<2x128xf32>
    %640 = arith.select %633, %634, %639 : vector<2x128xi1>, vector<2x128xf32>
    %641 = vector.extract_strided_slice %640 {offsets = [0, 0], sizes = [2, 32], strides = [1, 1]} : vector<2x128xf32> to vector<2x32xf32>
    %642 = vector.extract_strided_slice %640 {offsets = [0, 32], sizes = [2, 32], strides = [1, 1]} : vector<2x128xf32> to vector<2x32xf32>
    %643 = vector.extract_strided_slice %640 {offsets = [0, 64], sizes = [2, 32], strides = [1, 1]} : vector<2x128xf32> to vector<2x32xf32>
    %644 = vector.extract_strided_slice %640 {offsets = [0, 96], sizes = [2, 32], strides = [1, 1]} : vector<2x128xf32> to vector<2x32xf32>
    %645 = arith.mulf %642, %593 : vector<2x32xf32>
    %646 = arith.mulf %641, %643 : vector<2x32xf32>
    %647 = arith.addf %645, %646 : vector<2x32xf32>
    %648 = math.tanh %647 : vector<2x32xf32>
    %649 = arith.mulf %644, %648 : vector<2x32xf32>
    %650 = vector.extract_strided_slice %452 {offsets = [8, 128], sizes = [2, 128], strides = [1, 1]} : vector<16x256xf32> to vector<2x128xf32>
    %651 = arith.addf %650, %625 : vector<2x128xf32>
    %652 = tpu.iota {dimensions = array<i32: 1>} : vector<2x128xi32>
    %c64_i32_113 = arith.constant 64 : i32
    %653 = vector.broadcast %c64_i32_113 : i32 to vector<2x128xi32>
    %654 = arith.cmpi sge, %652, %653 : vector<2x128xi32>
    %c96_i32_114 = arith.constant 96 : i32
    %655 = vector.broadcast %c96_i32_114 : i32 to vector<2x128xi32>
    %656 = arith.cmpi slt, %652, %655 : vector<2x128xi32>
    %657 = arith.andi %654, %656 : vector<2x128xi1>
    %658 = math.tanh %651 : vector<2x128xf32>
    %659 = arith.negf %651 : vector<2x128xf32>
    %660 = math.exp %659 : vector<2x128xf32>
    %cst_115 = arith.constant 1.000000e+00 : f32
    %661 = vector.broadcast %cst_115 : f32 to vector<2x128xf32>
    %662 = arith.addf %661, %660 : vector<2x128xf32>
    %663 = arith.divf %661, %662 : vector<2x128xf32>
    %664 = arith.select %657, %658, %663 : vector<2x128xi1>, vector<2x128xf32>
    %665 = vector.extract_strided_slice %664 {offsets = [0, 0], sizes = [2, 32], strides = [1, 1]} : vector<2x128xf32> to vector<2x32xf32>
    %666 = vector.extract_strided_slice %664 {offsets = [0, 32], sizes = [2, 32], strides = [1, 1]} : vector<2x128xf32> to vector<2x32xf32>
    %667 = vector.extract_strided_slice %664 {offsets = [0, 64], sizes = [2, 32], strides = [1, 1]} : vector<2x128xf32> to vector<2x32xf32>
    %668 = vector.extract_strided_slice %664 {offsets = [0, 96], sizes = [2, 32], strides = [1, 1]} : vector<2x128xf32> to vector<2x32xf32>
    %669 = arith.mulf %666, %617 : vector<2x32xf32>
    %670 = arith.mulf %665, %667 : vector<2x32xf32>
    %671 = arith.addf %669, %670 : vector<2x32xf32>
    %672 = math.tanh %671 : vector<2x32xf32>
    %673 = arith.mulf %668, %672 : vector<2x32xf32>
    %674 = arith.truncf %649 : vector<2x32xf32> to vector<2x32xbf16>
    %675 = vector.extract_strided_slice %453 {offsets = [0, 0], sizes = [32, 128], strides = [1, 1]} : vector<32x256xbf16> to vector<32x128xbf16>
    %cst_116 = arith.constant dense<0.000000e+00> : vector<2x128xf32>
    %676 = tpu.matmul %674, %675, %cst_116 {dimension_numbers = #tpu.dot_dimension_numbers<[1], [0], [0], [1], [0, 0, 1, 1], [], []>} : vector<2x32xbf16>, vector<32x128xbf16>, vector<2x128xf32> -> vector<2x128xf32>
    %677 = arith.truncf %673 : vector<2x32xf32> to vector<2x32xbf16>
    %678 = vector.extract_strided_slice %453 {offsets = [0, 128], sizes = [32, 128], strides = [1, 1]} : vector<32x256xbf16> to vector<32x128xbf16>
    %cst_117 = arith.constant dense<0.000000e+00> : vector<2x128xf32>
    %679 = tpu.matmul %677, %678, %cst_117 {dimension_numbers = #tpu.dot_dimension_numbers<[1], [0], [0], [1], [0, 0, 1, 1], [], []>} : vector<2x32xbf16>, vector<32x128xbf16>, vector<2x128xf32> -> vector<2x128xf32>
    %680 = vector.extract_strided_slice %452 {offsets = [8, 0], sizes = [2, 128], strides = [1, 1]} : vector<16x256xf32> to vector<2x128xf32>
    %681 = arith.addf %680, %676 : vector<2x128xf32>
    %682 = tpu.iota {dimensions = array<i32: 1>} : vector<2x128xi32>
    %c64_i32_118 = arith.constant 64 : i32
    %683 = vector.broadcast %c64_i32_118 : i32 to vector<2x128xi32>
    %684 = arith.cmpi sge, %682, %683 : vector<2x128xi32>
    %c96_i32_119 = arith.constant 96 : i32
    %685 = vector.broadcast %c96_i32_119 : i32 to vector<2x128xi32>
    %686 = arith.cmpi slt, %682, %685 : vector<2x128xi32>
    %687 = arith.andi %684, %686 : vector<2x128xi1>
    %688 = math.tanh %681 : vector<2x128xf32>
    %689 = arith.negf %681 : vector<2x128xf32>
    %690 = math.exp %689 : vector<2x128xf32>
    %cst_120 = arith.constant 1.000000e+00 : f32
    %691 = vector.broadcast %cst_120 : f32 to vector<2x128xf32>
    %692 = arith.addf %691, %690 : vector<2x128xf32>
    %693 = arith.divf %691, %692 : vector<2x128xf32>
    %694 = arith.select %687, %688, %693 : vector<2x128xi1>, vector<2x128xf32>
    %695 = vector.extract_strided_slice %694 {offsets = [0, 0], sizes = [2, 32], strides = [1, 1]} : vector<2x128xf32> to vector<2x32xf32>
    %696 = vector.extract_strided_slice %694 {offsets = [0, 32], sizes = [2, 32], strides = [1, 1]} : vector<2x128xf32> to vector<2x32xf32>
    %697 = vector.extract_strided_slice %694 {offsets = [0, 64], sizes = [2, 32], strides = [1, 1]} : vector<2x128xf32> to vector<2x32xf32>
    %698 = vector.extract_strided_slice %694 {offsets = [0, 96], sizes = [2, 32], strides = [1, 1]} : vector<2x128xf32> to vector<2x32xf32>
    %699 = arith.mulf %696, %647 : vector<2x32xf32>
    %700 = arith.mulf %695, %697 : vector<2x32xf32>
    %701 = arith.addf %699, %700 : vector<2x32xf32>
    %702 = math.tanh %701 : vector<2x32xf32>
    %703 = arith.mulf %698, %702 : vector<2x32xf32>
    %704 = vector.extract_strided_slice %452 {offsets = [6, 128], sizes = [2, 128], strides = [1, 1]} : vector<16x256xf32> to vector<2x128xf32>
    %705 = arith.addf %704, %679 : vector<2x128xf32>
    %706 = tpu.iota {dimensions = array<i32: 1>} : vector<2x128xi32>
    %c64_i32_121 = arith.constant 64 : i32
    %707 = vector.broadcast %c64_i32_121 : i32 to vector<2x128xi32>
    %708 = arith.cmpi sge, %706, %707 : vector<2x128xi32>
    %c96_i32_122 = arith.constant 96 : i32
    %709 = vector.broadcast %c96_i32_122 : i32 to vector<2x128xi32>
    %710 = arith.cmpi slt, %706, %709 : vector<2x128xi32>
    %711 = arith.andi %708, %710 : vector<2x128xi1>
    %712 = math.tanh %705 : vector<2x128xf32>
    %713 = arith.negf %705 : vector<2x128xf32>
    %714 = math.exp %713 : vector<2x128xf32>
    %cst_123 = arith.constant 1.000000e+00 : f32
    %715 = vector.broadcast %cst_123 : f32 to vector<2x128xf32>
    %716 = arith.addf %715, %714 : vector<2x128xf32>
    %717 = arith.divf %715, %716 : vector<2x128xf32>
    %718 = arith.select %711, %712, %717 : vector<2x128xi1>, vector<2x128xf32>
    %719 = vector.extract_strided_slice %718 {offsets = [0, 0], sizes = [2, 32], strides = [1, 1]} : vector<2x128xf32> to vector<2x32xf32>
    %720 = vector.extract_strided_slice %718 {offsets = [0, 32], sizes = [2, 32], strides = [1, 1]} : vector<2x128xf32> to vector<2x32xf32>
    %721 = vector.extract_strided_slice %718 {offsets = [0, 64], sizes = [2, 32], strides = [1, 1]} : vector<2x128xf32> to vector<2x32xf32>
    %722 = vector.extract_strided_slice %718 {offsets = [0, 96], sizes = [2, 32], strides = [1, 1]} : vector<2x128xf32> to vector<2x32xf32>
    %723 = arith.mulf %720, %671 : vector<2x32xf32>
    %724 = arith.mulf %719, %721 : vector<2x32xf32>
    %725 = arith.addf %723, %724 : vector<2x32xf32>
    %726 = math.tanh %725 : vector<2x32xf32>
    %727 = arith.mulf %722, %726 : vector<2x32xf32>
    %728 = arith.truncf %703 : vector<2x32xf32> to vector<2x32xbf16>
    %729 = vector.extract_strided_slice %453 {offsets = [0, 0], sizes = [32, 128], strides = [1, 1]} : vector<32x256xbf16> to vector<32x128xbf16>
    %cst_124 = arith.constant dense<0.000000e+00> : vector<2x128xf32>
    %730 = tpu.matmul %728, %729, %cst_124 {dimension_numbers = #tpu.dot_dimension_numbers<[1], [0], [0], [1], [0, 0, 1, 1], [], []>} : vector<2x32xbf16>, vector<32x128xbf16>, vector<2x128xf32> -> vector<2x128xf32>
    %731 = arith.truncf %727 : vector<2x32xf32> to vector<2x32xbf16>
    %732 = vector.extract_strided_slice %453 {offsets = [0, 128], sizes = [32, 128], strides = [1, 1]} : vector<32x256xbf16> to vector<32x128xbf16>
    %cst_125 = arith.constant dense<0.000000e+00> : vector<2x128xf32>
    %733 = tpu.matmul %731, %732, %cst_125 {dimension_numbers = #tpu.dot_dimension_numbers<[1], [0], [0], [1], [0, 0, 1, 1], [], []>} : vector<2x32xbf16>, vector<32x128xbf16>, vector<2x128xf32> -> vector<2x128xf32>
    %734 = vector.extract_strided_slice %452 {offsets = [10, 0], sizes = [2, 128], strides = [1, 1]} : vector<16x256xf32> to vector<2x128xf32>
    %735 = arith.addf %734, %730 : vector<2x128xf32>
    %736 = tpu.iota {dimensions = array<i32: 1>} : vector<2x128xi32>
    %c64_i32_126 = arith.constant 64 : i32
    %737 = vector.broadcast %c64_i32_126 : i32 to vector<2x128xi32>
    %738 = arith.cmpi sge, %736, %737 : vector<2x128xi32>
    %c96_i32_127 = arith.constant 96 : i32
    %739 = vector.broadcast %c96_i32_127 : i32 to vector<2x128xi32>
    %740 = arith.cmpi slt, %736, %739 : vector<2x128xi32>
    %741 = arith.andi %738, %740 : vector<2x128xi1>
    %742 = math.tanh %735 : vector<2x128xf32>
    %743 = arith.negf %735 : vector<2x128xf32>
    %744 = math.exp %743 : vector<2x128xf32>
    %cst_128 = arith.constant 1.000000e+00 : f32
    %745 = vector.broadcast %cst_128 : f32 to vector<2x128xf32>
    %746 = arith.addf %745, %744 : vector<2x128xf32>
    %747 = arith.divf %745, %746 : vector<2x128xf32>
    %748 = arith.select %741, %742, %747 : vector<2x128xi1>, vector<2x128xf32>
    %749 = vector.extract_strided_slice %748 {offsets = [0, 0], sizes = [2, 32], strides = [1, 1]} : vector<2x128xf32> to vector<2x32xf32>
    %750 = vector.extract_strided_slice %748 {offsets = [0, 32], sizes = [2, 32], strides = [1, 1]} : vector<2x128xf32> to vector<2x32xf32>
    %751 = vector.extract_strided_slice %748 {offsets = [0, 64], sizes = [2, 32], strides = [1, 1]} : vector<2x128xf32> to vector<2x32xf32>
    %752 = vector.extract_strided_slice %748 {offsets = [0, 96], sizes = [2, 32], strides = [1, 1]} : vector<2x128xf32> to vector<2x32xf32>
    %753 = arith.mulf %750, %701 : vector<2x32xf32>
    %754 = arith.mulf %749, %751 : vector<2x32xf32>
    %755 = arith.addf %753, %754 : vector<2x32xf32>
    %756 = math.tanh %755 : vector<2x32xf32>
    %757 = arith.mulf %752, %756 : vector<2x32xf32>
    %758 = vector.extract_strided_slice %452 {offsets = [4, 128], sizes = [2, 128], strides = [1, 1]} : vector<16x256xf32> to vector<2x128xf32>
    %759 = arith.addf %758, %733 : vector<2x128xf32>
    %760 = tpu.iota {dimensions = array<i32: 1>} : vector<2x128xi32>
    %c64_i32_129 = arith.constant 64 : i32
    %761 = vector.broadcast %c64_i32_129 : i32 to vector<2x128xi32>
    %762 = arith.cmpi sge, %760, %761 : vector<2x128xi32>
    %c96_i32_130 = arith.constant 96 : i32
    %763 = vector.broadcast %c96_i32_130 : i32 to vector<2x128xi32>
    %764 = arith.cmpi slt, %760, %763 : vector<2x128xi32>
    %765 = arith.andi %762, %764 : vector<2x128xi1>
    %766 = math.tanh %759 : vector<2x128xf32>
    %767 = arith.negf %759 : vector<2x128xf32>
    %768 = math.exp %767 : vector<2x128xf32>
    %cst_131 = arith.constant 1.000000e+00 : f32
    %769 = vector.broadcast %cst_131 : f32 to vector<2x128xf32>
    %770 = arith.addf %769, %768 : vector<2x128xf32>
    %771 = arith.divf %769, %770 : vector<2x128xf32>
    %772 = arith.select %765, %766, %771 : vector<2x128xi1>, vector<2x128xf32>
    %773 = vector.extract_strided_slice %772 {offsets = [0, 0], sizes = [2, 32], strides = [1, 1]} : vector<2x128xf32> to vector<2x32xf32>
    %774 = vector.extract_strided_slice %772 {offsets = [0, 32], sizes = [2, 32], strides = [1, 1]} : vector<2x128xf32> to vector<2x32xf32>
    %775 = vector.extract_strided_slice %772 {offsets = [0, 64], sizes = [2, 32], strides = [1, 1]} : vector<2x128xf32> to vector<2x32xf32>
    %776 = vector.extract_strided_slice %772 {offsets = [0, 96], sizes = [2, 32], strides = [1, 1]} : vector<2x128xf32> to vector<2x32xf32>
    %777 = arith.mulf %774, %725 : vector<2x32xf32>
    %778 = arith.mulf %773, %775 : vector<2x32xf32>
    %779 = arith.addf %777, %778 : vector<2x32xf32>
    %780 = math.tanh %779 : vector<2x32xf32>
    %781 = arith.mulf %776, %780 : vector<2x32xf32>
    %782 = arith.truncf %757 : vector<2x32xf32> to vector<2x32xbf16>
    %783 = vector.extract_strided_slice %453 {offsets = [0, 0], sizes = [32, 128], strides = [1, 1]} : vector<32x256xbf16> to vector<32x128xbf16>
    %cst_132 = arith.constant dense<0.000000e+00> : vector<2x128xf32>
    %784 = tpu.matmul %782, %783, %cst_132 {dimension_numbers = #tpu.dot_dimension_numbers<[1], [0], [0], [1], [0, 0, 1, 1], [], []>} : vector<2x32xbf16>, vector<32x128xbf16>, vector<2x128xf32> -> vector<2x128xf32>
    %785 = arith.truncf %781 : vector<2x32xf32> to vector<2x32xbf16>
    %786 = vector.extract_strided_slice %453 {offsets = [0, 128], sizes = [32, 128], strides = [1, 1]} : vector<32x256xbf16> to vector<32x128xbf16>
    %cst_133 = arith.constant dense<0.000000e+00> : vector<2x128xf32>
    %787 = tpu.matmul %785, %786, %cst_133 {dimension_numbers = #tpu.dot_dimension_numbers<[1], [0], [0], [1], [0, 0, 1, 1], [], []>} : vector<2x32xbf16>, vector<32x128xbf16>, vector<2x128xf32> -> vector<2x128xf32>
    %788 = vector.extract_strided_slice %452 {offsets = [12, 0], sizes = [2, 128], strides = [1, 1]} : vector<16x256xf32> to vector<2x128xf32>
    %789 = arith.addf %788, %784 : vector<2x128xf32>
    %790 = tpu.iota {dimensions = array<i32: 1>} : vector<2x128xi32>
    %c64_i32_134 = arith.constant 64 : i32
    %791 = vector.broadcast %c64_i32_134 : i32 to vector<2x128xi32>
    %792 = arith.cmpi sge, %790, %791 : vector<2x128xi32>
    %c96_i32_135 = arith.constant 96 : i32
    %793 = vector.broadcast %c96_i32_135 : i32 to vector<2x128xi32>
    %794 = arith.cmpi slt, %790, %793 : vector<2x128xi32>
    %795 = arith.andi %792, %794 : vector<2x128xi1>
    %796 = math.tanh %789 : vector<2x128xf32>
    %797 = arith.negf %789 : vector<2x128xf32>
    %798 = math.exp %797 : vector<2x128xf32>
    %cst_136 = arith.constant 1.000000e+00 : f32
    %799 = vector.broadcast %cst_136 : f32 to vector<2x128xf32>
    %800 = arith.addf %799, %798 : vector<2x128xf32>
    %801 = arith.divf %799, %800 : vector<2x128xf32>
    %802 = arith.select %795, %796, %801 : vector<2x128xi1>, vector<2x128xf32>
    %803 = vector.extract_strided_slice %802 {offsets = [0, 0], sizes = [2, 32], strides = [1, 1]} : vector<2x128xf32> to vector<2x32xf32>
    %804 = vector.extract_strided_slice %802 {offsets = [0, 32], sizes = [2, 32], strides = [1, 1]} : vector<2x128xf32> to vector<2x32xf32>
    %805 = vector.extract_strided_slice %802 {offsets = [0, 64], sizes = [2, 32], strides = [1, 1]} : vector<2x128xf32> to vector<2x32xf32>
    %806 = vector.extract_strided_slice %802 {offsets = [0, 96], sizes = [2, 32], strides = [1, 1]} : vector<2x128xf32> to vector<2x32xf32>
    %807 = arith.mulf %804, %755 : vector<2x32xf32>
    %808 = arith.mulf %803, %805 : vector<2x32xf32>
    %809 = arith.addf %807, %808 : vector<2x32xf32>
    %810 = math.tanh %809 : vector<2x32xf32>
    %811 = arith.mulf %806, %810 : vector<2x32xf32>
    %812 = vector.extract_strided_slice %452 {offsets = [2, 128], sizes = [2, 128], strides = [1, 1]} : vector<16x256xf32> to vector<2x128xf32>
    %813 = arith.addf %812, %787 : vector<2x128xf32>
    %814 = tpu.iota {dimensions = array<i32: 1>} : vector<2x128xi32>
    %c64_i32_137 = arith.constant 64 : i32
    %815 = vector.broadcast %c64_i32_137 : i32 to vector<2x128xi32>
    %816 = arith.cmpi sge, %814, %815 : vector<2x128xi32>
    %c96_i32_138 = arith.constant 96 : i32
    %817 = vector.broadcast %c96_i32_138 : i32 to vector<2x128xi32>
    %818 = arith.cmpi slt, %814, %817 : vector<2x128xi32>
    %819 = arith.andi %816, %818 : vector<2x128xi1>
    %820 = math.tanh %813 : vector<2x128xf32>
    %821 = arith.negf %813 : vector<2x128xf32>
    %822 = math.exp %821 : vector<2x128xf32>
    %cst_139 = arith.constant 1.000000e+00 : f32
    %823 = vector.broadcast %cst_139 : f32 to vector<2x128xf32>
    %824 = arith.addf %823, %822 : vector<2x128xf32>
    %825 = arith.divf %823, %824 : vector<2x128xf32>
    %826 = arith.select %819, %820, %825 : vector<2x128xi1>, vector<2x128xf32>
    %827 = vector.extract_strided_slice %826 {offsets = [0, 0], sizes = [2, 32], strides = [1, 1]} : vector<2x128xf32> to vector<2x32xf32>
    %828 = vector.extract_strided_slice %826 {offsets = [0, 32], sizes = [2, 32], strides = [1, 1]} : vector<2x128xf32> to vector<2x32xf32>
    %829 = vector.extract_strided_slice %826 {offsets = [0, 64], sizes = [2, 32], strides = [1, 1]} : vector<2x128xf32> to vector<2x32xf32>
    %830 = vector.extract_strided_slice %826 {offsets = [0, 96], sizes = [2, 32], strides = [1, 1]} : vector<2x128xf32> to vector<2x32xf32>
    %831 = arith.mulf %828, %779 : vector<2x32xf32>
    %832 = arith.mulf %827, %829 : vector<2x32xf32>
    %833 = arith.addf %831, %832 : vector<2x32xf32>
    %834 = math.tanh %833 : vector<2x32xf32>
    %835 = arith.mulf %830, %834 : vector<2x32xf32>
    %836 = arith.truncf %811 : vector<2x32xf32> to vector<2x32xbf16>
    %837 = vector.extract_strided_slice %453 {offsets = [0, 0], sizes = [32, 128], strides = [1, 1]} : vector<32x256xbf16> to vector<32x128xbf16>
    %cst_140 = arith.constant dense<0.000000e+00> : vector<2x128xf32>
    %838 = tpu.matmul %836, %837, %cst_140 {dimension_numbers = #tpu.dot_dimension_numbers<[1], [0], [0], [1], [0, 0, 1, 1], [], []>} : vector<2x32xbf16>, vector<32x128xbf16>, vector<2x128xf32> -> vector<2x128xf32>
    %839 = arith.truncf %835 : vector<2x32xf32> to vector<2x32xbf16>
    %840 = vector.extract_strided_slice %453 {offsets = [0, 128], sizes = [32, 128], strides = [1, 1]} : vector<32x256xbf16> to vector<32x128xbf16>
    %cst_141 = arith.constant dense<0.000000e+00> : vector<2x128xf32>
    %841 = tpu.matmul %839, %840, %cst_141 {dimension_numbers = #tpu.dot_dimension_numbers<[1], [0], [0], [1], [0, 0, 1, 1], [], []>} : vector<2x32xbf16>, vector<32x128xbf16>, vector<2x128xf32> -> vector<2x128xf32>
    %842 = vector.extract_strided_slice %452 {offsets = [14, 0], sizes = [2, 128], strides = [1, 1]} : vector<16x256xf32> to vector<2x128xf32>
    %843 = arith.addf %842, %838 : vector<2x128xf32>
    %844 = tpu.iota {dimensions = array<i32: 1>} : vector<2x128xi32>
    %c64_i32_142 = arith.constant 64 : i32
    %845 = vector.broadcast %c64_i32_142 : i32 to vector<2x128xi32>
    %846 = arith.cmpi sge, %844, %845 : vector<2x128xi32>
    %c96_i32_143 = arith.constant 96 : i32
    %847 = vector.broadcast %c96_i32_143 : i32 to vector<2x128xi32>
    %848 = arith.cmpi slt, %844, %847 : vector<2x128xi32>
    %849 = arith.andi %846, %848 : vector<2x128xi1>
    %850 = math.tanh %843 : vector<2x128xf32>
    %851 = arith.negf %843 : vector<2x128xf32>
    %852 = math.exp %851 : vector<2x128xf32>
    %cst_144 = arith.constant 1.000000e+00 : f32
    %853 = vector.broadcast %cst_144 : f32 to vector<2x128xf32>
    %854 = arith.addf %853, %852 : vector<2x128xf32>
    %855 = arith.divf %853, %854 : vector<2x128xf32>
    %856 = arith.select %849, %850, %855 : vector<2x128xi1>, vector<2x128xf32>
    %857 = vector.extract_strided_slice %856 {offsets = [0, 0], sizes = [2, 32], strides = [1, 1]} : vector<2x128xf32> to vector<2x32xf32>
    %858 = vector.extract_strided_slice %856 {offsets = [0, 32], sizes = [2, 32], strides = [1, 1]} : vector<2x128xf32> to vector<2x32xf32>
    %859 = vector.extract_strided_slice %856 {offsets = [0, 64], sizes = [2, 32], strides = [1, 1]} : vector<2x128xf32> to vector<2x32xf32>
    %860 = vector.extract_strided_slice %856 {offsets = [0, 96], sizes = [2, 32], strides = [1, 1]} : vector<2x128xf32> to vector<2x32xf32>
    %861 = arith.mulf %858, %809 : vector<2x32xf32>
    %862 = arith.mulf %857, %859 : vector<2x32xf32>
    %863 = arith.addf %861, %862 : vector<2x32xf32>
    %864 = math.tanh %863 : vector<2x32xf32>
    %865 = arith.mulf %860, %864 : vector<2x32xf32>
    %866 = vector.extract_strided_slice %452 {offsets = [0, 128], sizes = [2, 128], strides = [1, 1]} : vector<16x256xf32> to vector<2x128xf32>
    %867 = arith.addf %866, %841 : vector<2x128xf32>
    %868 = tpu.iota {dimensions = array<i32: 1>} : vector<2x128xi32>
    %c64_i32_145 = arith.constant 64 : i32
    %869 = vector.broadcast %c64_i32_145 : i32 to vector<2x128xi32>
    %870 = arith.cmpi sge, %868, %869 : vector<2x128xi32>
    %c96_i32_146 = arith.constant 96 : i32
    %871 = vector.broadcast %c96_i32_146 : i32 to vector<2x128xi32>
    %872 = arith.cmpi slt, %868, %871 : vector<2x128xi32>
    %873 = arith.andi %870, %872 : vector<2x128xi1>
    %874 = math.tanh %867 : vector<2x128xf32>
    %875 = arith.negf %867 : vector<2x128xf32>
    %876 = math.exp %875 : vector<2x128xf32>
    %cst_147 = arith.constant 1.000000e+00 : f32
    %877 = vector.broadcast %cst_147 : f32 to vector<2x128xf32>
    %878 = arith.addf %877, %876 : vector<2x128xf32>
    %879 = arith.divf %877, %878 : vector<2x128xf32>
    %880 = arith.select %873, %874, %879 : vector<2x128xi1>, vector<2x128xf32>
    %881 = vector.extract_strided_slice %880 {offsets = [0, 0], sizes = [2, 32], strides = [1, 1]} : vector<2x128xf32> to vector<2x32xf32>
    %882 = vector.extract_strided_slice %880 {offsets = [0, 32], sizes = [2, 32], strides = [1, 1]} : vector<2x128xf32> to vector<2x32xf32>
    %883 = vector.extract_strided_slice %880 {offsets = [0, 64], sizes = [2, 32], strides = [1, 1]} : vector<2x128xf32> to vector<2x32xf32>
    %884 = vector.extract_strided_slice %880 {offsets = [0, 96], sizes = [2, 32], strides = [1, 1]} : vector<2x128xf32> to vector<2x32xf32>
    %885 = arith.mulf %882, %833 : vector<2x32xf32>
    %886 = arith.mulf %881, %883 : vector<2x32xf32>
    %887 = arith.addf %885, %886 : vector<2x32xf32>
    %888 = math.tanh %887 : vector<2x32xf32>
    %889 = arith.mulf %884, %888 : vector<2x32xf32>
    %890 = tpu.concatenate %487, %889, %541, %835, %595, %781, %649, %727, %703, %673, %757, %619, %811, %565, %865, %511 in 1 : vector<2x32xf32>, vector<2x32xf32>, vector<2x32xf32>, vector<2x32xf32>, vector<2x32xf32>, vector<2x32xf32>, vector<2x32xf32>, vector<2x32xf32>, vector<2x32xf32>, vector<2x32xf32>, vector<2x32xf32>, vector<2x32xf32>, vector<2x32xf32>, vector<2x32xf32>, vector<2x32xf32>, vector<2x32xf32> -> vector<2x512xf32>
    %c0_148 = arith.constant 0 : index
    %c0_149 = arith.constant 0 : index
    %891 = vector.load %arg7[%c0_148, %c0_149] : memref<2x512xf32, #tpu.memory_space<vmem>>, vector<2x512xf32>
    tpu.vector_store %arg7[%c0_148, %c0_149], %890 {strides = array<i32>} : memref<2x512xf32, #tpu.memory_space<vmem>>, vector<2x512xf32>,
    return
  }
}

module attributes {stable_mosaic.version = 11 : i64} {
  func.func @_attn_head_kernel(%arg0: i32, %arg1: memref<1x8x64xf32, #tpu.memory_space<vmem>>, %arg2: memref<1x8x8xf32, #tpu.memory_space<vmem>>, %arg3: memref<64x192xbf16, #tpu.memory_space<vmem>>, %arg4: memref<1x192xf32, #tpu.memory_space<vmem>>, %arg5: memref<64x64xbf16, #tpu.memory_space<vmem>>, %arg6: memref<1x64xf32, #tpu.memory_space<vmem>>, %arg7: memref<1x64xf32, #tpu.memory_space<vmem>>, %arg8: memref<1x64xf32, #tpu.memory_space<vmem>>, %arg9: memref<64x128xbf16, #tpu.memory_space<vmem>>, %arg10: memref<1x128xf32, #tpu.memory_space<vmem>>, %arg11: memref<128x64xbf16, #tpu.memory_space<vmem>>, %arg12: memref<1x64xf32, #tpu.memory_space<vmem>>, %arg13: memref<1x64xf32, #tpu.memory_space<vmem>>, %arg14: memref<1x64xf32, #tpu.memory_space<vmem>>, %arg15: memref<8x64xbf16, #tpu.memory_space<vmem>>, %arg16: memref<1x64xf32, #tpu.memory_space<vmem>>, %arg17: memref<64x64xbf16, #tpu.memory_space<vmem>>, %arg18: memref<64x64xbf16, #tpu.memory_space<vmem>>, %arg19: memref<1x64xf32, #tpu.memory_space<vmem>>, %arg20: memref<64x32xbf16, #tpu.memory_space<vmem>>, %arg21: memref<1x32xf32, #tpu.memory_space<vmem>>, %arg22: memref<32x16xbf16, #tpu.memory_space<vmem>>, %arg23: memref<1x16xf32, #tpu.memory_space<vmem>>, %arg24: memref<16x128xbf16, #tpu.memory_space<vmem>>, %arg25: memref<1x128xf32, #tpu.memory_space<vmem>>, %arg26: memref<1x1x128xf32, #tpu.memory_space<vmem>>) attributes {dimension_semantics = [#tpu.dimension_semantics<parallel>], iteration_bounds = array<i64: 2>, scalar_prefetch = 0 : i64, scratch_operands = 0 : i64, tpu.core_type = #tpu.core_type<tc>, window_params = [{transform_indices = @transform_0, window_bounds = array<i64: 1, 8, 64>}, {transform_indices = @transform_1, window_bounds = array<i64: 1, 8, 8>}, {pipeline_mode = #tpu.pipeline_mode<synchronous>, transform_indices = @transform_2, window_bounds = array<i64: 64, 192>}, {pipeline_mode = #tpu.pipeline_mode<synchronous>, transform_indices = @transform_3, window_bounds = array<i64: 1, 192>}, {pipeline_mode = #tpu.pipeline_mode<synchronous>, transform_indices = @transform_4, window_bounds = array<i64: 64, 64>}, {pipeline_mode = #tpu.pipeline_mode<synchronous>, transform_indices = @transform_5, window_bounds = array<i64: 1, 64>}, {pipeline_mode = #tpu.pipeline_mode<synchronous>, transform_indices = @transform_6, window_bounds = array<i64: 1, 64>}, {pipeline_mode = #tpu.pipeline_mode<synchronous>, transform_indices = @transform_7, window_bounds = array<i64: 1, 64>}, {pipeline_mode = #tpu.pipeline_mode<synchronous>, transform_indices = @transform_8, window_bounds = array<i64: 64, 128>}, {pipeline_mode = #tpu.pipeline_mode<synchronous>, transform_indices = @transform_9, window_bounds = array<i64: 1, 128>}, {pipeline_mode = #tpu.pipeline_mode<synchronous>, transform_indices = @transform_10, window_bounds = array<i64: 128, 64>}, {pipeline_mode = #tpu.pipeline_mode<synchronous>, transform_indices = @transform_11, window_bounds = array<i64: 1, 64>}, {pipeline_mode = #tpu.pipeline_mode<synchronous>, transform_indices = @transform_12, window_bounds = array<i64: 1, 64>}, {pipeline_mode = #tpu.pipeline_mode<synchronous>, transform_indices = @transform_13, window_bounds = array<i64: 1, 64>}, {pipeline_mode = #tpu.pipeline_mode<synchronous>, transform_indices = @transform_14, window_bounds = array<i64: 8, 64>}, {pipeline_mode = #tpu.pipeline_mode<synchronous>, transform_indices = @transform_15, window_bounds = array<i64: 1, 64>}, {pipeline_mode = #tpu.pipeline_mode<synchronous>, transform_indices = @transform_16, window_bounds = array<i64: 64, 64>}, {pipeline_mode = #tpu.pipeline_mode<synchronous>, transform_indices = @transform_17, window_bounds = array<i64: 64, 64>}, {pipeline_mode = #tpu.pipeline_mode<synchronous>, transform_indices = @transform_18, window_bounds = array<i64: 1, 64>}, {pipeline_mode = #tpu.pipeline_mode<synchronous>, transform_indices = @transform_19, window_bounds = array<i64: 64, 32>}, {pipeline_mode = #tpu.pipeline_mode<synchronous>, transform_indices = @transform_20, window_bounds = array<i64: 1, 32>}, {pipeline_mode = #tpu.pipeline_mode<synchronous>, transform_indices = @transform_21, window_bounds = array<i64: 32, 16>}, {pipeline_mode = #tpu.pipeline_mode<synchronous>, transform_indices = @transform_22, window_bounds = array<i64: 1, 16>}, {pipeline_mode = #tpu.pipeline_mode<synchronous>, transform_indices = @transform_23, window_bounds = array<i64: 16, 128>}, {pipeline_mode = #tpu.pipeline_mode<synchronous>, transform_indices = @transform_24, window_bounds = array<i64: 1, 128>}, {transform_indices = @transform_25, window_bounds = array<i64: 1, 1, 128>}]} {
    %c0 = arith.constant 0 : index
    %c0_0 = arith.constant 0 : index
    %c0_1 = arith.constant 0 : index
    %0 = vector.load %arg1[%c0, %c0_0, %c0_1] : memref<1x8x64xf32, #tpu.memory_space<vmem>>, vector<1x8x64xf32>
    %1 = vector.shape_cast %0 : vector<1x8x64xf32> to vector<8x64xf32>
    %2 = arith.truncf %1 : vector<8x64xf32> to vector<8x64xbf16>
    %c0_2 = arith.constant 0 : index
    %c0_3 = arith.constant 0 : index
    %3 = vector.load %arg3[%c0_2, %c0_3] : memref<64x192xbf16, #tpu.memory_space<vmem>>, vector<64x192xbf16>
    %cst = arith.constant dense<0.000000e+00> : vector<8x192xf32>
    %4 = tpu.matmul %2, %3, %cst {dimension_numbers = #tpu.dot_dimension_numbers<[1], [0], [0], [1], [0, 0, 1, 1], [], []>} : vector<8x64xbf16>, vector<64x192xbf16>, vector<8x192xf32> -> vector<8x192xf32>
    %c0_4 = arith.constant 0 : index
    %c0_5 = arith.constant 0 : index
    %5 = vector.load %arg4[%c0_4, %c0_5] : memref<1x192xf32, #tpu.memory_space<vmem>>, vector<1x192xf32>
    %6 = vector.broadcast %5 : vector<1x192xf32> to vector<8x192xf32>
    %7 = arith.addf %4, %6 : vector<8x192xf32>
    %8 = vector.extract_strided_slice %7 {offsets = [0, 0], sizes = [8, 64], strides = [1, 1]} : vector<8x192xf32> to vector<8x64xf32>
    %9 = vector.extract_strided_slice %7 {offsets = [0, 64], sizes = [8, 64], strides = [1, 1]} : vector<8x192xf32> to vector<8x64xf32>
    %10 = vector.extract_strided_slice %7 {offsets = [0, 128], sizes = [8, 64], strides = [1, 1]} : vector<8x192xf32> to vector<8x64xf32>
    %11 = vector.extract_strided_slice %8 {offsets = [0, 0], sizes = [8, 16], strides = [1, 1]} : vector<8x64xf32> to vector<8x16xf32>
    %12 = arith.truncf %11 : vector<8x16xf32> to vector<8x16xbf16>
    %13 = vector.extract_strided_slice %9 {offsets = [0, 0], sizes = [8, 16], strides = [1, 1]} : vector<8x64xf32> to vector<8x16xf32>
    %14 = arith.truncf %13 : vector<8x16xf32> to vector<8x16xbf16>
    %15 = vector.extract_strided_slice %10 {offsets = [0, 0], sizes = [8, 16], strides = [1, 1]} : vector<8x64xf32> to vector<8x16xf32>
    %16 = arith.truncf %15 : vector<8x16xf32> to vector<8x16xbf16>
    "tpu.trace_start"() <{level = 10 : i32, message = "qd,kd->qk"}> : () -> ()
    %cst_6 = arith.constant dense<0.000000e+00> : vector<8x8xf32>
    %17 = tpu.matmul %12, %14, %cst_6 {dimension_numbers = #tpu.dot_dimension_numbers<[1], [1], [0], [0], [0, 0, 1, 0], [], []>} : vector<8x16xbf16>, vector<8x16xbf16>, vector<8x8xf32> -> vector<8x8xf32>
    "tpu.trace_stop"() : () -> ()
    %cst_7 = arith.constant 2.500000e-01 : f32
    %18 = vector.broadcast %cst_7 : f32 to vector<8x8xf32>
    %19 = arith.mulf %17, %18 : vector<8x8xf32>
    %cst_8 = arith.constant dense<0xFF800000> : vector<8xf32>
    %20 = vector.multi_reduction <maximumf>, %19, %cst_8 [1] : vector<8x8xf32> to vector<8xf32>
    %21 = vector.shape_cast %20 : vector<8xf32> to vector<8x1xf32>
    %22 = vector.broadcast %21 : vector<8x1xf32> to vector<8x8xf32>
    %23 = arith.subf %19, %22 : vector<8x8xf32>
    %24 = math.exp %23 : vector<8x8xf32>
    %cst_9 = arith.constant dense<0.000000e+00> : vector<8xf32>
    %25 = vector.multi_reduction <add>, %24, %cst_9 [1] : vector<8x8xf32> to vector<8xf32>
    %26 = vector.shape_cast %25 : vector<8xf32> to vector<8x1xf32>
    %27 = tpu.reciprocal %26 {approx = true} : vector<8x1xf32> -> vector<8x1xf32>
    %28 = vector.broadcast %27 : vector<8x1xf32> to vector<8x8xf32>
    %29 = arith.mulf %24, %28 : vector<8x8xf32>
    %30 = arith.truncf %29 : vector<8x8xf32> to vector<8x8xbf16>
    %cst_10 = arith.constant dense<0.000000e+00> : vector<8x16xf32>
    %31 = tpu.matmul %30, %16, %cst_10 {dimension_numbers = #tpu.dot_dimension_numbers<[1], [0], [0], [1], [0, 0, 1, 1], [], []>} : vector<8x8xbf16>, vector<8x16xbf16>, vector<8x16xf32> -> vector<8x16xf32>
    %32 = vector.extract_strided_slice %8 {offsets = [0, 16], sizes = [8, 16], strides = [1, 1]} : vector<8x64xf32> to vector<8x16xf32>
    %33 = arith.truncf %32 : vector<8x16xf32> to vector<8x16xbf16>
    %34 = vector.extract_strided_slice %9 {offsets = [0, 16], sizes = [8, 16], strides = [1, 1]} : vector<8x64xf32> to vector<8x16xf32>
    %35 = arith.truncf %34 : vector<8x16xf32> to vector<8x16xbf16>
    %36 = vector.extract_strided_slice %10 {offsets = [0, 16], sizes = [8, 16], strides = [1, 1]} : vector<8x64xf32> to vector<8x16xf32>
    %37 = arith.truncf %36 : vector<8x16xf32> to vector<8x16xbf16>
    "tpu.trace_start"() <{level = 10 : i32, message = "qd,kd->qk"}> : () -> ()
    %cst_11 = arith.constant dense<0.000000e+00> : vector<8x8xf32>
    %38 = tpu.matmul %33, %35, %cst_11 {dimension_numbers = #tpu.dot_dimension_numbers<[1], [1], [0], [0], [0, 0, 1, 0], [], []>} : vector<8x16xbf16>, vector<8x16xbf16>, vector<8x8xf32> -> vector<8x8xf32>
    "tpu.trace_stop"() : () -> ()
    %cst_12 = arith.constant 2.500000e-01 : f32
    %39 = vector.broadcast %cst_12 : f32 to vector<8x8xf32>
    %40 = arith.mulf %38, %39 : vector<8x8xf32>
    %cst_13 = arith.constant dense<0xFF800000> : vector<8xf32>
    %41 = vector.multi_reduction <maximumf>, %40, %cst_13 [1] : vector<8x8xf32> to vector<8xf32>
    %42 = vector.shape_cast %41 : vector<8xf32> to vector<8x1xf32>
    %43 = vector.broadcast %42 : vector<8x1xf32> to vector<8x8xf32>
    %44 = arith.subf %40, %43 : vector<8x8xf32>
    %45 = math.exp %44 : vector<8x8xf32>
    %cst_14 = arith.constant dense<0.000000e+00> : vector<8xf32>
    %46 = vector.multi_reduction <add>, %45, %cst_14 [1] : vector<8x8xf32> to vector<8xf32>
    %47 = vector.shape_cast %46 : vector<8xf32> to vector<8x1xf32>
    %48 = tpu.reciprocal %47 {approx = true} : vector<8x1xf32> -> vector<8x1xf32>
    %49 = vector.broadcast %48 : vector<8x1xf32> to vector<8x8xf32>
    %50 = arith.mulf %45, %49 : vector<8x8xf32>
    %51 = arith.truncf %50 : vector<8x8xf32> to vector<8x8xbf16>
    %cst_15 = arith.constant dense<0.000000e+00> : vector<8x16xf32>
    %52 = tpu.matmul %51, %37, %cst_15 {dimension_numbers = #tpu.dot_dimension_numbers<[1], [0], [0], [1], [0, 0, 1, 1], [], []>} : vector<8x8xbf16>, vector<8x16xbf16>, vector<8x16xf32> -> vector<8x16xf32>
    %53 = vector.extract_strided_slice %8 {offsets = [0, 32], sizes = [8, 16], strides = [1, 1]} : vector<8x64xf32> to vector<8x16xf32>
    %54 = arith.truncf %53 : vector<8x16xf32> to vector<8x16xbf16>
    %55 = vector.extract_strided_slice %9 {offsets = [0, 32], sizes = [8, 16], strides = [1, 1]} : vector<8x64xf32> to vector<8x16xf32>
    %56 = arith.truncf %55 : vector<8x16xf32> to vector<8x16xbf16>
    %57 = vector.extract_strided_slice %10 {offsets = [0, 32], sizes = [8, 16], strides = [1, 1]} : vector<8x64xf32> to vector<8x16xf32>
    %58 = arith.truncf %57 : vector<8x16xf32> to vector<8x16xbf16>
    "tpu.trace_start"() <{level = 10 : i32, message = "qd,kd->qk"}> : () -> ()
    %cst_16 = arith.constant dense<0.000000e+00> : vector<8x8xf32>
    %59 = tpu.matmul %54, %56, %cst_16 {dimension_numbers = #tpu.dot_dimension_numbers<[1], [1], [0], [0], [0, 0, 1, 0], [], []>} : vector<8x16xbf16>, vector<8x16xbf16>, vector<8x8xf32> -> vector<8x8xf32>
    "tpu.trace_stop"() : () -> ()
    %cst_17 = arith.constant 2.500000e-01 : f32
    %60 = vector.broadcast %cst_17 : f32 to vector<8x8xf32>
    %61 = arith.mulf %59, %60 : vector<8x8xf32>
    %cst_18 = arith.constant dense<0xFF800000> : vector<8xf32>
    %62 = vector.multi_reduction <maximumf>, %61, %cst_18 [1] : vector<8x8xf32> to vector<8xf32>
    %63 = vector.shape_cast %62 : vector<8xf32> to vector<8x1xf32>
    %64 = vector.broadcast %63 : vector<8x1xf32> to vector<8x8xf32>
    %65 = arith.subf %61, %64 : vector<8x8xf32>
    %66 = math.exp %65 : vector<8x8xf32>
    %cst_19 = arith.constant dense<0.000000e+00> : vector<8xf32>
    %67 = vector.multi_reduction <add>, %66, %cst_19 [1] : vector<8x8xf32> to vector<8xf32>
    %68 = vector.shape_cast %67 : vector<8xf32> to vector<8x1xf32>
    %69 = tpu.reciprocal %68 {approx = true} : vector<8x1xf32> -> vector<8x1xf32>
    %70 = vector.broadcast %69 : vector<8x1xf32> to vector<8x8xf32>
    %71 = arith.mulf %66, %70 : vector<8x8xf32>
    %72 = arith.truncf %71 : vector<8x8xf32> to vector<8x8xbf16>
    %cst_20 = arith.constant dense<0.000000e+00> : vector<8x16xf32>
    %73 = tpu.matmul %72, %58, %cst_20 {dimension_numbers = #tpu.dot_dimension_numbers<[1], [0], [0], [1], [0, 0, 1, 1], [], []>} : vector<8x8xbf16>, vector<8x16xbf16>, vector<8x16xf32> -> vector<8x16xf32>
    %74 = vector.extract_strided_slice %8 {offsets = [0, 48], sizes = [8, 16], strides = [1, 1]} : vector<8x64xf32> to vector<8x16xf32>
    %75 = arith.truncf %74 : vector<8x16xf32> to vector<8x16xbf16>
    %76 = vector.extract_strided_slice %9 {offsets = [0, 48], sizes = [8, 16], strides = [1, 1]} : vector<8x64xf32> to vector<8x16xf32>
    %77 = arith.truncf %76 : vector<8x16xf32> to vector<8x16xbf16>
    %78 = vector.extract_strided_slice %10 {offsets = [0, 48], sizes = [8, 16], strides = [1, 1]} : vector<8x64xf32> to vector<8x16xf32>
    %79 = arith.truncf %78 : vector<8x16xf32> to vector<8x16xbf16>
    "tpu.trace_start"() <{level = 10 : i32, message = "qd,kd->qk"}> : () -> ()
    %cst_21 = arith.constant dense<0.000000e+00> : vector<8x8xf32>
    %80 = tpu.matmul %75, %77, %cst_21 {dimension_numbers = #tpu.dot_dimension_numbers<[1], [1], [0], [0], [0, 0, 1, 0], [], []>} : vector<8x16xbf16>, vector<8x16xbf16>, vector<8x8xf32> -> vector<8x8xf32>
    "tpu.trace_stop"() : () -> ()
    %cst_22 = arith.constant 2.500000e-01 : f32
    %81 = vector.broadcast %cst_22 : f32 to vector<8x8xf32>
    %82 = arith.mulf %80, %81 : vector<8x8xf32>
    %cst_23 = arith.constant dense<0xFF800000> : vector<8xf32>
    %83 = vector.multi_reduction <maximumf>, %82, %cst_23 [1] : vector<8x8xf32> to vector<8xf32>
    %84 = vector.shape_cast %83 : vector<8xf32> to vector<8x1xf32>
    %85 = vector.broadcast %84 : vector<8x1xf32> to vector<8x8xf32>
    %86 = arith.subf %82, %85 : vector<8x8xf32>
    %87 = math.exp %86 : vector<8x8xf32>
    %cst_24 = arith.constant dense<0.000000e+00> : vector<8xf32>
    %88 = vector.multi_reduction <add>, %87, %cst_24 [1] : vector<8x8xf32> to vector<8xf32>
    %89 = vector.shape_cast %88 : vector<8xf32> to vector<8x1xf32>
    %90 = tpu.reciprocal %89 {approx = true} : vector<8x1xf32> -> vector<8x1xf32>
    %91 = vector.broadcast %90 : vector<8x1xf32> to vector<8x8xf32>
    %92 = arith.mulf %87, %91 : vector<8x8xf32>
    %93 = arith.truncf %92 : vector<8x8xf32> to vector<8x8xbf16>
    %cst_25 = arith.constant dense<0.000000e+00> : vector<8x16xf32>
    %94 = tpu.matmul %93, %79, %cst_25 {dimension_numbers = #tpu.dot_dimension_numbers<[1], [0], [0], [1], [0, 0, 1, 1], [], []>} : vector<8x8xbf16>, vector<8x16xbf16>, vector<8x16xf32> -> vector<8x16xf32>
    %95 = tpu.concatenate %31, %52, %73, %94 in 1 : vector<8x16xf32>, vector<8x16xf32>, vector<8x16xf32>, vector<8x16xf32> -> vector<8x64xf32>
    %96 = arith.truncf %95 : vector<8x64xf32> to vector<8x64xbf16>
    %c0_26 = arith.constant 0 : index
    %c0_27 = arith.constant 0 : index
    %97 = vector.load %arg5[%c0_26, %c0_27] : memref<64x64xbf16, #tpu.memory_space<vmem>>, vector<64x64xbf16>
    %cst_28 = arith.constant dense<0.000000e+00> : vector<8x64xf32>
    %98 = tpu.matmul %96, %97, %cst_28 {dimension_numbers = #tpu.dot_dimension_numbers<[1], [0], [0], [1], [0, 0, 1, 1], [], []>} : vector<8x64xbf16>, vector<64x64xbf16>, vector<8x64xf32> -> vector<8x64xf32>
    %c0_29 = arith.constant 0 : index
    %c0_30 = arith.constant 0 : index
    %99 = vector.load %arg6[%c0_29, %c0_30] : memref<1x64xf32, #tpu.memory_space<vmem>>, vector<1x64xf32>
    %100 = vector.broadcast %99 : vector<1x64xf32> to vector<8x64xf32>
    %101 = arith.addf %98, %100 : vector<8x64xf32>
    %102 = arith.addf %1, %101 : vector<8x64xf32>
    %c0_31 = arith.constant 0 : index
    %c0_32 = arith.constant 0 : index
    %103 = vector.load %arg7[%c0_31, %c0_32] : memref<1x64xf32, #tpu.memory_space<vmem>>, vector<1x64xf32>
    %c0_33 = arith.constant 0 : index
    %c0_34 = arith.constant 0 : index
    %104 = vector.load %arg8[%c0_33, %c0_34] : memref<1x64xf32, #tpu.memory_space<vmem>>, vector<1x64xf32>
    %cst_35 = arith.constant dense<0.000000e+00> : vector<8xf32>
    %105 = vector.multi_reduction <add>, %102, %cst_35 [1] : vector<8x64xf32> to vector<8xf32>
    %106 = vector.shape_cast %105 : vector<8xf32> to vector<8x1xf32>
    %cst_36 = arith.constant 6.400000e+01 : f32
    %107 = vector.broadcast %cst_36 : f32 to vector<8x1xf32>
    %108 = arith.divf %106, %107 : vector<8x1xf32>
    %109 = vector.broadcast %108 : vector<8x1xf32> to vector<8x64xf32>
    %110 = arith.subf %102, %109 : vector<8x64xf32>
    %111 = arith.mulf %110, %110 : vector<8x64xf32>
    %cst_37 = arith.constant dense<0.000000e+00> : vector<8xf32>
    %112 = vector.multi_reduction <add>, %111, %cst_37 [1] : vector<8x64xf32> to vector<8xf32>
    %113 = vector.shape_cast %112 : vector<8xf32> to vector<8x1xf32>
    %cst_38 = arith.constant 6.400000e+01 : f32
    %114 = vector.broadcast %cst_38 : f32 to vector<8x1xf32>
    %115 = arith.divf %113, %114 : vector<8x1xf32>
    %116 = vector.broadcast %108 : vector<8x1xf32> to vector<8x64xf32>
    %117 = arith.subf %102, %116 : vector<8x64xf32>
    %cst_39 = arith.constant 9.99999974E-6 : f32
    %118 = vector.broadcast %cst_39 : f32 to vector<8x1xf32>
    %119 = arith.addf %115, %118 : vector<8x1xf32>
    %120 = math.rsqrt %119 : vector<8x1xf32>
    %121 = vector.broadcast %120 : vector<8x1xf32> to vector<8x64xf32>
    %122 = arith.mulf %117, %121 : vector<8x64xf32>
    %123 = vector.broadcast %103 : vector<1x64xf32> to vector<8x64xf32>
    %124 = arith.mulf %122, %123 : vector<8x64xf32>
    %125 = vector.broadcast %104 : vector<1x64xf32> to vector<8x64xf32>
    %126 = arith.addf %124, %125 : vector<8x64xf32>
    %127 = arith.truncf %126 : vector<8x64xf32> to vector<8x64xbf16>
    %c0_40 = arith.constant 0 : index
    %c0_41 = arith.constant 0 : index
    %128 = vector.load %arg9[%c0_40, %c0_41] : memref<64x128xbf16, #tpu.memory_space<vmem>>, vector<64x128xbf16>
    %cst_42 = arith.constant dense<0.000000e+00> : vector<8x128xf32>
    %129 = tpu.matmul %127, %128, %cst_42 {dimension_numbers = #tpu.dot_dimension_numbers<[1], [0], [0], [1], [0, 0, 1, 1], [], []>} : vector<8x64xbf16>, vector<64x128xbf16>, vector<8x128xf32> -> vector<8x128xf32>
    %c0_43 = arith.constant 0 : index
    %c0_44 = arith.constant 0 : index
    %130 = vector.load %arg10[%c0_43, %c0_44] : memref<1x128xf32, #tpu.memory_space<vmem>>, vector<1x128xf32>
    %131 = vector.broadcast %130 : vector<1x128xf32> to vector<8x128xf32>
    %132 = arith.addf %129, %131 : vector<8x128xf32>
    %cst_45 = arith.constant 0.000000e+00 : f32
    %133 = vector.broadcast %cst_45 : f32 to vector<8x128xf32>
    %134 = arith.maximumf %132, %133 : vector<8x128xf32>
    %135 = arith.truncf %134 : vector<8x128xf32> to vector<8x128xbf16>
    %c0_46 = arith.constant 0 : index
    %c0_47 = arith.constant 0 : index
    %136 = vector.load %arg11[%c0_46, %c0_47] : memref<128x64xbf16, #tpu.memory_space<vmem>>, vector<128x64xbf16>
    %cst_48 = arith.constant dense<0.000000e+00> : vector<8x64xf32>
    %137 = tpu.matmul %135, %136, %cst_48 {dimension_numbers = #tpu.dot_dimension_numbers<[1], [0], [0], [1], [0, 0, 1, 1], [], []>} : vector<8x128xbf16>, vector<128x64xbf16>, vector<8x64xf32> -> vector<8x64xf32>
    %c0_49 = arith.constant 0 : index
    %c0_50 = arith.constant 0 : index
    %138 = vector.load %arg12[%c0_49, %c0_50] : memref<1x64xf32, #tpu.memory_space<vmem>>, vector<1x64xf32>
    %139 = vector.broadcast %138 : vector<1x64xf32> to vector<8x64xf32>
    %140 = arith.addf %137, %139 : vector<8x64xf32>
    %141 = arith.addf %126, %140 : vector<8x64xf32>
    %c0_51 = arith.constant 0 : index
    %c0_52 = arith.constant 0 : index
    %142 = vector.load %arg13[%c0_51, %c0_52] : memref<1x64xf32, #tpu.memory_space<vmem>>, vector<1x64xf32>
    %c0_53 = arith.constant 0 : index
    %c0_54 = arith.constant 0 : index
    %143 = vector.load %arg14[%c0_53, %c0_54] : memref<1x64xf32, #tpu.memory_space<vmem>>, vector<1x64xf32>
    %cst_55 = arith.constant dense<0.000000e+00> : vector<8xf32>
    %144 = vector.multi_reduction <add>, %141, %cst_55 [1] : vector<8x64xf32> to vector<8xf32>
    %145 = vector.shape_cast %144 : vector<8xf32> to vector<8x1xf32>
    %cst_56 = arith.constant 6.400000e+01 : f32
    %146 = vector.broadcast %cst_56 : f32 to vector<8x1xf32>
    %147 = arith.divf %145, %146 : vector<8x1xf32>
    %148 = vector.broadcast %147 : vector<8x1xf32> to vector<8x64xf32>
    %149 = arith.subf %141, %148 : vector<8x64xf32>
    %150 = arith.mulf %149, %149 : vector<8x64xf32>
    %cst_57 = arith.constant dense<0.000000e+00> : vector<8xf32>
    %151 = vector.multi_reduction <add>, %150, %cst_57 [1] : vector<8x64xf32> to vector<8xf32>
    %152 = vector.shape_cast %151 : vector<8xf32> to vector<8x1xf32>
    %cst_58 = arith.constant 6.400000e+01 : f32
    %153 = vector.broadcast %cst_58 : f32 to vector<8x1xf32>
    %154 = arith.divf %152, %153 : vector<8x1xf32>
    %155 = vector.broadcast %147 : vector<8x1xf32> to vector<8x64xf32>
    %156 = arith.subf %141, %155 : vector<8x64xf32>
    %cst_59 = arith.constant 9.99999974E-6 : f32
    %157 = vector.broadcast %cst_59 : f32 to vector<8x1xf32>
    %158 = arith.addf %154, %157 : vector<8x1xf32>
    %159 = math.rsqrt %158 : vector<8x1xf32>
    %160 = vector.broadcast %159 : vector<8x1xf32> to vector<8x64xf32>
    %161 = arith.mulf %156, %160 : vector<8x64xf32>
    %162 = vector.broadcast %142 : vector<1x64xf32> to vector<8x64xf32>
    %163 = arith.mulf %161, %162 : vector<8x64xf32>
    %164 = vector.broadcast %143 : vector<1x64xf32> to vector<8x64xf32>
    %165 = arith.addf %163, %164 : vector<8x64xf32>
    %c0_60 = arith.constant 0 : index
    %c0_61 = arith.constant 0 : index
    %c0_62 = arith.constant 0 : index
    %166 = vector.load %arg2[%c0_60, %c0_61, %c0_62] : memref<1x8x8xf32, #tpu.memory_space<vmem>>, vector<1x8x8xf32>
    %167 = vector.shape_cast %166 : vector<1x8x8xf32> to vector<8x8xf32>
    %168 = arith.truncf %167 : vector<8x8xf32> to vector<8x8xbf16>
    %c0_63 = arith.constant 0 : index
    %c0_64 = arith.constant 0 : index
    %169 = vector.load %arg15[%c0_63, %c0_64] : memref<8x64xbf16, #tpu.memory_space<vmem>>, vector<8x64xbf16>
    %cst_65 = arith.constant dense<0.000000e+00> : vector<8x64xf32>
    %170 = tpu.matmul %168, %169, %cst_65 {dimension_numbers = #tpu.dot_dimension_numbers<[1], [0], [0], [1], [0, 0, 1, 1], [], []>} : vector<8x8xbf16>, vector<8x64xbf16>, vector<8x64xf32> -> vector<8x64xf32>
    %c0_66 = arith.constant 0 : index
    %c0_67 = arith.constant 0 : index
    %171 = vector.load %arg16[%c0_66, %c0_67] : memref<1x64xf32, #tpu.memory_space<vmem>>, vector<1x64xf32>
    %172 = vector.broadcast %171 : vector<1x64xf32> to vector<8x64xf32>
    %173 = arith.addf %170, %172 : vector<8x64xf32>
    %cst_68 = arith.constant 0.000000e+00 : f32
    %174 = vector.broadcast %cst_68 : f32 to vector<8x64xf32>
    %175 = arith.maximumf %173, %174 : vector<8x64xf32>
    %176 = arith.truncf %165 : vector<8x64xf32> to vector<8x64xbf16>
    %c0_69 = arith.constant 0 : index
    %c0_70 = arith.constant 0 : index
    %177 = vector.load %arg17[%c0_69, %c0_70] : memref<64x64xbf16, #tpu.memory_space<vmem>>, vector<64x64xbf16>
    %cst_71 = arith.constant dense<0.000000e+00> : vector<8x64xf32>
    %178 = tpu.matmul %176, %177, %cst_71 {dimension_numbers = #tpu.dot_dimension_numbers<[1], [0], [0], [1], [0, 0, 1, 1], [], []>} : vector<8x64xbf16>, vector<64x64xbf16>, vector<8x64xf32> -> vector<8x64xf32>
    %179 = arith.truncf %175 : vector<8x64xf32> to vector<8x64xbf16>
    %c0_72 = arith.constant 0 : index
    %c0_73 = arith.constant 0 : index
    %180 = vector.load %arg18[%c0_72, %c0_73] : memref<64x64xbf16, #tpu.memory_space<vmem>>, vector<64x64xbf16>
    %cst_74 = arith.constant dense<0.000000e+00> : vector<8x64xf32>
    %181 = tpu.matmul %179, %180, %cst_74 {dimension_numbers = #tpu.dot_dimension_numbers<[1], [0], [0], [1], [0, 0, 1, 1], [], []>} : vector<8x64xbf16>, vector<64x64xbf16>, vector<8x64xf32> -> vector<8x64xf32>
    %182 = arith.addf %178, %181 : vector<8x64xf32>
    %c0_75 = arith.constant 0 : index
    %c0_76 = arith.constant 0 : index
    %183 = vector.load %arg19[%c0_75, %c0_76] : memref<1x64xf32, #tpu.memory_space<vmem>>, vector<1x64xf32>
    %184 = vector.broadcast %183 : vector<1x64xf32> to vector<8x64xf32>
    %185 = arith.addf %182, %184 : vector<8x64xf32>
    %cst_77 = arith.constant dense<0xFF800000> : vector<64xf32>
    %186 = vector.multi_reduction <maximumf>, %185, %cst_77 [0] : vector<8x64xf32> to vector<64xf32>
    %187 = vector.shape_cast %186 : vector<64xf32> to vector<1x64xf32>
    %188 = arith.truncf %187 : vector<1x64xf32> to vector<1x64xbf16>
    %c0_78 = arith.constant 0 : index
    %c0_79 = arith.constant 0 : index
    %189 = vector.load %arg20[%c0_78, %c0_79] : memref<64x32xbf16, #tpu.memory_space<vmem>>, vector<64x32xbf16>
    %cst_80 = arith.constant dense<0.000000e+00> : vector<1x32xf32>
    %190 = tpu.matmul %188, %189, %cst_80 {dimension_numbers = #tpu.dot_dimension_numbers<[1], [0], [0], [1], [0, 0, 1, 1], [], []>} : vector<1x64xbf16>, vector<64x32xbf16>, vector<1x32xf32> -> vector<1x32xf32>
    %c0_81 = arith.constant 0 : index
    %c0_82 = arith.constant 0 : index
    %191 = vector.load %arg21[%c0_81, %c0_82] : memref<1x32xf32, #tpu.memory_space<vmem>>, vector<1x32xf32>
    %192 = arith.addf %190, %191 : vector<1x32xf32>
    %cst_83 = arith.constant 0.000000e+00 : f32
    %193 = vector.broadcast %cst_83 : f32 to vector<1x32xf32>
    %194 = arith.maximumf %192, %193 : vector<1x32xf32>
    %195 = arith.truncf %194 : vector<1x32xf32> to vector<1x32xbf16>
    %c0_84 = arith.constant 0 : index
    %c0_85 = arith.constant 0 : index
    %196 = vector.load %arg22[%c0_84, %c0_85] : memref<32x16xbf16, #tpu.memory_space<vmem>>, vector<32x16xbf16>
    %cst_86 = arith.constant dense<0.000000e+00> : vector<1x16xf32>
    %197 = tpu.matmul %195, %196, %cst_86 {dimension_numbers = #tpu.dot_dimension_numbers<[1], [0], [0], [1], [0, 0, 1, 1], [], []>} : vector<1x32xbf16>, vector<32x16xbf16>, vector<1x16xf32> -> vector<1x16xf32>
    %c0_87 = arith.constant 0 : index
    %c0_88 = arith.constant 0 : index
    %198 = vector.load %arg23[%c0_87, %c0_88] : memref<1x16xf32, #tpu.memory_space<vmem>>, vector<1x16xf32>
    %199 = arith.addf %197, %198 : vector<1x16xf32>
    %cst_89 = arith.constant 0.000000e+00 : f32
    %200 = vector.broadcast %cst_89 : f32 to vector<1x16xf32>
    %201 = arith.maximumf %199, %200 : vector<1x16xf32>
    %202 = arith.truncf %201 : vector<1x16xf32> to vector<1x16xbf16>
    %c0_90 = arith.constant 0 : index
    %c0_91 = arith.constant 0 : index
    %203 = vector.load %arg24[%c0_90, %c0_91] : memref<16x128xbf16, #tpu.memory_space<vmem>>, vector<16x128xbf16>
    %cst_92 = arith.constant dense<0.000000e+00> : vector<1x128xf32>
    %204 = tpu.matmul %202, %203, %cst_92 {dimension_numbers = #tpu.dot_dimension_numbers<[1], [0], [0], [1], [0, 0, 1, 1], [], []>} : vector<1x16xbf16>, vector<16x128xbf16>, vector<1x128xf32> -> vector<1x128xf32>
    %c0_93 = arith.constant 0 : index
    %c0_94 = arith.constant 0 : index
    %205 = vector.load %arg25[%c0_93, %c0_94] : memref<1x128xf32, #tpu.memory_space<vmem>>, vector<1x128xf32>
    %206 = arith.addf %204, %205 : vector<1x128xf32>
    %207 = vector.shape_cast %206 : vector<1x128xf32> to vector<1x1x128xf32>
    %c0_95 = arith.constant 0 : index
    %c0_96 = arith.constant 0 : index
    %c0_97 = arith.constant 0 : index
    %208 = vector.load %arg26[%c0_95, %c0_96, %c0_97] : memref<1x1x128xf32, #tpu.memory_space<vmem>>, vector<1x1x128xf32>
    tpu.vector_store %arg26[%c0_95, %c0_96, %c0_97], %207 {strides = array<i32>} : memref<1x1x128xf32, #tpu.memory_space<vmem>>, vector<1x1x128xf32>,
    return
  }
  func.func @transform_0(%arg0: i32) -> (i32, i32, i32) {
    %c0_i32 = arith.constant 0 : i32
    %c0_i32_0 = arith.constant 0 : i32
    %c0_i32_1 = arith.constant 0 : i32
    return %arg0, %c0_i32, %c0_i32_0 : i32, i32, i32
  }
  func.func @transform_1(%arg0: i32) -> (i32, i32, i32) {
    %c0_i32 = arith.constant 0 : i32
    %c0_i32_0 = arith.constant 0 : i32
    %c0_i32_1 = arith.constant 0 : i32
    return %arg0, %c0_i32, %c0_i32_0 : i32, i32, i32
  }
  func.func @transform_2(%arg0: i32) -> (i32, i32) {
    %c0_i32 = arith.constant 0 : i32
    %c0_i32_0 = arith.constant 0 : i32
    %c0_i32_1 = arith.constant 0 : i32
    return %c0_i32, %c0_i32_0 : i32, i32
  }
  func.func @transform_3(%arg0: i32) -> (i32, i32) {
    %c0_i32 = arith.constant 0 : i32
    %c0_i32_0 = arith.constant 0 : i32
    %c0_i32_1 = arith.constant 0 : i32
    return %c0_i32, %c0_i32_0 : i32, i32
  }
  func.func @transform_4(%arg0: i32) -> (i32, i32) {
    %c0_i32 = arith.constant 0 : i32
    %c0_i32_0 = arith.constant 0 : i32
    %c0_i32_1 = arith.constant 0 : i32
    return %c0_i32, %c0_i32_0 : i32, i32
  }
  func.func @transform_5(%arg0: i32) -> (i32, i32) {
    %c0_i32 = arith.constant 0 : i32
    %c0_i32_0 = arith.constant 0 : i32
    %c0_i32_1 = arith.constant 0 : i32
    return %c0_i32, %c0_i32_0 : i32, i32
  }
  func.func @transform_6(%arg0: i32) -> (i32, i32) {
    %c0_i32 = arith.constant 0 : i32
    %c0_i32_0 = arith.constant 0 : i32
    %c0_i32_1 = arith.constant 0 : i32
    return %c0_i32, %c0_i32_0 : i32, i32
  }
  func.func @transform_7(%arg0: i32) -> (i32, i32) {
    %c0_i32 = arith.constant 0 : i32
    %c0_i32_0 = arith.constant 0 : i32
    %c0_i32_1 = arith.constant 0 : i32
    return %c0_i32, %c0_i32_0 : i32, i32
  }
  func.func @transform_8(%arg0: i32) -> (i32, i32) {
    %c0_i32 = arith.constant 0 : i32
    %c0_i32_0 = arith.constant 0 : i32
    %c0_i32_1 = arith.constant 0 : i32
    return %c0_i32, %c0_i32_0 : i32, i32
  }
  func.func @transform_9(%arg0: i32) -> (i32, i32) {
    %c0_i32 = arith.constant 0 : i32
    %c0_i32_0 = arith.constant 0 : i32
    %c0_i32_1 = arith.constant 0 : i32
    return %c0_i32, %c0_i32_0 : i32, i32
  }
  func.func @transform_10(%arg0: i32) -> (i32, i32) {
    %c0_i32 = arith.constant 0 : i32
    %c0_i32_0 = arith.constant 0 : i32
    %c0_i32_1 = arith.constant 0 : i32
    return %c0_i32, %c0_i32_0 : i32, i32
  }
  func.func @transform_11(%arg0: i32) -> (i32, i32) {
    %c0_i32 = arith.constant 0 : i32
    %c0_i32_0 = arith.constant 0 : i32
    %c0_i32_1 = arith.constant 0 : i32
    return %c0_i32, %c0_i32_0 : i32, i32
  }
  func.func @transform_12(%arg0: i32) -> (i32, i32) {
    %c0_i32 = arith.constant 0 : i32
    %c0_i32_0 = arith.constant 0 : i32
    %c0_i32_1 = arith.constant 0 : i32
    return %c0_i32, %c0_i32_0 : i32, i32
  }
  func.func @transform_13(%arg0: i32) -> (i32, i32) {
    %c0_i32 = arith.constant 0 : i32
    %c0_i32_0 = arith.constant 0 : i32
    %c0_i32_1 = arith.constant 0 : i32
    return %c0_i32, %c0_i32_0 : i32, i32
  }
  func.func @transform_14(%arg0: i32) -> (i32, i32) {
    %c0_i32 = arith.constant 0 : i32
    %c0_i32_0 = arith.constant 0 : i32
    %c0_i32_1 = arith.constant 0 : i32
    return %c0_i32, %c0_i32_0 : i32, i32
  }
  func.func @transform_15(%arg0: i32) -> (i32, i32) {
    %c0_i32 = arith.constant 0 : i32
    %c0_i32_0 = arith.constant 0 : i32
    %c0_i32_1 = arith.constant 0 : i32
    return %c0_i32, %c0_i32_0 : i32, i32
  }
  func.func @transform_16(%arg0: i32) -> (i32, i32) {
    %c0_i32 = arith.constant 0 : i32
    %c0_i32_0 = arith.constant 0 : i32
    %c0_i32_1 = arith.constant 0 : i32
    return %c0_i32, %c0_i32_0 : i32, i32
  }
  func.func @transform_17(%arg0: i32) -> (i32, i32) {
    %c0_i32 = arith.constant 0 : i32
    %c0_i32_0 = arith.constant 0 : i32
    %c0_i32_1 = arith.constant 0 : i32
    return %c0_i32, %c0_i32_0 : i32, i32
  }
  func.func @transform_18(%arg0: i32) -> (i32, i32) {
    %c0_i32 = arith.constant 0 : i32
    %c0_i32_0 = arith.constant 0 : i32
    %c0_i32_1 = arith.constant 0 : i32
    return %c0_i32, %c0_i32_0 : i32, i32
  }
  func.func @transform_19(%arg0: i32) -> (i32, i32) {
    %c0_i32 = arith.constant 0 : i32
    %c0_i32_0 = arith.constant 0 : i32
    %c0_i32_1 = arith.constant 0 : i32
    return %c0_i32, %c0_i32_0 : i32, i32
  }
  func.func @transform_20(%arg0: i32) -> (i32, i32) {
    %c0_i32 = arith.constant 0 : i32
    %c0_i32_0 = arith.constant 0 : i32
    %c0_i32_1 = arith.constant 0 : i32
    return %c0_i32, %c0_i32_0 : i32, i32
  }
  func.func @transform_21(%arg0: i32) -> (i32, i32) {
    %c0_i32 = arith.constant 0 : i32
    %c0_i32_0 = arith.constant 0 : i32
    %c0_i32_1 = arith.constant 0 : i32
    return %c0_i32, %c0_i32_0 : i32, i32
  }
  func.func @transform_22(%arg0: i32) -> (i32, i32) {
    %c0_i32 = arith.constant 0 : i32
    %c0_i32_0 = arith.constant 0 : i32
    %c0_i32_1 = arith.constant 0 : i32
    return %c0_i32, %c0_i32_0 : i32, i32
  }
  func.func @transform_23(%arg0: i32) -> (i32, i32) {
    %c0_i32 = arith.constant 0 : i32
    %c0_i32_0 = arith.constant 0 : i32
    %c0_i32_1 = arith.constant 0 : i32
    return %c0_i32, %c0_i32_0 : i32, i32
  }
  func.func @transform_24(%arg0: i32) -> (i32, i32) {
    %c0_i32 = arith.constant 0 : i32
    %c0_i32_0 = arith.constant 0 : i32
    %c0_i32_1 = arith.constant 0 : i32
    return %c0_i32, %c0_i32_0 : i32, i32
  }
  func.func @transform_25(%arg0: i32) -> (i32, i32, i32) {
    %c0_i32 = arith.constant 0 : i32
    %c0_i32_0 = arith.constant 0 : i32
    %c0_i32_1 = arith.constant 0 : i32
    return %arg0, %c0_i32, %c0_i32_0 : i32, i32, i32
  }
}

</mosaic_0001>

<bundles_post_ra>
// kernel: forward.3
= control target key start
LH: loop header
LB: loop body
LE: loop exit
PB: predicated region body
PF: predicated region fallthrough
CT: control target
= control target key end

     0   :  { %s3189_s0 = inlined_call_operand.vmem [shape: f32[2,8,64], index: 0, kind: input, shape index: {}]   ;;  %s3190_s1 = inlined_call_operand.vmem [shape: f32[2,8,8], index: 1, kind: input, shape index: {}]   ;;  %s3191_s2 = inlined_call_operand.vmem [shape: bf16[64,192], index: 2, kind: input, shape index: {}]   ;;  %s3192_s3 = inlined_call_operand.vmem [shape: f32[1,192], index: 3, kind: input, shape index: {}]   ;;  %s3193_s4 = inlined_call_operand.vmem [shape: bf16[64,64], index: 4, kind: input, shape index: {}]   ;;  %s3194_s5 = inlined_call_operand.vmem [shape: f32[1,64], index: 5, kind: input, shape index: {}]   ;;  %s3195_s6 = inlined_call_operand.vmem [shape: f32[1,64], index: 6, kind: input, shape index: {}]   ;;  %s3196_s7 = inlined_call_operand.vmem [shape: f32[1,64], index: 7, kind: input, shape index: {}]   ;;  %s3197_s8 = inlined_call_operand.vmem [shape: bf16[64,128], index: 8, kind: input, shape index: {}]   ;;  %s3198_s9 = inlined_call_operand.vmem [shape: f32[1,128], index: 9, kind: input, shape index: {}]   ;;  %s3199_s10 = inlined_call_operand.vmem [shape: bf16[128,64], index: 10, kind: input, shape index: {}]   ;;  %s3200_s11 = inlined_call_operand.vmem [shape: f32[1,64], index: 11, kind: input, shape index: {}]   ;;  %s3201_s12 = inlined_call_operand.vmem [shape: f32[1,64], index: 12, kind: input, shape index: {}]   ;;  %s3202_s13 = inlined_call_operand.vmem [shape: f32[1,64], index: 13, kind: input, shape index: {}]   ;;  %s3203_s14 = inlined_call_operand.vmem [shape: bf16[8,64], index: 14, kind: input, shape index: {}]   ;;  %s3204_s15 = inlined_call_operand.vmem [shape: f32[1,64], index: 15, kind: input, shape index: {}]   ;;  %s3205_s16 = inlined_call_operand.vmem [shape: bf16[64,64], index: 16, kind: input, shape index: {}]   ;;  %s3206_s17 = inlined_call_operand.vmem [shape: bf16[64,64], index: 17, kind: input, shape index: {}]   ;;  %s3207_s18 = inlined_call_operand.vmem [shape: f32[1,64], index: 18, kind: input, shape index: {}]   ;;  %s3208_s19 = inlined_call_operand.vmem [shape: bf16[64,32], index: 19, kind: input, shape index: {}]   ;;  %s3209_s20 = inlined_call_operand.vmem [shape: f32[1,32], index: 20, kind: input, shape index: {}]   ;;  %s3210_s21 = inlined_call_operand.vmem [shape: bf16[32,16], index: 21, kind: input, shape index: {}]   ;;  %s3211_s22 = inlined_call_operand.vmem [shape: f32[1,16], index: 22, kind: input, shape index: {}]   ;;  %s3212_s23 = inlined_call_operand.vmem [shape: bf16[16,128], index: 23, kind: input, shape index: {}]   ;;  %s3213_s24 = inlined_call_operand.vmem [shape: f32[1,128], index: 24, kind: input, shape index: {}]   ;;  %s3214_s25 = inlined_call_operand.hbm [shape: f32[2,1,128], index: 25, kind: output, shape index: {}]  }
   0x1   :  { %3229 = sst [smem:[#allocation12_spill]] %s3189_s0 }
   0x2   :  { %3230 = sst [smem:[#allocation13_spill]] %s3190_s1 }
   0x3   :  { %3231 = sst [smem:[#allocation14_spill]] %s3191_s2 }
   0x4   :  { %3232 = sst [smem:[#allocation15_spill]] %s3192_s3 }
   0x5   :  { %3233 = sst [smem:[#allocation16_spill]] %s3193_s4 }
   0x6   :  { %3234 = sst [smem:[#allocation17_spill]] %s3194_s5 }
   0x7   :  { %3235 = sst [smem:[#allocation18_spill]] %s3195_s6 }
   0x8   :  { %3236 = sst [smem:[#allocation19_spill]] %s3196_s7 }
   0x9   :  { %3237 = sst [smem:[#allocation20_spill]] %s3197_s8 }
   0xa   :  { %3238 = sst [smem:[#allocation21_spill]] %s3198_s9 }
   0xb   :  { %3239 = sst [smem:[#allocation22_spill]] %s3214_s25 }
   0xc   :  { %30 = vsyncpa [#allocation3], 0 }
   0xd   :  { %32 = vsyncpa [#allocation3 + $0x1], 0  ;;  %s2782_s29 = smov 0   ;;  %s2784_s2 = smov 0  }
   0xe   :  { %s2786_s6 = smov 0   ;;  %s2788_s30 = smov 0  }
   0xf LB: > { %3240 = sst [smem:[#allocation5_spill]] %s2627_s29  ;;  %s2803_s7 = sadd.s32 4294967295, %s2639_s30   ;;  %s2639_s30 = sphi %s2788_s30, %s3266_s30   ;;  %s2635_s6 = sphi %s2786_s6, %s3271_s6   ;;  %s2631_s2 = sphi %s2784_s2, %s3270_s2   ;;  %s2627_s29 = sphi %s2782_s29, %s3269_s29  }
  0x10   : > { %3241 = sst [smem:[#allocation6_spill]] %s2635_s6  ;;  %s2186_s3 = sadd.s32 4294967294, %s2639_s30  }
  0x11   : > { %3242 = sst [smem:[#allocation7_spill]] %s2639_s30  ;;  %s2807_s26 = sadd.s32 1, %s2639_s30  }
  0x12   : > { %3243 = sst [smem:[#allocation8_spill]] %s2807_s26  ;;  %s580_s1 = sadd.s32 1, %s2635_s6 }
  0x13   : > { %s577_s8 = ssub.s32 %s2639_s30, %s2807_s26  ;;  %p590_p0 = scmp.ne.s32.totalorder %s2635_s6, %s2631_s2 }
  0x14   : > { %p578_p1 = scmp.eq.s32.totalorder %s577_s8, 0  ;;  %p591_p2 = scmp.eq.s32.totalorder %s2803_s7, 1 }
  0x15   : > { %p596_p3 = scmp.ne.s32.totalorder %s2631_s2, %s2627_s29  ;;  %p597_p4 = scmp.eq.s32.totalorder %s2186_s3, 1 }
  0x16   : > { %s2818_s27 = scalar_select %p578_p1, %s2635_s6, %s580_s1  }
  0x17   : > { %p2820_p5 = por %p591_p2, %p590_p0  ;;  %p2824_p6 = por %p597_p4, %p596_p3 }
  0x18   : > { %3244 = sst [smem:[#allocation9_spill]] %s2818_s27  ;;  %p2189_p7 = scmp.ge.s32.totalorder %s2639_s30, 1 }
  0x19   : > { %s3245_s4 = scalar_select %p2820_p5, 1, 0 }
  0x1a   : > { %s3247_s28 = scalar_select %p2824_p6, 1, 0 }
  0x1b   : > { %3246 = sst [smem:[#allocation10_spill]] %s3245_s4  ;;  %p698_p8 = scmp.lt.s32.totalorder %s2639_s30, 3 }
  0x1c   : > { %3248 = sst [smem:[#allocation11_spill]] %s3247_s28 }
  0x1d   : > { %p699_p9 = pnand %p2189_p7, %p698_p8 }
  0x1e   : > { %s3249_s0 = sld [smem:[#allocation14_spill]] (!%p699_p9)  ;;  %p768_p10 = scmp.lt.s32.totalorder (!%p699_p9), %s2803_s7, 1  ;;  %v2641_v2 = vmov (!%p699_p9), 0   ;;  %vm839_vm0 = vcmask (!%p699_p9), 523264   ;;  %v789_v11 = vlaneseq (!%p699_p9)  ;;  %v2642_v13 = vmov (!%p699_p9), 0.0  }
  0x1f   : > { %702 = sbr.rel (%p699_p9) target bundleno = 3484 (0xd9c), region = 120  ;;  %875 = vmatprep.mubr.bf16.mxu0 (!%p699_p9), %v2641_v2  ;;  %s3250_s4 = sld [smem:[#allocation12_spill]] (!%p699_p9)  ;;  %2317 = vmatprep.subr.bf16.mxu1 (!%p699_p9), %v2642_v13  ;;  %vm2643_vm1 = vmmov (!%p699_p9), 0   ;;  %vm889_vm2 = vcmask (!%p699_p9), 130048   ;;  %vm953_vm3 = vcmask (!%p699_p9), 1043456   ;;  %vm937_vm4 = vcmask (!%p699_p9), 64512  }
  0x20   : > { %v790_v12 = vshrl.u32 (!%p699_p9), %v789_v11, 7  ;;  %s3251_s30 = sld [smem:[#allocation15_spill]] (!%p699_p9)  ;;  %2319 = vmatprep.mubr.msk.bf16.mxu1 (!%p699_p9), %vm2643_vm1, %v2642_v13  ;;  %s2645_s28 = smov (!%p699_p9), 64   ;;  %vm1344_vm5 = vcmask (!%p699_p9), 261120   ;;  %vm1346_vm6 = vcmask (!%p699_p9), 392192  }
  0x21   : > { %s2646_s3 = smov (!%p699_p9), 32   ;;  %s2647_s27 = smov (!%p699_p9), 48  }
  0x22   : > { %v791_v14 = vsub.s32 (!%p699_p9), 0, %v790_v12  ;;  %s2648_s8 = smov (!%p699_p9), 16   ;;  %s2650_s5 = smov (!%p699_p9), 80   ;;  %v795_v23 = vsub.s32 (!%p699_p9), 1, %v790_v12 }
  0x23   : > { %s3252_s29 = sld [smem:[#allocation16_spill]] (!%p699_p9)  ;;  %s3254_s25 = sld [smem:[#allocation17_spill]] (!%p699_p9) }
  0x24   : > { %v2514_v0 = vld [vmem:[%s3249_s0 + $0x4] ss:$8 sps:$4 sm:$0xff] (!%p699_p9)   ;;  %v2516_v1 = vld [vmem:[%s3249_s0] ss:$8 sps:$4 sm:$0xff] (!%p699_p9)   ;;  %v2517_v3 = vld [vmem:[%s3249_s0 + $0x14] ss:$8 sps:$4 sm:$0xff] (!%p699_p9)  }
  0x25   : > { %843 = vmatprep.subr.bf16.mxu0 (!%p699_p9), %v2514_v0  ;;  %v2519_v4 = vld [vmem:[%s3249_s0 + $0x10] ss:$8 sps:$4 sm:$0xff] (!%p699_p9)   ;;  %v2520_v5 = vld [vmem:[%s3249_s0 + $0x24] ss:$8 sps:$4 sm:$0xff] (!%p699_p9)   ;;  %v2522_v6 = vld [vmem:[%s3249_s0 + $0x20] ss:$8 sps:$4 sm:$0xff] (!%p699_p9)  }
  0x26   : > { %s2841_s6 = scalar_select %p768_p10, %s2803_s7, 1  ;;  %844 = vmatpush1.bf16.msra.mxu0 %v2516_v1  ;;  %v2523_v7 = vld [vmem:[%s3249_s0 + $0x34] ss:$8 sps:$4 sm:$0xff]   ;;  %v2525_v8 = vld [vmem:[%s3249_s0 + $0x30] ss:$8 sps:$4 sm:$0xff]  }
  0x27   : > { %845 = vmatprep.subr.bf16.mxu0 %v2517_v3  ;;  %v787_v15 = vld [vmem:[%s3251_s30] sm:$0x3]  ;;  %s3258_s26 = sld [smem:[#allocation21_spill]]  ;;  %s3261_s30 = sld [smem:[#allocation22_spill]] }
  0x28   : > { %s2190_s1 = sshll.u32 %s2841_s6, 3  ;;  %v792_v16 = vrot.slane %v787_v15, %v791_v14  ;;  %v796_v24 = vrot.slane %v787_v15, %v795_v23  ;;  %s766_s6 = sand.u32 1, %s2631_s2  }
  0x29   : > { %s771_s9 = scalar_lea.vmem %s3250_s4, %s2190_s1  ;;  %s2644_s4 = smov 112  }
  0x2a   : > { %846 = vmatpush1.bf16.msra.mxu0 %v2519_v4  ;;  %v2864_v9 = vld [vmem:[%s771_s9] sm:$0xff]  ;;  %s2649_s9 = smov 96  }
  0x2b   : > { %847 = vmatprep.subr.bf16.mxu0 %v2520_v5  ;;  %v778_v10 = vpack.c.bf16 %v2864_v9, %v2864_v9 }
  0x2e   : > { %848 = vmatpush1.bf16.msra.mxu0 %v2522_v6 }
  0x2f   : > { %849 = vmatprep.subr.bf16.mxu0 %v2523_v7 }
  0x32   : > { %850 = vmatpush1.bf16.msra.mxu0 %v2525_v8 }
  0x33   : > { %2329 = vmatprep.subr.bf16.mxu0 %v2642_v13 }
  0x35   : > { %2200 = vmatmul.mubr.msk.bf16.vlgmr.msra.gmra.mrb[0].mxu0 %vm839_vm0, %v778_v10 }
  0x36   : > { %2331 = vmatprep.mubr.msk.bf16.mxu0 %vm2643_vm1, %v2642_v13 }
 0x108   : > { %v877_v17 = vpop.f32.mrb[0].mxu0 }
 0x109   : > { %v878_v18 = vadd.f32 %v877_v17, %v792_v16  ;;  %v879_v19 = vpop.f32.mrb[1].mxu0 }
 0x10a   : > { %v881_v20 = vpop.f32.mrb[2].mxu0  ;;  %v880_v26 = vadd.f32 %v879_v19, %v796_v24 }
 0x10b   : > { %v884_v21 = vpack.c.bf16 %v878_v18, %v878_v18  ;;  %v882_v22 = vpop.f32.mrb[3].mxu0 }
 0x10c   : > { %v2886_v30 = vpack.c.bf16 %v880_v26, %v880_v26 }
 0x10d   : > { %997 = vrot.lane.b32.xlu1 %v884_v21, %s2644_s4  ;;  %887 = vrot.lane.b32.xlu0 %v884_v21, %s2645_s28  ;;  %s3255_s28 = sld [smem:[#allocation20_spill]] }
 0x10e   : > { %v955_v32 = vsel %vm953_vm3, %v2886_v30, 0 }
 0x111   : > { %1111 = vrot.lane.b32.xlu1 %v884_v21, %s2646_s3  ;;  %999 = vrot.lane.b32.xlu0 %v884_v21, %s2647_s27 }
 0x115   : > { %1222 = vrot.lane.b32.xlu1 %v884_v21, %s2648_s8  ;;  %1109 = vrot.lane.b32.xlu0 %v884_v21, %s2649_s9 }
 0x119   : > { %1220 = vrot.lane.b32.xlu0 %v884_v21, %s2650_s5 }
 0x17f   : > { %v888_v25 = vpop.permute.xlu0 %887  ;;  %v998_v28 = vpop.permute.xlu1 %997 }
 0x180   : > { %v894_v27 = vsel %vm889_vm2, %v888_v25, 0 }
 0x181   : > { %2318 = vmatpush3.bf16.xpose.msra.mxu1 %v894_v27 }
 0x182   : > { %2323 = vmatprep.subr.bf16.mxu1 %v2642_v13 }
 0x183   : > { %v1000_v29 = vpop.permute.xlu0 %999  ;;  %v1112_v33 = vpop.permute.xlu1 %1111 }
 0x184   : > { %v1005_v31 = vsel %vm889_vm2, %v1000_v29, 0  ;;  %v1117_v34 = vsel %vm889_vm2, %v1112_v33, 0 }
 0x185   : > { %2330 = vmatpush3.bf16.xpose.msra.mxu0 %v1005_v31 }
 0x186   : > { %2341 = vmatprep.subr.bf16.mxu0 %v2642_v13 }
 0x187   : > { %v1223_v35 = vpop.permute.xlu1 %1222  ;;  %v1110_v36 = vpop.permute.xlu0 %1109 }
 0x188   : > { %2320 = vmatmul.mubr.msk.bf16.vlgmr.msra.gmra.mrb[0].mxu1 %vm889_vm2, %v884_v21  ;;  %v1228_v37 = vsel %vm889_vm2, %v1223_v35, 0 }
 0x189   : > { %2324 = vmatpush3.bf16.msra.mxu1 %v955_v32  ;;  %2325 = vmatprep.mubr.msk.bf16.mxu1 %vm2643_vm1, %v2642_v13 }
 0x18a   : > { %2335 = vmatprep.subr.bf16.mxu1 %v2642_v13 }
 0x18b   : > { %v1221_v38 = vpop.permute.xlu0 %1220 }
 0x18c   : > { %2332 = vmatmul.mubr.msk.bf16.vlgmr.msra.gmra.mrb[4].mxu0 %vm889_vm2, %v998_v28 }
 0x18d   : > { %2342 = vmatpush3.bf16.xpose.msra.mxu0 %v1117_v34  ;;  %2343 = vmatprep.mubr.msk.bf16.mxu0 %vm2643_vm1, %v2642_v13 }
 0x18e   : > { %2353 = vmatprep.subr.bf16.mxu0 %v2642_v13 }
 0x194   : > { %2344 = vmatmul.mubr.msk.bf16.vlgmr.msra.gmra.mrb[8].mxu0 %vm889_vm2, %v1110_v36 }
 0x195   : > { %2354 = vmatpush3.bf16.xpose.msra.mxu0 %v1228_v37  ;;  %2355 = vmatprep.mubr.msk.bf16.mxu0 %vm2643_vm1, %v2642_v13 }
 0x196   : > { %2365 = vmatprep.subr.bf16.mxu0 %v2642_v13 }
 0x19c   : > { %2356 = vmatmul.mubr.msk.bf16.vlgmr.msra.gmra.mrb[12].mxu0 %vm889_vm2, %v1221_v38 }
 0x19d   : > { %2373 = vmatprep.mubr.msk.bf16.mxu0 %vm2643_vm1, %v2642_v13 }
 0x25b   : > { %v930_v39 = vpop.f32.mrb[0].mxu1 }
 0x25c   : > { %v936_v40 = vmul.f32 0.25, %v930_v39  ;;  %v2321_v41 = vpop.f32.mrb[1].mxu1 }
 0x25d   : > { %v933_v42 = vpop.f32.mrb[2].mxu1 }
 0x25e   : > { %v2322_v43 = vpop.f32.mrb[3].mxu1  ;;  %v938_v44 = vsel %vm937_vm4, %v936_v40, -inf }
 0x25f   : > { %939 = vmax.xlane.f32.xlu1 %v938_v44  ;;  %v1041_v45 = vpop.f32.mrb[4].mxu0 }
 0x260   : > { %v1047_v46 = vmul.f32 0.25, %v1041_v45  ;;  %v2333_v47 = vpop.f32.mrb[5].mxu0 }
 0x261   : > { %v1044_v48 = vpop.f32.mrb[6].mxu0  ;;  %v2526_v47 = vld [vmem:[%s3252_s29] sm:$0xff]  }
 0x262   : > { %v2334_v49 = vpop.f32.mrb[7].mxu0  ;;  %v1048_v50 = vsel %vm937_vm4, %v1047_v46, -inf  ;;  %2366 = vmatpush3.bf16.msra.mxu0 %v2526_v47 }
 0x263   : > { %1049 = vmax.xlane.f32.xlu0 %v1048_v50  ;;  %2367 = vmatprep.subr.bf16.mxu0 %v2642_v13 }
 0x267   : > { %v1153_v51 = vpop.f32.mrb[8].mxu0 }
 0x268   : > { %v1159_v52 = vmul.f32 0.25, %v1153_v51  ;;  %v2345_v53 = vpop.f32.mrb[9].mxu0 }
 0x269   : > { %v1156_v54 = vpop.f32.mrb[10].mxu0 }
 0x26a   : > { %v2346_v55 = vpop.f32.mrb[11].mxu0  ;;  %v1160_v56 = vsel %vm937_vm4, %v1159_v52, -inf }
 0x26b   : > { %1161 = vmax.xlane.f32.xlu0 %v1160_v56 }
 0x26f   : > { %v1264_v57 = vpop.f32.mrb[12].mxu0 }
 0x270   : > { %v1270_v58 = vmul.f32 0.25, %v1264_v57  ;;  %v2357_v59 = vpop.f32.mrb[13].mxu0 }
 0x271   : > { %v1267_v60 = vpop.f32.mrb[14].mxu0 }
 0x272   : > { %v2358_v61 = vpop.f32.mrb[15].mxu0  ;;  %v1271_v62 = vsel %vm937_vm4, %v1270_v58, -inf }
 0x273   : > { %1272 = vmax.xlane.f32.xlu1 %v1271_v62 }
 0x2ec   : > { %v940_v63 = vpop.xlane.xlu1 %939 }
 0x2ed   : > { %v941_v0 = vsub.f32 %v936_v40, %v940_v63 }
 0x2ef   : > { %v942_v1 = vmul.f32 1.442695, %v941_v0 }
 0x2f0   : > { %v1050_v2 = vpop.xlane.xlu0 %1049 }
 0x2f1   : > { %2557 = vpow2.f32 %v942_v1  ;;  %v1051_v3 = vsub.f32 %v1047_v46, %v1050_v2 }
 0x2f3   : > { %v1052_v4 = vmul.f32 1.442695, %v1051_v3 }
 0x2f5   : > { %2559 = vpow2.f32 %v1052_v4 }
 0x2f8   : > { %v1162_v5 = vpop.xlane.xlu0 %1161 }
 0x2f9   : > { %v1163_v6 = vsub.f32 %v1159_v52, %v1162_v5 }
 0x2fb   : > { %v2558_v7 = vpop.eup %2557  ;;  %v1164_v8 = vmul.f32 1.442695, %v1163_v6  ;;  %v2209_v6 = vld [vmem:[%s3254_s25] ss:$0 sm:$0xff]  ;;  %s3259_s25 = sld [smem:[#allocation13_spill]] }
 0x2fc   : > { %v944_v10 = vsel %vm937_vm4, %v2558_v7, 0.0 }
 0x2fd   : > { %2561 = vpow2.f32 %v1164_v8  ;;  %945 = vadd.xlane.f32.xlu0 %v944_v10 }
 0x2ff   : > { %v2560_v11 = vpop.eup %2559 }
 0x300   : > { %v1054_v12 = vsel %vm937_vm4, %v2560_v11, 0.0  ;;  %v1273_v16 = vpop.xlane.xlu1 %1272 }
 0x301   : > { %1055 = vadd.xlane.f32.xlu1 %v1054_v12  ;;  %v1274_v17 = vsub.f32 %v1270_v58, %v1273_v16 }
 0x303   : > { %v1275_v18 = vmul.f32 1.442695, %v1274_v17 }
 0x305   : > { %2563 = vpow2.f32 %v1275_v18 }
 0x307   : > { %v2562_v14 = vpop.eup %2561 }
 0x308   : > { %v1166_v15 = vsel %vm937_vm4, %v2562_v14, 0.0 }
 0x309   : > { %1167 = vadd.xlane.f32.xlu0 %v1166_v15 }
 0x30f   : > { %v2564_v19 = vpop.eup %2563 }
 0x310   : > { %v1277_v20 = vsel %vm937_vm4, %v2564_v19, 0.0 }
 0x312   : > { %1172 = vrot.lane.b32.xlu1 %v2886_v30, %s2649_s9  ;;  %s3262_s9 = smov %s3261_s30 }
 0x31f   : > { %1061 = vrot.lane.b32.xlu0 %v2886_v30, %s2644_s4  ;;  %s3253_s4 = smov %s3252_s29  ;;  %s775_s29 = scalar_lea.vmem %s3259_s25, %s2190_s1 }
 0x320   : > { %v2527_v48 = vld [vmem:[%s3253_s4 + $0x8] sm:$0xff]   ;;  %v2528_v52 = vld [vmem:[%s3253_s4 + $0x10] sm:$0xff]   ;;  %v2529_v58 = vld [vmem:[%s3253_s4 + $0x18] sm:$0xff]   ;;  %s2651_s1 = smov [#allocation2]  }
 0x321   : > { %2368 = vmatpush3.bf16.msra.mxu0 %v2527_v48  ;;  %s2581_s4 = sshll.u32 %s2651_s1, 4  ;;  %s2582_s4 = int_to_ptr.vmem [resolvable:$false] %s2581_s4 }
 0x322   : > { %2369 = vmatprep.subr.bf16.mxu0 %v2642_v13  ;;  %s2583_s25 = scalar_lea.vmem %s2582_s4, 32 }
 0x325   : > { %2370 = vmatpush3.bf16.msra.mxu0 %v2528_v52 }
 0x326   : > { %2371 = vmatprep.subr.bf16.mxu0 %v2642_v13 }
 0x329   : > { %2372 = vmatpush3.bf16.msra.mxu0 %v2529_v58 }
 0x32a   : > { %2389 = vmatprep.subr.bf16.mxu0 %v2642_v13 }
 0x336   : > { %1278 = vadd.xlane.f32.xlu1 %v1277_v20 }
 0x347   : > { %1283 = vrot.lane.b32.xlu1 %v2886_v30, %s2650_s5  ;;  %s2107_s5 = scalar_lea.sflag [#allocation3], %s766_s6 }
 0x38a   : > { %v946_v21 = vpop.xlane.xlu0 %945 }
 0x38b   : > { %2565 = vrcp.f32 %v946_v21  ;;  %v2530_v21 = vld [vmem:[%s3255_s28] sm:$0xff]  }
 0x38e   : > { %v1056_v22 = vpop.xlane.xlu1 %1055 }
 0x38f   : > { %2567 = vrcp.f32 %v1056_v22  ;;  %v2532_v22 = vld [vmem:[%s3255_s28 + $0x10] sm:$0xff]  }
 0x392   : > { %v1173_v30 = vpop.permute.xlu1 %1172 }
 0x393   : > { %v1178_v34 = vsel %vm953_vm3, %v1173_v30, 0 }
 0x395   : > { %v2566_v23 = vpop.eup %2565 }
 0x396   : > { %v948_v24 = vmul.f32 %v2566_v23, %v2558_v7  ;;  %v1168_v25 = vpop.xlane.xlu0 %1167  ;;  %v2533_v23 = vld [vmem:[%s3255_s28 + $0x18] sm:$0xff]  }
 0x397   : > { %2569 = vrcp.f32 %v1168_v25  ;;  %v2535_v25 = vld [vmem:[%s3199_s10 + $0x8] sm:$0xff]  }
 0x398   : > { %v949_v26 = vpack.c.bf16 %v948_v24, %v948_v24  ;;  %v2534_v24 = vld [vmem:[%s3199_s10] sm:$0xff]  }
 0x399   : > { %v2568_v27 = vpop.eup %2567 }
 0x39a   : > { %2326 = vmatmul.mubr.msk.bf16.vlgmr.msra.gmra.mrb[4].mxu1 %vm937_vm4, %v949_v26  ;;  %v1062_v28 = vpop.permute.xlu0 %1061  ;;  %v1058_v31 = vmul.f32 %v2568_v27, %v2560_v11  ;;  %v2536_v26 = vld [vmem:[%s3199_s10 + $0x10] sm:$0xff]   ;;  %v2537_v27 = vld [vmem:[%s3199_s10 + $0x18] sm:$0xff]  }
 0x39b   : > { %v1067_v29 = vsel %vm953_vm3, %v1062_v28, 0  ;;  %2337 = vmatprep.mubr.msk.bf16.mxu1 %vm2643_vm1, %v2642_v13  ;;  %v2538_v28 = vld [vmem:[%s3199_s10 + $0x20] sm:$0xff]  }
 0x39c   : > { %2336 = vmatpush3.bf16.msra.mxu1 %v1067_v29  ;;  %v1059_v32 = vpack.c.bf16 %v1058_v31, %v1058_v31  ;;  %v2539_v29 = vld [vmem:[%s3199_s10 + $0x28] sm:$0xff]  }
 0x39d   : > { %2347 = vmatprep.subr.bf16.mxu1 %v2642_v13 }
 0x3a1   : > { %v2570_v33 = vpop.eup %2569 }
 0x3a2   : > { %2338 = vmatmul.mubr.msk.bf16.vlgmr.msra.gmra.mrb[8].mxu1 %vm937_vm4, %v1059_v32  ;;  %v1170_v35 = vmul.f32 %v2570_v33, %v2562_v14 }
 0x3a3   : > { %2348 = vmatpush3.bf16.msra.mxu1 %v1178_v34  ;;  %2349 = vmatprep.mubr.msk.bf16.mxu1 %vm2643_vm1, %v2642_v13 }
 0x3a4   : > { %2359 = vmatprep.subr.bf16.mxu1 %v2642_v13  ;;  %v1171_v36 = vpack.c.bf16 %v1170_v35, %v1170_v35 }
 0x3aa   : > { %2350 = vmatmul.mubr.msk.bf16.vlgmr.msra.gmra.mrb[12].mxu1 %vm937_vm4, %v1171_v36 }
 0x3ab   : > { %2361 = vmatprep.mubr.msk.bf16.mxu1 %vm2643_vm1, %v2642_v13 }
 0x3c3   : > { %v1279_v37 = vpop.xlane.xlu1 %1278 }
 0x3c4   : > { %2571 = vrcp.f32 %v1279_v37 }
 0x3c7   : > { %v1284_v38 = vpop.permute.xlu1 %1283 }
 0x3c8   : > { %v1289_v39 = vsel %vm953_vm3, %v1284_v38, 0 }
 0x3c9   : > { %2360 = vmatpush3.bf16.msra.mxu1 %v1289_v39 }
 0x3ca   : > { %2377 = vmatprep.subr.bf16.mxu1 %v2642_v13 }
 0x3ce   : > { %v2572_v40 = vpop.eup %2571 }
 0x3cf   : > { %v1281_v41 = vmul.f32 %v2572_v40, %v2564_v19  ;;  %v2540_v40 = vld [vmem:[%s3199_s10 + $0x30] sm:$0xff]  }
 0x3d1   : > { %v1282_v42 = vpack.c.bf16 %v1281_v41, %v1281_v41  ;;  %v2541_v41 = vld [vmem:[%s3199_s10 + $0x38] sm:$0xff]  }
 0x3d3   : > { %2362 = vmatmul.mubr.msk.bf16.vlgmr.msra.gmra.mrb[16].mxu1 %vm937_vm4, %v1282_v42  ;;  %v2217_v42 = vld [vmem:[%s3258_s26] ss:$0 sm:$0xff]  ;;  %s2257_s26 = sshll.u32 %s2803_s7, 4 }
 0x3d4   : > { %2385 = vmatprep.mubr.msk.bf16.mxu1 %vm2643_vm1, %v2642_v13  ;;  %2378 = vmatpush3.bf16.msra.mxu1 %v2530_v21  ;;  %s3147_s0 = scalar_lea.hbm %s3261_s30, %s2257_s26 }
 0x3d5   : > { %2379 = vmatprep.subr.bf16.mxu1 %v2642_v13 }
 0x46d   : > { %v991_v43 = vpop.f32.mrb[4].mxu1 }
 0x46e   : > { %v2327_v44 = vpop.f32.mrb[5].mxu1 }
 0x46f   : > { %v994_v45 = vpop.f32.mrb[6].mxu1 }
 0x470   : > { %v2328_v46 = vpop.f32.mrb[7].mxu1 }
 0x475   : > { %v1103_v49 = vpop.f32.mrb[8].mxu1 }
 0x476   : > { %1332 = vrot.lane.b32.xlu0 %v1103_v49, %s2648_s8  ;;  %v2339_v50 = vpop.f32.mrb[9].mxu1  ;;  %s3256_s8 = sld [smem:[#allocation18_spill]] }
 0x477   : > { %v1106_v51 = vpop.f32.mrb[10].mxu1  ;;  %v1688_v50 = vld [vmem:[%s775_s29] sm:$0xff] }
 0x478   : > { %v2340_v53 = vpop.f32.mrb[11].mxu1  ;;  %v1690_v51 = vld [vmem:[%s3203_s14] sm:$0xf]  ;;  %v1689_v52 = vpack.c.bf16 %v1688_v50, %v1688_v50 }
 0x479   : > { %v1702_v53 = vsel %vm953_vm3, %v1690_v51, 0 }
 0x47c   : > { %v2215_v34 = vld [vmem:[%s3256_s8] ss:$0 sm:$0xff] }
 0x47d   : > { %v1214_v54 = vpop.f32.mrb[12].mxu1 }
 0x47e   : > { %1336 = vrot.lane.b32.xlu1 %v1214_v54, %s2646_s3  ;;  %v2351_v55 = vpop.f32.mrb[13].mxu1  ;;  %v2223_v54 = vld [vmem:[%s3200_s11] ss:$0 sm:$0xff]  ;;  %s767_s3 = scalar_lea.vmem [#allocation2], %s766_s6 }
 0x47f   : > { %v1217_v56 = vpop.f32.mrb[14].mxu1 }
 0x480   : > { %v2352_v57 = vpop.f32.mrb[15].mxu1 }
 0x4a6   : > { %v1325_v59 = vpop.f32.mrb[16].mxu1 }
 0x4a7   : > { %1340 = vrot.lane.b32.xlu0 %v1325_v59, %s2647_s27  ;;  %v2363_v60 = vpop.f32.mrb[17].mxu1  ;;  %s3257_s27 = sld [smem:[#allocation19_spill]] }
 0x4a8   : > { %v1328_v61 = vpop.f32.mrb[18].mxu1 }
 0x4a9   : > { %v2364_v62 = vpop.f32.mrb[19].mxu1 }
 0x4aa   : > { %v2542_v62 = vld [vmem:[%s3206_s17] sm:$0xff]  }
 0x4ad   : > { %v2216_v36 = vld [vmem:[%s3257_s27] ss:$0 sm:$0xff]  ;;  %s2119_s27 = sshll.u32 %s767_s3, 4  ;;  %s3149_s27 = int_to_ptr.vmem [resolvable:$true] %s2119_s27 }
 0x4ae   : > { %s2577_s7 = scalar_lea.vmem %s3149_s27, 16  ;;  %p2584_p0 = scmp.lt.s32.totalorder %s3149_s27, %s2582_s4 }
 0x4af   : > { %p2578_p11 = scmp.ne.s32.totalorder %s3149_s27, %s2577_s7  ;;  %p2585_p1 = scmp.lt.s32.totalorder %s2583_s25, %s2577_s7 }
 0x4b1   : > { %p2579_p12 = pnand %p2578_p11, %p2820_p5  ;;  %p2586_p2 = por %p2585_p1, %p2584_p0 }
 0x4b3   : > { %p2580_p13 = pneg %p2579_p12 }
 0x4b5   : > { %p2587_p3 = pnand %p2586_p2, %p2580_p13 }
 0x4e8   : > { %v1333_v63 = vpop.permute.xlu0 %1332 }
 0x4e9   : > { %v1343_v1 = vsel %vm889_vm2, %v991_v43, %v1333_v63  ;;  %v2543_v63 = vld [vmem:[%s3206_s17 + $0x8] sm:$0xff]  }
 0x4f0   : > { %v1337_v0 = vpop.permute.xlu1 %1336 }
 0x4f1   : > { %v1345_v2 = vsel %vm1344_vm5, %v1343_v1, %v1337_v0  ;;  %v2544_v0 = vld [vmem:[%s3206_s17 + $0x10] sm:$0xff]  }
 0x519   : > { %v1341_v3 = vpop.permute.xlu0 %1340 }
 0x51a   : > { %v1347_v4 = vsel %vm1346_vm6, %v1345_v2, %v1341_v3 }
 0x51b   : > { %v1348_v5 = vpack.c.bf16 %v1347_v4, %v1347_v4 }
 0x51d   : > { %2374 = vmatmul.mubr.msk.bf16.vlgmr.msra.gmra.mrb[16].mxu0 %vm839_vm0, %v1348_v5 }
 0x51e   : > { %2405 = vmatprep.mubr.msk.bf16.mxu0 %vm2643_vm1, %v2642_v13  ;;  %2390 = vmatpush3.bf16.msra.mxu0 %v2534_v24  ;;  %v2232_v24 = vld [vmem:[%s3201_s12] ss:$0 sm:$0xff] }
 0x51f   : > { %2391 = vmatprep.subr.bf16.mxu0 %v2642_v13 }
 0x522   : > { %2392 = vmatpush3.bf16.msra.mxu0 %v2535_v25 }
 0x523   : > { %2393 = vmatprep.subr.bf16.mxu0 %v2642_v13 }
 0x526   : > { %2394 = vmatpush3.bf16.msra.mxu0 %v2536_v26  ;;  %v2233_v26 = vld [vmem:[%s3202_s13] ss:$0 sm:$0xff] }
 0x527   : > { %2395 = vmatprep.subr.bf16.mxu0 %v2642_v13 }
 0x52a   : > { %2396 = vmatpush3.bf16.msra.mxu0 %v2537_v27 }
 0x52b   : > { %2397 = vmatprep.subr.bf16.mxu0 %v2642_v13 }
 0x52e   : > { %2398 = vmatpush3.bf16.msra.mxu0 %v2538_v28 }
 0x52f   : > { %2399 = vmatprep.subr.bf16.mxu0 %v2642_v13 }
 0x532   : > { %2400 = vmatpush3.bf16.msra.mxu0 %v2539_v29 }
 0x533   : > { %2401 = vmatprep.subr.bf16.mxu0 %v2642_v13 }
 0x536   : > { %2402 = vmatpush3.bf16.msra.mxu0 %v2540_v40 }
 0x537   : > { %2403 = vmatprep.subr.bf16.mxu0 %v2642_v13 }
 0x53a   : > { %2404 = vmatpush3.bf16.msra.mxu0 %v2541_v41 }
 0x53b   : > { %2439 = vmatprep.subr.bf16.mxu0 %v2642_v13 }
 0x5f0   : > { %v1425_v7 = vpop.f32.mrb[16].mxu0 }
 0x5f1   : > { %v1426_v8 = vadd.f32 %v2209_v6, %v1425_v7  ;;  %v2375_v10 = vpop.f32.mrb[17].mxu0  ;;  %v2234_v6 = vld [vmem:[%s3204_s15] ss:$0 sm:$0xff] }
 0x5f2   : > { %v1428_v11 = vpop.f32.mrb[18].mxu0 }
 0x5f3   : > { %v2376_v12 = vpop.f32.mrb[19].mxu0  ;;  %v1431_v14 = vadd.f32 %v1426_v8, %v2864_v9  ;;  %v2531_v9 = vld [vmem:[%s3255_s28 + $0x8] sm:$0xff]  }
 0x5f4   : > { %2380 = vmatpush3.bf16.msra.mxu1 %v2531_v9  ;;  %v2545_v12 = vld [vmem:[%s3206_s17 + $0x18] sm:$0xff]  }
 0x5f5   : > { %v1434_v15 = vsel %vm839_vm0, %v1431_v14, 0.0  ;;  %2381 = vmatprep.subr.bf16.mxu1 %v2642_v13 }
 0x5f6   : > { %1435 = vadd.xlane.f32.xlu1 %v1434_v15 }
 0x5f8   : > { %2382 = vmatpush3.bf16.msra.mxu1 %v2532_v22 }
 0x5f9   : > { %2383 = vmatprep.subr.bf16.mxu1 %v2642_v13 }
 0x5fc   : > { %2384 = vmatpush3.bf16.msra.mxu1 %v2533_v23 }
 0x5fd   : > { %2409 = vmatprep.subr.bf16.mxu1 %v2642_v13 }
 0x683   : > { %v1436_v16 = vpop.xlane.xlu1 %1435 }
 0x684   : > { %v1438_v17 = vmul.f32 0.015625, %v1436_v16 }
 0x686   : > { %v1439_v18 = vsub.f32 %v1431_v14, %v1438_v17  ;;  %v2546_v17 = vld [vmem:[%s3205_s16] sm:$0xff]  }
 0x688   : > { %v1440_v19 = vmul.f32 %v1439_v18, %v1439_v18 }
 0x68a   : > { %v1441_v20 = vsel %vm839_vm0, %v1440_v19, 0.0  ;;  %v2548_v19 = vld [vmem:[%s3205_s16 + $0x10] sm:$0xff]  }
 0x68b   : > { %1442 = vadd.xlane.f32.xlu0 %v1441_v20  ;;  %v2549_v20 = vld [vmem:[%s3205_s16 + $0x18] sm:$0xff]  }
 0x718   : > { %v1443_v31 = vpop.xlane.xlu0 %1442 }
 0x719   : > { %v1444_v30 = vmul.f32 0.015625, %v1443_v31 }
 0x71b   : > { %v1445_v32 = vadd.f32 1e-05, %v1444_v30 }
 0x71d   : > { %2573 = vrsqrt.f32 %v1445_v32 }
 0x727   : > { %v2574_v33 = vpop.eup %2573 }
 0x728   : > { %v1447_v35 = vmul.f32 %v2574_v33, %v1439_v18  ;;  %v2547_v18 = vld [vmem:[%s3205_s16 + $0x8] sm:$0xff]  }
 0x72a   : > { %v1454_v37 = vmul.f32 %v2215_v34, %v1447_v35  ;;  %v2550_v34 = vld [vmem:[%s3208_s19] sm:$0xff]   ;;  %v2551_v35 = vld [vmem:[%s3208_s19 + $0x8] sm:$0xff]  }
 0x72c   : > { %v1461_v38 = vadd.f32 %v2216_v36, %v1454_v37  ;;  %v2552_v36 = vld [vmem:[%s3208_s19 + $0x10] sm:$0xff]   ;;  %v2553_v37 = vld [vmem:[%s3208_s19 + $0x18] sm:$0xff]  }
 0x72e   : > { %v1462_v39 = vpack.c.bf16 %v1461_v38, %v1461_v38 }
 0x730   : > { %2386 = vmatmul.mubr.msk.bf16.vlgmr.msra.gmra.mrb[20].mxu1 %vm839_vm0, %v1462_v39  ;;  %v2246_v39 = vld [vmem:[%s3207_s18] ss:$0 sm:$0xff] }
 0x731   : > { %2411 = vmatprep.mubr.msk.bf16.mxu1 %vm2643_vm1, %v2642_v13  ;;  %2410 = vmatpush3.bf16.msra.mxu1 %v1702_v53  ;;  %v2554_v53 = vld [vmem:[%s3210_s21] sm:$0xff]  }
 0x732   : > { %2415 = vmatprep.subr.bf16.mxu1 %v2642_v13 }
 0x738   : > { %2412 = vmatmul.mubr.msk.bf16.vlgmr.msra.gmra.mrb[24].mxu1 %vm937_vm4, %v1689_v52 }
 0x739   : > { %2423 = vmatprep.mubr.msk.bf16.mxu1 %vm2643_vm1, %v2642_v13  ;;  %2416 = vmatpush3.bf16.msra.mxu1 %v2542_v62 }
 0x73a   : > { %2417 = vmatprep.subr.bf16.mxu1 %v2642_v13 }
 0x73d   : > { %2418 = vmatpush3.bf16.msra.mxu1 %v2543_v63  ;;  %v1995_v63 = vld [vmem:[%s3211_s22] sm:$0x1] }
 0x73e   : > { %2419 = vmatprep.subr.bf16.mxu1 %v2642_v13 }
 0x741   : > { %2420 = vmatpush3.bf16.msra.mxu1 %v2544_v0 }
 0x742   : > { %2421 = vmatprep.subr.bf16.mxu1 %v2642_v13 }
 0x745   : > { %2422 = vmatpush3.bf16.msra.mxu1 %v2545_v12 }
 0x746   : > { %2427 = vmatprep.subr.bf16.mxu1 %v2642_v13 }
 0x803   : > { %v1539_v43 = vpop.f32.mrb[20].mxu1 }
 0x804   : > { %v1540_v44 = vadd.f32 %v2217_v42, %v1539_v43  ;;  %v2387_v45 = vpop.f32.mrb[21].mxu1 }
 0x805   : > { %v1542_v46 = vpop.f32.mrb[22].mxu1 }
 0x806   : > { %v1545_v47 = vmax.f32 %v1540_v44, 0.0  ;;  %v2388_v48 = vpop.f32.mrb[23].mxu1 }
 0x808   : > { %v1546_v49 = vpack.c.bf16 %v1545_v47, %v1545_v47 }
 0x80a   : > { %2406 = vmatmul.mubr.bf16.vlgmr.msra.gmra.mrb[20].mxu0 %v1546_v49 }
 0x80b   : > { %2447 = vmatprep.mubr.msk.bf16.mxu0 %vm2643_vm1, %v2642_v13  ;;  %v1738_v7 = vpop.f32.mrb[24].mxu1  ;;  %2440 = vmatpush3.bf16.msra.mxu0 %v2550_v34 }
 0x80c   : > { %v1739_v8 = vadd.f32 %v2234_v6, %v1738_v7  ;;  %v2413_v10 = vpop.f32.mrb[25].mxu1  ;;  %2441 = vmatprep.subr.bf16.mxu0 %v2642_v13  ;;  %v2055_v7 = vld [vmem:[%s3213_s24] sm:$0x1] }
 0x80d   : > { %v1741_v11 = vpop.f32.mrb[26].mxu1 }
 0x80e   : > { %v1744_v14 = vmax.f32 %v1739_v8, 0.0  ;;  %v2414_v15 = vpop.f32.mrb[27].mxu1 }
 0x80f   : > { %2442 = vmatpush3.bf16.msra.mxu0 %v2551_v35 }
 0x810   : > { %v1754_v16 = vpack.c.bf16 %v1744_v14, %v1744_v14  ;;  %2443 = vmatprep.subr.bf16.mxu0 %v2642_v13 }
 0x812   : > { %2424 = vmatmul.mubr.msk.bf16.vlgmr.msra.gmra.mrb[28].mxu1 %vm839_vm0, %v1754_v16 }
 0x813   : > { %2435 = vmatprep.mubr.msk.bf16.mxu1 %vm2643_vm1, %v2642_v13  ;;  %2428 = vmatpush3.bf16.msra.mxu1 %v2546_v17 }
 0x814   : > { %2429 = vmatprep.subr.bf16.mxu1 %v2642_v13  ;;  %2444 = vmatpush3.bf16.msra.mxu0 %v2552_v36 }
 0x815   : > { %2445 = vmatprep.subr.bf16.mxu0 %v2642_v13 }
 0x817   : > { %2430 = vmatpush3.bf16.msra.mxu1 %v2547_v18 }
 0x818   : > { %2431 = vmatprep.subr.bf16.mxu1 %v2642_v13  ;;  %2446 = vmatpush3.bf16.msra.mxu0 %v2553_v37 }
 0x819   : > { %2459 = vmatprep.subr.bf16.mxu0 %v2642_v13 }
 0x81b   : > { %2432 = vmatpush3.bf16.msra.mxu1 %v2548_v19 }
 0x81c   : > { %2433 = vmatprep.subr.bf16.mxu1 %v2642_v13 }
 0x81f   : > { %2434 = vmatpush3.bf16.msra.mxu1 %v2549_v20 }
 0x820   : > { %2451 = vmatprep.subr.bf16.mxu1 %v2642_v13 }
 0x8dd   : > { %v1652_v55 = vpop.f32.mrb[20].mxu0 }
 0x8de   : > { %v1653_v56 = vadd.f32 %v2223_v54, %v1652_v55  ;;  %v2407_v57 = vpop.f32.mrb[21].mxu0  ;;  %v2555_v54 = vld [vmem:[%s3210_s21 + $0x8] sm:$0xff]   ;;  %v1921_v55 = vld [vmem:[%s3209_s20] sm:$0x1] }
 0x8df   : > { %v1655_v58 = vpop.f32.mrb[22].mxu0 }
 0x8e0   : > { %v2408_v59 = vpop.f32.mrb[23].mxu0  ;;  %v1658_v60 = vadd.f32 %v1653_v56, %v1461_v38 }
 0x8e2   : > { %v1661_v61 = vsel %vm839_vm0, %v1658_v60, 0.0 }
 0x8e3   : > { %1662 = vadd.xlane.f32.xlu0 %v1661_v61 }
 0x8e5   : > { %v1824_v31 = vpop.f32.mrb[28].mxu1 }
 0x8e6   : > { %v2425_v30 = vpop.f32.mrb[29].mxu1 }
 0x8e7   : > { %v1827_v32 = vpop.f32.mrb[30].mxu1 }
 0x8e8   : > { %v2426_v33 = vpop.f32.mrb[31].mxu1 }
 0x970   : > { %v1663_v1 = vpop.xlane.xlu0 %1662 }
 0x971   : > { %v1664_v2 = vmul.f32 0.015625, %v1663_v1 }
 0x973   : > { %v1665_v3 = vsub.f32 %v1658_v60, %v1664_v2 }
 0x975   : > { %v1666_v4 = vmul.f32 %v1665_v3, %v1665_v3 }
 0x977   : > { %v1667_v5 = vsel %vm839_vm0, %v1666_v4, 0.0 }
 0x978   : > { %1668 = vadd.xlane.f32.xlu1 %v1667_v5 }
 0xa05   : > { %v1669_v21 = vpop.xlane.xlu1 %1668 }
 0xa06   : > { %v1670_v9 = vmul.f32 0.015625, %v1669_v21 }
 0xa08   : > { %v1671_v22 = vadd.f32 1e-05, %v1670_v9 }
 0xa0a   : > { %2575 = vrsqrt.f32 %v1671_v22 }
 0xa14   : > { %v2576_v23 = vpop.eup %2575 }
 0xa15   : > { %v1673_v25 = vmul.f32 %v2576_v23, %v1665_v3 }
 0xa17   : > { %v1680_v27 = vmul.f32 %v2232_v24, %v1673_v25 }
 0xa19   : > { %v1687_v28 = vadd.f32 %v2233_v26, %v1680_v27 }
 0xa1b   : > { %v1745_v29 = vpack.c.bf16 %v1687_v28, %v1687_v28 }
 0xa1d   : > { %2436 = vmatmul.mubr.msk.bf16.vlgmr.msra.gmra.mrb[32].mxu1 %vm839_vm0, %v1745_v29 }
 0xa1e   : > { %2455 = vmatprep.mubr.msk.bf16.mxu1 %vm2643_vm1, %v2642_v13  ;;  %2452 = vmatpush3.bf16.msra.mxu1 %v2554_v53 }
 0xa1f   : > { %2453 = vmatprep.subr.bf16.mxu1 %v2642_v13 }
 0xa22   : > { %2454 = vmatpush3.bf16.msra.mxu1 %v2555_v54 }
 0xaf0   : > { %v1891_v38 = vpop.f32.mrb[32].mxu1 }
 0xaf1   : > { %v1892_v40 = vadd.f32 %v1891_v38, %v1824_v31  ;;  %v2437_v41 = vpop.f32.mrb[33].mxu1 }
 0xaf2   : > { %v1894_v42 = vpop.f32.mrb[34].mxu1 }
 0xaf3   : > { %v1904_v43 = vadd.f32 %v2246_v39, %v1892_v40  ;;  %v2438_v44 = vpop.f32.mrb[35].mxu1 }
 0xaf5   : > { %v1905_v45 = vsel %vm839_vm0, %v1904_v43, -inf }
 0xaf6   : > { %v1906_v46 = vrot.slane %v1905_v45, 4 }
 0xaf8   : > { %v1907_v47 = vmax.f32 %v1905_v45, %v1906_v46 }
 0xafa   : > { %v1908_v48 = vrot.slane %v1907_v47, 2 }
 0xafc   : > { %v1909_v49 = vmax.f32 %v1907_v47, %v1908_v48 }
 0xafe   : > { %v1910_v50 = vrot.slane %v1909_v49, 1 }
 0xb00   : > { %v1911_v51 = vmax.f32 %v1909_v49, %v1910_v50 }
 0xb02   : > { %v1912_v52 = vpack.c.bf16 %v1911_v51, %v1911_v51 }
 0xb04   : > { %2448 = vmatmul.mubr.msk.bf16.vlgmr.msra.gmra.mrb[24].mxu0 %vm839_vm0, %v1912_v52 }
 0xb05   : > { %2461 = vmatprep.mubr.msk.bf16.mxu0 %vm2643_vm1, %v2642_v13  ;;  %v2556_v13 = vld [vmem:[%s3212_s23] sm:$0xff]  }
 0xb06   : > { %2460 = vmatpush3.bf16.msra.mxu0 %v2556_v13 }
 0xbd7   : > { %v1983_v56 = vpop.f32.mrb[24].mxu0 }
 0xbd8   : > { %v1984_v57 = vadd.f32 %v1983_v56, %v1921_v55  ;;  %v2449_v58 = vpop.f32.mrb[25].mxu0 }
 0xbd9   : > { %v1986_v59 = vpop.f32.mrb[26].mxu0 }
 0xbda   : > { %v1989_v60 = vmax.f32 %v1984_v57, 0.0  ;;  %v2450_v61 = vpop.f32.mrb[27].mxu0 }
 0xbdc   : > { %v1990_v62 = vpack.c.bf16 %v1989_v60, %v1989_v60 }
 0xbde   : > { %2456 = vmatmul.mubr.msk.bf16.vlgmr.msra.gmra.mrb[36].mxu1 %vm1344_vm5, %v1990_v62 }
 0xcb1   : > { %v2045_v0 = vpop.f32.mrb[36].mxu1 }
 0xcb2   : > { %v2046_v1 = vadd.f32 %v2045_v0, %v1995_v63  ;;  %v2457_v2 = vpop.f32.mrb[37].mxu1 }
 0xcb3   : > { %v2048_v3 = vpop.f32.mrb[38].mxu1 }
 0xcb4   : > { %v2051_v4 = vmax.f32 %v2046_v1, 0.0  ;;  %v2458_v5 = vpop.f32.mrb[39].mxu1 }
 0xcb6   : > { %v2052_v6 = vpack.c.bf16 %v2051_v4, %v2051_v4 }
 0xcb8   : > { %2462 = vmatmul.mubr.msk.bf16.vlgmr.msra.gmra.mrb[28].mxu0 %vm889_vm2, %v2052_v6 }
 0xd8b   : > { %v2099_v8 = vpop.f32.mrb[28].mxu0 }
 0xd8c   : > { %v2100_v10 = vadd.f32 %v2099_v8, %v2055_v7  ;;  %v2463_v11 = vpop.f32.mrb[29].mxu0 }
 0xd8d   : > { %v2102_v12 = vpop.f32.mrb[30].mxu0 }
 0xd8e   : > { %2105 = vst [vmem:[%s767_s3] sm:$0x1] %v2100_v10  ;;  %v2464_v14 = vpop.f32.mrb[31].mxu0 }
 0xd8f   : > { %2590 = shalt.err (!%p2587_p3)
}
 0xd90   : > { %s2591_s6 = scalar_lea.hbm %s3147_s0, 16  ;;  %s2595_s29 = scalar_lea.hbm %s3262_s9, 32 }
 0xd91   : > { %p2592_p4 = scmp.ne.s32.totalorder %s3147_s0, %s2591_s6  ;;  %p2596_p9 = scmp.lt.u32.totalorder %s3147_s0, %s3262_s9 }
 0xd92   : > { %p2597_p10 = scmp.lt.u32.totalorder %s2595_s29, %s2591_s6  ;;  %p2599_p12 = scmp.lt.u32.totalorder %s2591_s6, %s3147_s0 }
 0xd93   : > { %p2593_p7 = pnand %p2592_p4, %p2820_p5 }
 0xd94   : > { %p2598_p11 = por %p2597_p10, %p2596_p9 }
 0xd95   : > { %p2594_p8 = pneg %p2593_p7 }
 0xd96   : > { %p2600_p13 = por %p2599_p12, %p2598_p11 }
 0xd98   : > { %p2601_p0 = pnand %p2600_p13, %p2594_p8 }
 0xd9a   : > { %2604 = shalt.err (!%p2601_p0)
}
 0xd9b   : > { %2465 = dma.vmem_to_hbm [thread:$0]  (%p2820_p5), %s3149_s27, 16, %s3147_s0, %s2107_s5  }
 0xd9c PF: > { %s3263_s7 = sld [smem:[#allocation7_spill]]  ;;  %s3264_s1 = sld [smem:[#allocation5_spill]] }
 0xda2   : > { %p2471_p1 = scmp.ge.s32.totalorder %s3263_s7, 2  ;;  %s2131_s26 = sand.u32 1, %s3264_s1  }
 0xda3   : > { %s2132_s3 = scalar_lea.sflag [#allocation3], %s2131_s26 }
 0xda4   : > { %p2468_p2 = pnand %p2471_p1, %p2824_p6 }
 0xda6   : > { %2622 = dma.done.wait (!%p2468_p2), %s2132_s3, 16  }
 0xda7   : > { %2624 = vsyncadd (!%p2468_p2), %s2132_s3, 4294967280  ;;  %s3266_s30 = sld [smem:[#allocation8_spill]]  ;;  %s3267_s6 = sld [smem:[#allocation6_spill]] }
 0xda8   : > { %s3268_s4 = sld [smem:[#allocation9_spill]]  ;;  %s3269_s29 = smov %s2631_s2 }
 0xdad   : > { %p35_p3 = scmp.ge.s32.totalorder %s3266_s30, 4   ;;  %s3270_s2 = smov %s3267_s6 }
 0xdae   : > { %s3271_s6 = smov %s3268_s4 }
 0xdaf   :  { %37 = sbr.rel (!%p35_p3) target bundleno = 15 (0xf), region = 158 }
 0xdb6   :  { %2136 = vsyncpa [#allocation3], 1 }
 0xdb7   :  { %2138 = vsyncpa [#allocation3 + $0x1], 1 }

// kernel: forward.2
= control target key start
LH: loop header
LB: loop body
LE: loop exit
PB: predicated region body
PF: predicated region fallthrough
CT: control target
= control target key end

     0   :  { %v3749_v1 = vmov 0.0   ;;  %vm3750_vm0 = vmmov 0   ;;  %v3751_v3 = vmov 0   ;;  %vm136_vm1 = vcmask 1043456   ;;  %s3753_s20 = smov 32   ;;  %s4700_s1 = inlined_call_operand.vmem [shape: bf16[120,256], index: 1, kind: input, shape index: {}]   ;;  %s4701_s2 = inlined_call_operand.vmem [shape: bf16[32,256], index: 2, kind: input, shape index: {}]   ;;  %s4702_s0 = inlined_call_operand.vmem [shape: f32[16,120], index: 0, kind: input, shape index: {}]   ;;  %s4703_s3 = inlined_call_operand.vmem [shape: f32[1,256], index: 3, kind: input, shape index: {}]   ;;  %s4704_s4 = inlined_call_operand.vmem [shape: bf16[64,256], index: 4, kind: input, shape index: {}]   ;;  %s4705_s5 = inlined_call_operand.vmem [shape: bf16[32,256], index: 5, kind: input, shape index: {}]   ;;  %s4706_s6 = inlined_call_operand.vmem [shape: f32[1,256], index: 6, kind: input, shape index: {}]   ;;  %s4707_s7 = inlined_call_operand.vmem [shape: f32[2,512], index: 7, kind: output, shape index: {}]  }
   0x1   :  { %v3441_v0 = vld [vmem:[%s4700_s1 + $0x4] ss:$8 sps:$4 sm:$0xff]   ;;  %3168 = vmatprep.subr.bf16.mxu1 %v3749_v1  ;;  %3172 = vmatprep.mubr.msk.bf16.mxu1 %vm3750_vm0, %v3749_v1  ;;  %v3443_v2 = vld [vmem:[%s4700_s1] ss:$8 sps:$4 sm:$0xff]   ;;  %v3444_v4 = vld [vmem:[%s4700_s1 + $0x14] ss:$8 sps:$4 sm:$0xff]   ;;  %v47_v30 = vlaneseq }
   0x2   :  { %175 = vmatprep.mubr.bf16.mxu0 %v3751_v3  ;;  %143 = vmatprep.subr.bf16.mxu0 %v3441_v0  ;;  %v3446_v5 = vld [vmem:[%s4700_s1 + $0x10] ss:$8 sps:$4 sm:$0xff]   ;;  %v3447_v6 = vld [vmem:[%s4700_s1 + $0x24] ss:$8 sps:$4 sm:$0xff]   ;;  %v3449_v7 = vld [vmem:[%s4700_s1 + $0x20] ss:$8 sps:$4 sm:$0xff]  }
   0x3   :  { %144 = vmatpush1.bf16.msra.mxu0 %v3443_v2  ;;  %v3450_v8 = vld [vmem:[%s4700_s1 + $0x34] ss:$8 sps:$4 sm:$0xff]   ;;  %v3824_v9 = vld [vmem:[%s4701_s2] ss:$8 sps:$4 sm:$0xff]   ;;  %v3830_v10 = vld [vmem:[%s4701_s2 + $0x10] ss:$8 sps:$4 sm:$0xff]  }
   0x4   :  { %145 = vmatprep.subr.bf16.mxu0 %v3444_v4  ;;  %3169 = vmatpush3.bf16.msra.mxu1 %v3824_v9  ;;  %v3452_v11 = vld [vmem:[%s4700_s1 + $0x30] ss:$8 sps:$4 sm:$0xff]   ;;  %v3453_v12 = vld [vmem:[%s4700_s1 + $0x44] ss:$8 sps:$4 sm:$0xff]   ;;  %v3455_v14 = vld [vmem:[%s4700_s1 + $0x40] ss:$8 sps:$4 sm:$0xff]  }
   0x5   :  { %3170 = vmatprep.subr.bf16.mxu1 %v3749_v1  ;;  %v3843_v13 = vld [vmem:[%s4701_s2 + $0x4] ss:$8 sps:$4 sm:$0xff]   ;;  %v3456_v15 = vld [vmem:[%s4700_s1 + $0x54] ss:$8 sps:$4 sm:$0xff]   ;;  %v3460_v17 = vld [vmem:[%s4700_s1 + $0x50] ss:$8 sps:$4 sm:$0xff]  }
   0x6   :  { %v3857_v16 = vld [vmem:[%s4701_s2 + $0x14] ss:$8 sps:$4 sm:$0xff]   ;;  %v3461_v18 = vld [vmem:[%s4700_s1 + $0x64] ss:$8 sps:$4 sm:$0xff]   ;;  %v3465_v20 = vld [vmem:[%s4700_s1 + $0x60] ss:$8 sps:$4 sm:$0xff]  }
   0x7   :  { %146 = vmatpush1.bf16.msra.mxu0 %v3446_v5  ;;  %v44_v19 = vld [vmem:[%s4700_s1 + $0x70] sm:$0xff]  ;;  %v27_v23 = vld [vmem:[%s4702_s0] sm:$0xff]  ;;  %v28_v24 = vld [vmem:[%s4702_s0 + $0x8] sm:$0xff]  ;;  %vm132_vm2 = vcmask 982016   ;;  %v3898_v32 = vshrl.u32 %v47_v30, 7  ;;  %v296_v58 = vand.u32 127, %v47_v30 }
   0x8   :  { %147 = vmatprep.subr.bf16.mxu0 %v3447_v6  ;;  %3171 = vmatpush3.bf16.msra.mxu1 %v3830_v10  ;;  %v2992_v21 = vcombine.high %v44_v19, %v44_v19  ;;  %v2991_v22 = vcombine.low %v44_v19, %v44_v19  ;;  %v29_v26 = vpack.c.bf16 %v28_v24, %v27_v23  ;;  %v45_v37 = vld [vmem:[%s4703_s3] sm:$0x3]  ;;  %s3752_s3 = smov 64   ;;  %vm202_vm6 = vcmask 261120  }
   0x9   :  { %3176 = vmatprep.subr.bf16.mxu1 %v3749_v1  ;;  %v49_v35 = vsub.s32 0, %v3898_v32  ;;  %v53_v38 = vsub.s32 1, %v3898_v32  ;;  %vm297_vm3 = vcmp.ge.s32.totalorder %v296_v58, 64  ;;  %vm298_vm4 = vcmp.lt.s32.totalorder %v296_v58, 96 }
   0xa   :  { %v138_v25 = vsel %vm136_vm1, %v2991_v22, 0  ;;  %vm3919_vm5 = vmand %vm297_vm3, %vm298_vm4  ;;  %vm1462_vm7 = vcmask 1041408   ;;  %vm1465_vm8 = vcmask 1045504   ;;  %vm1555_vm9 = vcmask 523264  }
   0xb   :  { %148 = vmatpush1.bf16.msra.mxu0 %v3449_v7  ;;  %3173 = vmatmul.mubr.bf16.vlgmr.msra.gmra.mrb[0].mxu1 %v3751_v3  ;;  %v50_v40 = vrot.slane %v45_v37, %v49_v35  ;;  %v54_v41 = vrot.slane %v45_v37, %v53_v38  ;;  %vm2939_vm10 = vcmask 785408  }
   0xc   :  { %149 = vmatprep.subr.bf16.mxu0 %v3450_v8  ;;  %3177 = vmatpush3.bf16.msra.mxu1 %v3843_v13 }
   0xd   :  { %3180 = vmatprep.mubr.msk.bf16.mxu1 %vm3750_vm0, %v3749_v1  ;;  %3178 = vmatprep.subr.bf16.mxu1 %v3749_v1 }
   0xf   :  { %150 = vmatpush1.bf16.msra.mxu0 %v3452_v11 }
  0x10   :  { %151 = vmatprep.subr.bf16.mxu0 %v3453_v12  ;;  %3179 = vmatpush3.bf16.msra.mxu1 %v3857_v16 }
  0x11   :  { %3184 = vmatprep.subr.bf16.mxu1 %v3749_v1 }
  0x13   :  { %152 = vmatpush1.bf16.msra.mxu0 %v3455_v14  ;;  %3181 = vmatmul.mubr.bf16.vlgmr.msra.gmra.mrb[4].mxu1 %v3751_v3 }
  0x14   :  { %153 = vmatprep.subr.bf16.mxu0 %v3456_v15  ;;  %3185 = vmatpush3.bf16.msra.mxu1 %v3824_v9 }
  0x15   :  { %3188 = vmatprep.mubr.msk.bf16.mxu1 %vm3750_vm0, %v3749_v1  ;;  %3186 = vmatprep.subr.bf16.mxu1 %v3749_v1 }
  0x17   :  { %154 = vmatpush1.bf16.msra.mxu0 %v3460_v17 }
  0x18   :  { %155 = vmatprep.subr.bf16.mxu0 %v3461_v18  ;;  %3187 = vmatpush3.bf16.msra.mxu1 %v3830_v10 }
  0x19   :  { %3192 = vmatprep.subr.bf16.mxu1 %v3749_v1 }
  0x1b   :  { %156 = vmatpush1.bf16.msra.mxu0 %v3465_v20 }
  0x1c   :  { %2993 = vmatprep.subr.msk.bf16.mxu0 %vm136_vm1, %v2992_v21 }
  0x1f   :  { %158 = vmatpush1.bf16.msra.mxu0 %v138_v25 }
  0x20   :  { %3200 = vmatprep.subr.bf16.mxu0 %v3749_v1 }
  0x22   :  { %2994 = vmatmul.mubr.msk.bf16.vlgmr.msra.gmra.mrb[0].mxu0 %vm132_vm2, %v29_v26 }
  0x23   :  { %3201 = vmatpush3.bf16.msra.mxu0 %v3824_v9  ;;  %3204 = vmatprep.mubr.msk.bf16.mxu0 %vm3750_vm0, %v3749_v1 }
  0x24   :  { %3202 = vmatprep.subr.bf16.mxu0 %v3749_v1 }
  0x27   :  { %3203 = vmatpush3.bf16.msra.mxu0 %v3830_v10 }
  0x28   :  { %3216 = vmatprep.subr.bf16.mxu0 %v3749_v1 }
  0xde   :  { %v240_v27 = vpop.f32.mrb[0].mxu1 }
  0xdf   :  { %v3174_v28 = vpop.f32.mrb[1].mxu1 }
  0xe0   :  { %v243_v29 = vpop.f32.mrb[2].mxu1 }
  0xe1   :  { %v3175_v31 = vpop.f32.mrb[3].mxu1 }
  0xe6   :  { %v288_v33 = vpop.f32.mrb[4].mxu1 }
  0xe7   :  { %v3182_v34 = vpop.f32.mrb[5].mxu1  ;;  %v326_v47 = vrot.slane %v288_v33, 2 }
  0xe8   :  { %v291_v36 = vpop.f32.mrb[6].mxu1 }
  0xe9   :  { %v3183_v39 = vpop.f32.mrb[7].mxu1 }
  0xf5   :  { %v177_v42 = vpop.f32.mrb[0].mxu0 }
  0xf6   :  { %v3909_v43 = vadd.f32 %v177_v42, %v50_v40  ;;  %v179_v44 = vpop.f32.mrb[1].mxu0 }
  0xf7   :  { %v3911_v45 = vadd.f32 %v179_v44, %v54_v41  ;;  %v181_v46 = vpop.f32.mrb[2].mxu0 }
  0xf8   :  { %v294_v48 = vadd.f32 %v240_v27, %v3909_v43  ;;  %v3914_v49 = vadd.f32 %v181_v46, %v50_v40  ;;  %v183_v50 = vpop.f32.mrb[3].mxu0 }
  0xf9   :  { %v3916_v51 = vadd.f32 %v183_v50, %v54_v41 }
  0xfa   :  { %v2999_v52 = vmul.f32 -1.442695, %v294_v48 }
  0xfb   :  { %v328_v53 = vadd.f32 %v326_v47, %v3916_v51 }
  0xfc   :  { %3488 = vpow2.f32 %v2999_v52 }
  0xfd   :  { %v3000_v54 = vmul.f32 -1.442695, %v328_v53 }
  0xff   :  { %3490 = vpow2.f32 %v3000_v54 }
 0x100   :  { %3492 = vtanh.f32 %v294_v48 }
 0x106   :  { %v3489_v55 = vpop.eup %3488 }
 0x107   :  { %v304_v56 = vadd.f32 1.0, %v3489_v55 }
 0x109   :  { %v3491_v57 = vpop.eup %3490  ;;  %3494 = vrcp.f32 %v304_v56 }
 0x10a   :  { %v333_v59 = vadd.f32 1.0, %v3491_v57  ;;  %3496 = vtanh.f32 %v328_v53  ;;  %v3493_v61 = vpop.eup %3492 }
 0x10c   :  { %3498 = vrcp.f32 %v333_v59 }
 0x113   :  { %v3495_v62 = vpop.eup %3494 }
 0x114   :  { %v307_v63 = vsel %vm3919_vm5, %v3493_v61, %v3495_v62  ;;  %v3497_v0 = vpop.eup %3496 }
 0x115   :  { %310 = vrot.lane.b32.xlu0 %v307_v63, %s3752_s3  ;;  %v308_v11 = vmul.f32 0.0, %v307_v63 }
 0x116   :  { %v3499_v2 = vpop.eup %3498 }
 0x117   :  { %v336_v4 = vsel %vm3919_vm5, %v3497_v0, %v3499_v2 }
 0x118   :  { %v337_v15 = vmul.f32 0.0, %v336_v4 }
 0x119   :  { %339 = vrot.lane.b32.xlu0 %v336_v4, %s3752_s3 }
 0x187   :  { %v311_v5 = vpop.permute.xlu0 %310 }
 0x188   :  { %v313_v6 = vmul.f32 %v311_v5, %v307_v63 }
 0x18a   :  { %315 = vrot.lane.b32.xlu1 %v313_v6, %s3753_s20 }
 0x18b   :  { %v340_v7 = vpop.permute.xlu0 %339 }
 0x18c   :  { %v342_v8 = vmul.f32 %v340_v7, %v336_v4 }
 0x18e   :  { %344 = vrot.lane.b32.xlu1 %v342_v8, %s3753_s20 }
 0x1fc   :  { %v316_v12 = vpop.permute.xlu1 %315 }
 0x1fd   :  { %v3931_v14 = vadd.f32 %v316_v12, %v308_v11 }
 0x1ff   :  { %3500 = vtanh.f32 %v3931_v14 }
 0x200   :  { %v345_v17 = vpop.permute.xlu1 %344 }
 0x201   :  { %v3934_v18 = vadd.f32 %v345_v17, %v337_v15 }
 0x203   :  { %3502 = vtanh.f32 %v3934_v18  ;;  %v494_v8 = vrot.slane %v3934_v18, 2 }
 0x209   :  { %v3501_v19 = vpop.eup %3500 }
 0x20a   :  { %321 = vrot.lane.b32.xlu0 %v3501_v19, %s3752_s3 }
 0x20d   :  { %v3503_v20 = vpop.eup %3502 }
 0x20e   :  { %350 = vrot.lane.b32.xlu1 %v3503_v20, %s3752_s3 }
 0x27c   :  { %v322_v21 = vpop.permute.xlu0 %321 }
 0x27d   :  { %v3939_v22 = vmul.f32 %v322_v21, %v307_v63 }
 0x27f   :  { %v354_v23 = vpack.c.bf16 %v3939_v22, %v3939_v22 }
 0x280   :  { %v351_v24 = vpop.permute.xlu1 %350 }
 0x281   :  { %v3943_v25 = vmul.f32 %v351_v24, %v336_v4  ;;  %356 = vrot.lane.b32.xlu0 %v354_v23, %s3753_s20  ;;  %v462_v4 = vrot.slane %v3931_v14, 6 }
 0x283   :  { %v401_v26 = vpack.c.bf16 %v3943_v25, %v3943_v25 }
 0x285   :  { %v403_v27 = vrot.slane %v401_v26, 3 }
 0x287   :  { %404 = vrot.lane.b32.xlu1 %v403_v27, %s3753_s20 }
 0x2f3   :  { %v357_v28 = vpop.permute.xlu0 %356 }
 0x2f4   :  { %3189 = vmatmul.mubr.msk.bf16.vlgmr.msra.gmra.mrb[8].mxu1 %vm202_vm6, %v357_v28 }
 0x2f5   :  { %3193 = vmatpush3.bf16.msra.mxu1 %v3843_v13  ;;  %3196 = vmatprep.mubr.msk.bf16.mxu1 %vm3750_vm0, %v3749_v1 }
 0x2f6   :  { %3194 = vmatprep.subr.bf16.mxu1 %v3749_v1 }
 0x2f9   :  { %3195 = vmatpush3.bf16.msra.mxu1 %v3857_v16  ;;  %v405_v29 = vpop.permute.xlu1 %404 }
 0x2fa   :  { %3208 = vmatprep.subr.bf16.mxu1 %v3749_v1 }
 0x2fc   :  { %3197 = vmatmul.mubr.msk.bf16.vlgmr.msra.gmra.mrb[12].mxu1 %vm202_vm6, %v405_v29 }
 0x2fd   :  { %3209 = vmatpush3.bf16.msra.mxu1 %v3843_v13  ;;  %3212 = vmatprep.mubr.msk.bf16.mxu1 %vm3750_vm0, %v3749_v1 }
 0x2fe   :  { %3210 = vmatprep.subr.bf16.mxu1 %v3749_v1 }
 0x301   :  { %3211 = vmatpush3.bf16.msra.mxu1 %v3857_v16 }
 0x302   :  { %3224 = vmatprep.subr.bf16.mxu1 %v3749_v1 }
 0x3c7   :  { %v395_v30 = vpop.f32.mrb[8].mxu1 }
 0x3c8   :  { %v450_v31 = vrot.slane %v395_v30, 6  ;;  %v3190_v33 = vpop.f32.mrb[9].mxu1 }
 0x3c9   :  { %v398_v34 = vpop.f32.mrb[10].mxu1 }
 0x3ca   :  { %v452_v36 = vadd.f32 %v450_v31, %v3909_v43  ;;  %v3191_v37 = vpop.f32.mrb[11].mxu1 }
 0x3cc   :  { %v3003_v39 = vmul.f32 -1.442695, %v452_v36 }
 0x3ce   :  { %3504 = vpow2.f32 %v3003_v39 }
 0x3cf   :  { %v443_v40 = vpop.f32.mrb[12].mxu1 }
 0x3d0   :  { %v482_v41 = vrot.slane %v443_v40, 4  ;;  %v3198_v42 = vpop.f32.mrb[13].mxu1 }
 0x3d1   :  { %v446_v44 = vpop.f32.mrb[14].mxu1 }
 0x3d2   :  { %v484_v46 = vadd.f32 %v482_v41, %v3916_v51  ;;  %v3199_v47 = vpop.f32.mrb[15].mxu1 }
 0x3d4   :  { %v3004_v48 = vmul.f32 -1.442695, %v484_v46 }
 0x3d6   :  { %3506 = vpow2.f32 %v3004_v48 }
 0x3d7   :  { %3508 = vtanh.f32 %v452_v36 }
 0x3d8   :  { %v3505_v50 = vpop.eup %3504 }
 0x3d9   :  { %v457_v52 = vadd.f32 1.0, %v3505_v50 }
 0x3db   :  { %3510 = vrcp.f32 %v457_v52 }
 0x3dc   :  { %3512 = vtanh.f32 %v484_v46 }
 0x3e0   :  { %v3507_v53 = vpop.eup %3506 }
 0x3e1   :  { %v489_v54 = vadd.f32 1.0, %v3507_v53  ;;  %v3509_v55 = vpop.eup %3508 }
 0x3e3   :  { %3514 = vrcp.f32 %v489_v54 }
 0x3e5   :  { %v3511_v56 = vpop.eup %3510 }
 0x3e6   :  { %v460_v57 = vsel %vm3919_vm5, %v3509_v55, %v3511_v56  ;;  %v3513_v58 = vpop.eup %3512 }
 0x3e7   :  { %466 = vrot.lane.b32.xlu0 %v460_v57, %s3752_s3  ;;  %v464_v5 = vmul.f32 %v462_v4, %v460_v57 }
 0x3ed   :  { %v3515_v59 = vpop.eup %3514 }
 0x3ee   :  { %v492_v61 = vsel %vm3919_vm5, %v3513_v58, %v3515_v59 }
 0x3ef   :  { %498 = vrot.lane.b32.xlu1 %v492_v61, %s3752_s3  ;;  %v496_v11 = vmul.f32 %v494_v8, %v492_v61 }
 0x459   :  { %v467_v62 = vpop.permute.xlu0 %466 }
 0x45a   :  { %v469_v63 = vmul.f32 %v467_v62, %v460_v57 }
 0x45c   :  { %471 = vrot.lane.b32.xlu0 %v469_v63, %s3753_s20 }
 0x461   :  { %v499_v0 = vpop.permute.xlu1 %498 }
 0x462   :  { %v501_v2 = vmul.f32 %v499_v0, %v492_v61 }
 0x464   :  { %503 = vrot.lane.b32.xlu1 %v501_v2, %s3753_s20 }
 0x4ce   :  { %v472_v6 = vpop.permute.xlu0 %471 }
 0x4cf   :  { %v3974_v7 = vadd.f32 %v472_v6, %v464_v5 }
 0x4d1   :  { %3516 = vtanh.f32 %v3974_v7  ;;  %v622_v4 = vrot.slane %v3974_v7, 6 }
 0x4d6   :  { %v504_v12 = vpop.permute.xlu1 %503 }
 0x4d7   :  { %v3978_v15 = vadd.f32 %v504_v12, %v496_v11 }
 0x4d9   :  { %3518 = vtanh.f32 %v3978_v15  ;;  %v654_v11 = vrot.slane %v3978_v15, 2 }
 0x4db   :  { %v3517_v17 = vpop.eup %3516 }
 0x4dc   :  { %477 = vrot.lane.b32.xlu0 %v3517_v17, %s3752_s3 }
 0x4e3   :  { %v3519_v19 = vpop.eup %3518 }
 0x4e4   :  { %509 = vrot.lane.b32.xlu1 %v3519_v19, %s3752_s3 }
 0x54e   :  { %v478_v14 = vpop.permute.xlu0 %477 }
 0x54f   :  { %v3983_v20 = vmul.f32 %v478_v14, %v460_v57 }
 0x551   :  { %v513_v21 = vpack.c.bf16 %v3983_v20, %v3983_v20 }
 0x553   :  { %v515_v23 = vrot.slane %v513_v21, 1 }
 0x555   :  { %516 = vrot.lane.b32.xlu0 %v515_v23, %s3753_s20 }
 0x556   :  { %v510_v18 = vpop.permute.xlu1 %509 }
 0x557   :  { %v3988_v24 = vmul.f32 %v510_v18, %v492_v61  ;;  %v1463_v18 = vsel %vm1462_vm7, %v3939_v22, %v3983_v20 }
 0x559   :  { %v561_v26 = vpack.c.bf16 %v3988_v24, %v3988_v24 }
 0x55b   :  { %v563_v27 = vrot.slane %v561_v26, 2 }
 0x55d   :  { %564 = vrot.lane.b32.xlu1 %v563_v27, %s3753_s20 }
 0x5c7   :  { %v517_v28 = vpop.permute.xlu0 %516 }
 0x5c8   :  { %3205 = vmatmul.mubr.msk.bf16.vlgmr.msra.gmra.mrb[4].mxu0 %vm202_vm6, %v517_v28 }
 0x5c9   :  { %3217 = vmatpush3.bf16.msra.mxu0 %v3824_v9  ;;  %3220 = vmatprep.mubr.msk.bf16.mxu0 %vm3750_vm0, %v3749_v1 }
 0x5ca   :  { %3218 = vmatprep.subr.bf16.mxu0 %v3749_v1 }
 0x5cd   :  { %3219 = vmatpush3.bf16.msra.mxu0 %v3830_v10 }
 0x5ce   :  { %3232 = vmatprep.subr.bf16.mxu0 %v3749_v1 }
 0x5cf   :  { %v565_v29 = vpop.permute.xlu1 %564 }
 0x5d0   :  { %3213 = vmatmul.mubr.msk.bf16.vlgmr.msra.gmra.mrb[16].mxu1 %vm202_vm6, %v565_v29 }
 0x5d1   :  { %3225 = vmatpush3.bf16.msra.mxu1 %v3843_v13  ;;  %3228 = vmatprep.mubr.msk.bf16.mxu1 %vm3750_vm0, %v3749_v1 }
 0x5d2   :  { %3226 = vmatprep.subr.bf16.mxu1 %v3749_v1 }
 0x5d5   :  { %3227 = vmatpush3.bf16.msra.mxu1 %v3857_v16 }
 0x5d6   :  { %3240 = vmatprep.subr.bf16.mxu1 %v3749_v1 }
 0x69b   :  { %v555_v30 = vpop.f32.mrb[4].mxu0 }
 0x69c   :  { %v610_v31 = vrot.slane %v555_v30, 4  ;;  %v3206_v33 = vpop.f32.mrb[5].mxu0 }
 0x69d   :  { %v558_v34 = vpop.f32.mrb[6].mxu0 }
 0x69e   :  { %v612_v36 = vadd.f32 %v610_v31, %v3909_v43  ;;  %v3207_v37 = vpop.f32.mrb[7].mxu0 }
 0x6a0   :  { %v3007_v39 = vmul.f32 -1.442695, %v612_v36 }
 0x6a2   :  { %3520 = vpow2.f32 %v3007_v39 }
 0x6a3   :  { %v603_v40 = vpop.f32.mrb[16].mxu1 }
 0x6a4   :  { %v642_v41 = vrot.slane %v603_v40, 6  ;;  %v3214_v42 = vpop.f32.mrb[17].mxu1 }
 0x6a5   :  { %v606_v44 = vpop.f32.mrb[18].mxu1 }
 0x6a6   :  { %v644_v46 = vadd.f32 %v642_v41, %v3916_v51  ;;  %v3215_v47 = vpop.f32.mrb[19].mxu1 }
 0x6a8   :  { %v3008_v48 = vmul.f32 -1.442695, %v644_v46 }
 0x6aa   :  { %3522 = vpow2.f32 %v3008_v48 }
 0x6ab   :  { %3524 = vtanh.f32 %v612_v36 }
 0x6ac   :  { %v3521_v50 = vpop.eup %3520 }
 0x6ad   :  { %v617_v52 = vadd.f32 1.0, %v3521_v50 }
 0x6af   :  { %3526 = vrcp.f32 %v617_v52 }
 0x6b0   :  { %3528 = vtanh.f32 %v644_v46 }
 0x6b4   :  { %v3523_v53 = vpop.eup %3522 }
 0x6b5   :  { %v649_v54 = vadd.f32 1.0, %v3523_v53  ;;  %v3525_v55 = vpop.eup %3524 }
 0x6b7   :  { %3530 = vrcp.f32 %v649_v54 }
 0x6b9   :  { %v3527_v56 = vpop.eup %3526 }
 0x6ba   :  { %v620_v57 = vsel %vm3919_vm5, %v3525_v55, %v3527_v56  ;;  %v3529_v58 = vpop.eup %3528 }
 0x6bb   :  { %626 = vrot.lane.b32.xlu0 %v620_v57, %s3752_s3  ;;  %v624_v5 = vmul.f32 %v622_v4, %v620_v57 }
 0x6c1   :  { %v3531_v59 = vpop.eup %3530 }
 0x6c2   :  { %v652_v61 = vsel %vm3919_vm5, %v3529_v58, %v3531_v59 }
 0x6c3   :  { %658 = vrot.lane.b32.xlu1 %v652_v61, %s3752_s3  ;;  %v656_v12 = vmul.f32 %v654_v11, %v652_v61 }
 0x72d   :  { %v627_v62 = vpop.permute.xlu0 %626 }
 0x72e   :  { %v629_v63 = vmul.f32 %v627_v62, %v620_v57 }
 0x730   :  { %631 = vrot.lane.b32.xlu0 %v629_v63, %s3753_s20 }
 0x735   :  { %v659_v0 = vpop.permute.xlu1 %658 }
 0x736   :  { %v661_v2 = vmul.f32 %v659_v0, %v652_v61 }
 0x738   :  { %663 = vrot.lane.b32.xlu1 %v661_v2, %s3753_s20 }
 0x7a2   :  { %v632_v6 = vpop.permute.xlu0 %631 }
 0x7a3   :  { %v4018_v8 = vadd.f32 %v632_v6, %v624_v5 }
 0x7a5   :  { %3532 = vtanh.f32 %v4018_v8  ;;  %v782_v2 = vrot.slane %v4018_v8, 6 }
 0x7aa   :  { %v664_v17 = vpop.permute.xlu1 %663 }
 0x7ab   :  { %v4022_v19 = vadd.f32 %v664_v17, %v656_v12 }
 0x7ad   :  { %3534 = vtanh.f32 %v4022_v19  ;;  %v811_v11 = vrot.slane %v4022_v19, 2 }
 0x7af   :  { %v3533_v14 = vpop.eup %3532 }
 0x7b0   :  { %637 = vrot.lane.b32.xlu0 %v3533_v14, %s3752_s3 }
 0x7b7   :  { %v3535_v21 = vpop.eup %3534 }
 0x7b8   :  { %669 = vrot.lane.b32.xlu1 %v3535_v21, %s3752_s3 }
 0x822   :  { %v638_v7 = vpop.permute.xlu0 %637 }
 0x823   :  { %v640_v23 = vmul.f32 %v638_v7, %v620_v57 }
 0x825   :  { %v673_v15 = vpack.c.bf16 %v640_v23, %v640_v23  ;;  %v4031_v26 = vsel %vm136_vm1, %v1463_v18, %v640_v23 }
 0x827   :  { %v675_v27 = vrot.slane %v673_v15, 2 }
 0x829   :  { %676 = vrot.lane.b32.xlu0 %v675_v27, %s3753_s20 }
 0x82a   :  { %v670_v28 = vpop.permute.xlu1 %669 }
 0x82b   :  { %v4034_v29 = vmul.f32 %v670_v28, %v652_v61 }
 0x82d   :  { %v721_v30 = vpack.c.bf16 %v4034_v29, %v4034_v29 }
 0x82f   :  { %v723_v31 = vrot.slane %v721_v30, 1 }
 0x831   :  { %724 = vrot.lane.b32.xlu1 %v723_v31, %s3753_s20 }
 0x89b   :  { %v677_v33 = vpop.permute.xlu0 %676 }
 0x89c   :  { %3221 = vmatmul.mubr.msk.bf16.vlgmr.msra.gmra.mrb[8].mxu0 %vm202_vm6, %v677_v33 }
 0x89d   :  { %3233 = vmatpush3.bf16.msra.mxu0 %v3824_v9  ;;  %3236 = vmatprep.mubr.msk.bf16.mxu0 %vm3750_vm0, %v3749_v1 }
 0x89e   :  { %3234 = vmatprep.subr.bf16.mxu0 %v3749_v1 }
 0x8a1   :  { %3235 = vmatpush3.bf16.msra.mxu0 %v3830_v10 }
 0x8a2   :  { %3248 = vmatprep.subr.bf16.mxu0 %v3749_v1 }
 0x8a3   :  { %v725_v22 = vpop.permute.xlu1 %724 }
 0x8a4   :  { %3229 = vmatmul.mubr.msk.bf16.vlgmr.msra.gmra.mrb[20].mxu1 %vm202_vm6, %v725_v22 }
 0x8a5   :  { %3241 = vmatpush3.bf16.msra.mxu1 %v3843_v13  ;;  %3244 = vmatprep.mubr.msk.bf16.mxu1 %vm3750_vm0, %v3749_v1 }
 0x8a6   :  { %3242 = vmatprep.subr.bf16.mxu1 %v3749_v1 }
 0x8a9   :  { %3243 = vmatpush3.bf16.msra.mxu1 %v3857_v16 }
 0x8aa   :  { %3256 = vmatprep.subr.bf16.mxu1 %v3749_v1 }
 0x96f   :  { %v715_v20 = vpop.f32.mrb[8].mxu0 }
 0x970   :  { %v770_v34 = vrot.slane %v715_v20, 2  ;;  %v3222_v36 = vpop.f32.mrb[9].mxu0 }
 0x971   :  { %v718_v37 = vpop.f32.mrb[10].mxu0 }
 0x972   :  { %v772_v39 = vadd.f32 %v770_v34, %v3909_v43  ;;  %v3223_v40 = vpop.f32.mrb[11].mxu0 }
 0x974   :  { %v3011_v41 = vmul.f32 -1.442695, %v772_v39 }
 0x976   :  { %3536 = vpow2.f32 %v3011_v41 }
 0x977   :  { %v763_v42 = vpop.f32.mrb[20].mxu1 }
 0x978   :  { %v801_v44 = vadd.f32 %v763_v42, %v3916_v51  ;;  %v3230_v46 = vpop.f32.mrb[21].mxu1 }
 0x979   :  { %v766_v47 = vpop.f32.mrb[22].mxu1 }
 0x97a   :  { %v3012_v48 = vmul.f32 -1.442695, %v801_v44  ;;  %v3231_v50 = vpop.f32.mrb[23].mxu1 }
 0x97c   :  { %3538 = vpow2.f32 %v3012_v48 }
 0x97d   :  { %3540 = vtanh.f32 %v772_v39 }
 0x980   :  { %v3537_v52 = vpop.eup %3536 }
 0x981   :  { %v777_v53 = vadd.f32 1.0, %v3537_v52 }
 0x983   :  { %3542 = vrcp.f32 %v777_v53 }
 0x984   :  { %3544 = vtanh.f32 %v801_v44 }
 0x986   :  { %v3539_v54 = vpop.eup %3538 }
 0x987   :  { %v806_v55 = vadd.f32 1.0, %v3539_v54  ;;  %v3541_v43 = vpop.eup %3540 }
 0x989   :  { %3546 = vrcp.f32 %v806_v55 }
 0x98d   :  { %v3543_v56 = vpop.eup %3542 }
 0x98e   :  { %v780_v57 = vsel %vm3919_vm5, %v3541_v43, %v3543_v56  ;;  %v3545_v51 = vpop.eup %3544 }
 0x98f   :  { %786 = vrot.lane.b32.xlu1 %v780_v57, %s3752_s3  ;;  %v784_v4 = vmul.f32 %v782_v2, %v780_v57 }
 0x993   :  { %v3547_v58 = vpop.eup %3546 }
 0x994   :  { %v809_v59 = vsel %vm3919_vm5, %v3545_v51, %v3547_v58 }
 0x995   :  { %815 = vrot.lane.b32.xlu0 %v809_v59, %s3752_s3  ;;  %v813_v12 = vmul.f32 %v811_v11, %v809_v59 }
 0xa01   :  { %v787_v61 = vpop.permute.xlu1 %786 }
 0xa02   :  { %v789_v62 = vmul.f32 %v787_v61, %v780_v57 }
 0xa04   :  { %791 = vrot.lane.b32.xlu1 %v789_v62, %s3753_s20 }
 0xa07   :  { %v816_v63 = vpop.permute.xlu0 %815 }
 0xa08   :  { %v818_v0 = vmul.f32 %v816_v63, %v809_v59 }
 0xa0a   :  { %820 = vrot.lane.b32.xlu0 %v818_v0, %s3753_s20 }
 0xa76   :  { %v792_v5 = vpop.permute.xlu1 %791 }
 0xa77   :  { %v4064_v6 = vadd.f32 %v792_v5, %v784_v4 }
 0xa79   :  { %3548 = vtanh.f32 %v4064_v6  ;;  %v935_v63 = vrot.slane %v4064_v6, 6 }
 0xa7c   :  { %v821_v17 = vpop.permute.xlu0 %820 }
 0xa7d   :  { %v4068_v14 = vadd.f32 %v821_v17, %v813_v12 }
 0xa7f   :  { %3550 = vtanh.f32 %v4068_v14  ;;  %v967_v5 = vrot.slane %v4068_v14, 2 }
 0xa83   :  { %v3549_v21 = vpop.eup %3548 }
 0xa84   :  { %797 = vrot.lane.b32.xlu1 %v3549_v21, %s3752_s3 }
 0xa89   :  { %v3551_v7 = vpop.eup %3550 }
 0xa8a   :  { %826 = vrot.lane.b32.xlu0 %v3551_v7, %s3752_s3 }
 0xaf6   :  { %v798_v8 = vpop.permute.xlu1 %797 }
 0xaf7   :  { %v800_v23 = vmul.f32 %v798_v8, %v780_v57 }
 0xaf9   :  { %v830_v18 = vpack.c.bf16 %v800_v23, %v800_v23  ;;  %v4075_v19 = vsel %vm1465_vm8, %v4031_v26, %v800_v23 }
 0xafb   :  { %v832_v15 = vrot.slane %v830_v18, 3 }
 0xafc   :  { %v827_v27 = vpop.permute.xlu0 %826 }
 0xafd   :  { %v4077_v28 = vmul.f32 %v827_v27, %v809_v59  ;;  %833 = vrot.lane.b32.xlu1 %v832_v15, %s3753_s20 }
 0xaff   :  { %v878_v30 = vpack.c.bf16 %v4077_v28, %v4077_v28 }
 0xb01   :  { %880 = vrot.lane.b32.xlu0 %v878_v30, %s3753_s20 }
 0xb6f   :  { %v834_v31 = vpop.permute.xlu1 %833 }
 0xb70   :  { %3237 = vmatmul.mubr.msk.bf16.vlgmr.msra.gmra.mrb[12].mxu0 %vm202_vm6, %v834_v31 }
 0xb71   :  { %3249 = vmatpush3.bf16.msra.mxu0 %v3824_v9  ;;  %3252 = vmatprep.mubr.msk.bf16.mxu0 %vm3750_vm0, %v3749_v1 }
 0xb72   :  { %3250 = vmatprep.subr.bf16.mxu0 %v3749_v1 }
 0xb73   :  { %v881_v26 = vpop.permute.xlu0 %880 }
 0xb74   :  { %3245 = vmatmul.mubr.msk.bf16.vlgmr.msra.gmra.mrb[24].mxu1 %vm202_vm6, %v881_v26 }
 0xb75   :  { %3251 = vmatpush3.bf16.msra.mxu0 %v3830_v10  ;;  %3257 = vmatpush3.bf16.msra.mxu1 %v3843_v13 }
 0xb76   :  { %3258 = vmatprep.subr.bf16.mxu1 %v3749_v1  ;;  %3260 = vmatprep.mubr.msk.bf16.mxu1 %vm3750_vm0, %v3749_v1 }
 0xb77   :  { %3264 = vmatprep.subr.bf16.mxu0 %v3749_v1 }
 0xb79   :  { %3259 = vmatpush3.bf16.msra.mxu1 %v3857_v16 }
 0xb7a   :  { %3272 = vmatprep.subr.bf16.mxu1 %v3749_v1 }
 0xc43   :  { %v872_v33 = vpop.f32.mrb[12].mxu0 }
 0xc44   :  { %v925_v22 = vadd.f32 %v872_v33, %v3914_v49  ;;  %v3238_v20 = vpop.f32.mrb[13].mxu0 }
 0xc45   :  { %v875_v34 = vpop.f32.mrb[14].mxu0 }
 0xc46   :  { %v3015_v36 = vmul.f32 -1.442695, %v925_v22  ;;  %v3239_v37 = vpop.f32.mrb[15].mxu0 }
 0xc47   :  { %v919_v39 = vpop.f32.mrb[24].mxu1 }
 0xc48   :  { %3552 = vpow2.f32 %v3015_v36  ;;  %v955_v40 = vrot.slane %v919_v39, 2  ;;  %v3246_v41 = vpop.f32.mrb[25].mxu1 }
 0xc49   :  { %v922_v42 = vpop.f32.mrb[26].mxu1 }
 0xc4a   :  { %v957_v44 = vadd.f32 %v955_v40, %v3911_v45  ;;  %v3247_v46 = vpop.f32.mrb[27].mxu1 }
 0xc4c   :  { %v3016_v47 = vmul.f32 -1.442695, %v957_v44 }
 0xc4e   :  { %3554 = vpow2.f32 %v3016_v47 }
 0xc4f   :  { %3556 = vtanh.f32 %v925_v22 }
 0xc52   :  { %v3553_v48 = vpop.eup %3552 }
 0xc53   :  { %v930_v50 = vadd.f32 1.0, %v3553_v48 }
 0xc55   :  { %3558 = vrcp.f32 %v930_v50 }
 0xc56   :  { %3560 = vtanh.f32 %v957_v44 }
 0xc58   :  { %v3555_v52 = vpop.eup %3554 }
 0xc59   :  { %v962_v53 = vadd.f32 1.0, %v3555_v52  ;;  %v3557_v54 = vpop.eup %3556 }
 0xc5b   :  { %3562 = vrcp.f32 %v962_v53 }
 0xc5f   :  { %v3559_v55 = vpop.eup %3558 }
 0xc60   :  { %v933_v43 = vsel %vm3919_vm5, %v3557_v54, %v3559_v55  ;;  %v3561_v56 = vpop.eup %3560 }
 0xc61   :  { %939 = vrot.lane.b32.xlu1 %v933_v43, %s3752_s3  ;;  %v937_v0 = vmul.f32 %v935_v63, %v933_v43 }
 0xc65   :  { %v3563_v57 = vpop.eup %3562 }
 0xc66   :  { %v965_v51 = vsel %vm3919_vm5, %v3561_v56, %v3563_v57 }
 0xc67   :  { %971 = vrot.lane.b32.xlu0 %v965_v51, %s3752_s3  ;;  %v969_v11 = vmul.f32 %v967_v5, %v965_v51 }
 0xcd3   :  { %v940_v58 = vpop.permute.xlu1 %939 }
 0xcd4   :  { %v942_v59 = vmul.f32 %v940_v58, %v933_v43 }
 0xcd6   :  { %944 = vrot.lane.b32.xlu1 %v942_v59, %s3753_s20 }
 0xcd9   :  { %v972_v61 = vpop.permute.xlu0 %971 }
 0xcda   :  { %v974_v62 = vmul.f32 %v972_v61, %v965_v51 }
 0xcdc   :  { %976 = vrot.lane.b32.xlu0 %v974_v62, %s3753_s20 }
 0xd48   :  { %v945_v2 = vpop.permute.xlu1 %944 }
 0xd49   :  { %v4108_v4 = vadd.f32 %v945_v2, %v937_v0 }
 0xd4b   :  { %3564 = vtanh.f32 %v4108_v4  ;;  %v1094_v59 = vrot.slane %v4108_v4, 6 }
 0xd4e   :  { %v977_v12 = vpop.permute.xlu0 %976 }
 0xd4f   :  { %v4112_v17 = vadd.f32 %v977_v12, %v969_v11 }
 0xd51   :  { %3566 = vtanh.f32 %v4112_v17  ;;  %v1126_v0 = vrot.slane %v4112_v17, 2 }
 0xd55   :  { %v3565_v21 = vpop.eup %3564 }
 0xd56   :  { %950 = vrot.lane.b32.xlu1 %v3565_v21, %s3752_s3 }
 0xd5b   :  { %v3567_v7 = vpop.eup %3566 }
 0xd5c   :  { %982 = vrot.lane.b32.xlu0 %v3567_v7, %s3752_s3 }
 0xdc8   :  { %v951_v6 = vpop.permute.xlu1 %950 }
 0xdc9   :  { %v4117_v8 = vmul.f32 %v951_v6, %v933_v43 }
 0xdcb   :  { %v986_v14 = vpack.c.bf16 %v4117_v8, %v4117_v8 }
 0xdcd   :  { %988 = vrot.lane.b32.xlu0 %v986_v14, %s3753_s20 }
 0xdce   :  { %v983_v23 = vpop.permute.xlu0 %982 }
 0xdcf   :  { %v4122_v18 = vmul.f32 %v983_v23, %v965_v51 }
 0xdd1   :  { %v1033_v15 = vpack.c.bf16 %v4122_v18, %v4122_v18 }
 0xdd3   :  { %v1035_v27 = vrot.slane %v1033_v15, 3 }
 0xdd5   :  { %1036 = vrot.lane.b32.xlu1 %v1035_v27, %s3753_s20 }
 0xe3f   :  { %v989_v30 = vpop.permute.xlu0 %988 }
 0xe40   :  { %3253 = vmatmul.mubr.msk.bf16.vlgmr.msra.gmra.mrb[16].mxu0 %vm202_vm6, %v989_v30 }
 0xe41   :  { %3265 = vmatpush3.bf16.msra.mxu0 %v3824_v9  ;;  %3268 = vmatprep.mubr.msk.bf16.mxu0 %vm3750_vm0, %v3749_v1 }
 0xe42   :  { %3266 = vmatprep.subr.bf16.mxu0 %v3749_v1 }
 0xe45   :  { %3267 = vmatpush3.bf16.msra.mxu0 %v3830_v10 }
 0xe46   :  { %3280 = vmatprep.subr.bf16.mxu0 %v3749_v1 }
 0xe47   :  { %v1037_v31 = vpop.permute.xlu1 %1036 }
 0xe48   :  { %3261 = vmatmul.mubr.msk.bf16.vlgmr.msra.gmra.mrb[28].mxu1 %vm202_vm6, %v1037_v31  ;;  %v3744_v31 = vld [vmem:[%s4701_s2] ss:$8 sps:$4 sm:$0xff]  }
 0xe49   :  { %3273 = vmatpush3.bf16.msra.mxu1 %v3843_v13  ;;  %3276 = vmatprep.mubr.msk.bf16.mxu1 %vm3750_vm0, %v3749_v1 }
 0xe4a   :  { %3274 = vmatprep.subr.bf16.mxu1 %v3749_v1 }
 0xe4d   :  { %3275 = vmatpush3.bf16.msra.mxu1 %v3857_v16 }
 0xe4e   :  { %3288 = vmatprep.subr.bf16.mxu1 %v3749_v1 }
 0xf13   :  { %v1027_v9 = vpop.f32.mrb[16].mxu0 }
 0xf14   :  { %v1082_v26 = vrot.slane %v1027_v9, 6  ;;  %v3254_v33 = vpop.f32.mrb[17].mxu0  ;;  %v3745_v9 = vld [vmem:[%s4701_s2 + $0x10] ss:$8 sps:$4 sm:$0xff]  }
 0xf15   :  { %v1030_v10 = vpop.f32.mrb[18].mxu0  ;;  %v3746_v33 = vld [vmem:[%s4701_s2 + $0x4] ss:$8 sps:$4 sm:$0xff]  }
 0xf16   :  { %v1084_v22 = vadd.f32 %v1082_v26, %v3914_v49  ;;  %v3255_v20 = vpop.f32.mrb[19].mxu0 }
 0xf18   :  { %v3019_v34 = vmul.f32 -1.442695, %v1084_v22 }
 0xf1a   :  { %3568 = vpow2.f32 %v3019_v34 }
 0xf1b   :  { %v1075_v36 = vpop.f32.mrb[28].mxu1 }
 0xf1c   :  { %v1114_v13 = vrot.slane %v1075_v36, 4  ;;  %v3262_v37 = vpop.f32.mrb[29].mxu1 }
 0xf1d   :  { %v1078_v39 = vpop.f32.mrb[30].mxu1 }
 0xf1e   :  { %v1116_v40 = vadd.f32 %v1114_v13, %v3911_v45  ;;  %v3263_v41 = vpop.f32.mrb[31].mxu1 }
 0xf20   :  { %v3020_v42 = vmul.f32 -1.442695, %v1116_v40 }
 0xf22   :  { %3570 = vpow2.f32 %v3020_v42 }
 0xf23   :  { %3572 = vtanh.f32 %v1084_v22 }
 0xf24   :  { %v3569_v44 = vpop.eup %3568 }
 0xf25   :  { %v1089_v46 = vadd.f32 1.0, %v3569_v44 }
 0xf27   :  { %3574 = vrcp.f32 %v1089_v46 }
 0xf28   :  { %3576 = vtanh.f32 %v1116_v40 }
 0xf2c   :  { %v3571_v47 = vpop.eup %3570 }
 0xf2d   :  { %v1121_v48 = vadd.f32 1.0, %v3571_v47  ;;  %v3573_v50 = vpop.eup %3572 }
 0xf2f   :  { %3578 = vrcp.f32 %v1121_v48 }
 0xf31   :  { %v3575_v52 = vpop.eup %3574 }
 0xf32   :  { %v1092_v53 = vsel %vm3919_vm5, %v3573_v50, %v3575_v52  ;;  %v3577_v54 = vpop.eup %3576 }
 0xf33   :  { %1098 = vrot.lane.b32.xlu0 %v1092_v53, %s3752_s3  ;;  %v1096_v61 = vmul.f32 %v1094_v59, %v1092_v53 }
 0xf39   :  { %v3579_v55 = vpop.eup %3578 }
 0xf3a   :  { %v1124_v43 = vsel %vm3919_vm5, %v3577_v54, %v3579_v55 }
 0xf3b   :  { %1130 = vrot.lane.b32.xlu1 %v1124_v43, %s3752_s3  ;;  %v1128_v2 = vmul.f32 %v1126_v0, %v1124_v43 }
 0xfa5   :  { %v1099_v56 = vpop.permute.xlu0 %1098 }
 0xfa6   :  { %v1101_v57 = vmul.f32 %v1099_v56, %v1092_v53 }
 0xfa8   :  { %1103 = vrot.lane.b32.xlu0 %v1101_v57, %s3753_s20 }
 0xfad   :  { %v1131_v51 = vpop.permute.xlu1 %1130 }
 0xfae   :  { %v1133_v58 = vmul.f32 %v1131_v51, %v1124_v43 }
 0xfb0   :  { %1135 = vrot.lane.b32.xlu1 %v1133_v58, %s3753_s20 }
0x101a   :  { %v1104_v62 = vpop.permute.xlu0 %1103 }
0x101b   :  { %v4152_v63 = vadd.f32 %v1104_v62, %v1096_v61 }
0x101d   :  { %3580 = vtanh.f32 %v4152_v63  ;;  %v1254_v62 = vrot.slane %v4152_v63, 6 }
0x1022   :  { %v1136_v5 = vpop.permute.xlu1 %1135 }
0x1023   :  { %v4156_v11 = vadd.f32 %v1136_v5, %v1128_v2 }
0x1025   :  { %3582 = vtanh.f32 %v4156_v11 }
0x1027   :  { %v3581_v12 = vpop.eup %3580 }
0x1028   :  { %1109 = vrot.lane.b32.xlu0 %v3581_v12, %s3752_s3  ;;  %v1286_v12 = vrot.slane %v4156_v11, 2 }
0x102f   :  { %v3583_v21 = vpop.eup %3582 }
0x1030   :  { %1141 = vrot.lane.b32.xlu1 %v3583_v21, %s3752_s3 }
0x109a   :  { %v1110_v4 = vpop.permute.xlu0 %1109 }
0x109b   :  { %v4161_v7 = vmul.f32 %v1110_v4, %v1092_v53 }
0x109d   :  { %v1145_v6 = vpack.c.bf16 %v4161_v7, %v4161_v7 }
0x109f   :  { %v1147_v14 = vrot.slane %v1145_v6, 1 }
0x10a1   :  { %1148 = vrot.lane.b32.xlu0 %v1147_v14, %s3753_s20 }
0x10a2   :  { %v1142_v17 = vpop.permute.xlu1 %1141 }
0x10a3   :  { %v4166_v23 = vmul.f32 %v1142_v17, %v1124_v43 }
0x10a5   :  { %v1193_v15 = vpack.c.bf16 %v4166_v23, %v4166_v23 }
0x10a7   :  { %v1195_v27 = vrot.slane %v1193_v15, 2 }
0x10a9   :  { %1196 = vrot.lane.b32.xlu1 %v1195_v27, %s3753_s20  ;;  %v1467_v27 = vsel %vm1462_vm7, %v4117_v8, %v4161_v7 }
0x1113   :  { %v1149_v30 = vpop.permute.xlu0 %1148 }
0x1114   :  { %3269 = vmatmul.mubr.msk.bf16.vlgmr.msra.gmra.mrb[20].mxu0 %vm202_vm6, %v1149_v30 }
0x1115   :  { %3281 = vmatpush3.bf16.msra.mxu0 %v3744_v31  ;;  %3284 = vmatprep.mubr.msk.bf16.mxu0 %vm3750_vm0, %v3749_v1 }
0x1116   :  { %3282 = vmatprep.subr.bf16.mxu0 %v3749_v1 }
0x1119   :  { %3283 = vmatpush3.bf16.msra.mxu0 %v3745_v9 }
0x111b   :  { %v1197_v26 = vpop.permute.xlu1 %1196 }
0x111c   :  { %3277 = vmatmul.mubr.msk.bf16.vlgmr.msra.gmra.mrb[32].mxu1 %vm202_vm6, %v1197_v26 }
0x111d   :  { %3289 = vmatpush3.bf16.msra.mxu1 %v3746_v33  ;;  %3292 = vmatprep.mubr.msk.bf16.mxu1 %vm3750_vm0, %v3749_v1 }
0x111e   :  { %3290 = vmatprep.subr.bf16.mxu1 %v3749_v1 }
0x1121   :  { %3291 = vmatpush3.bf16.msra.mxu1 %v3857_v16 }
0x1122   :  { %3296 = vmatprep.subr.bf16.mxu1 %v3749_v1 }
0x11e7   :  { %v1187_v10 = vpop.f32.mrb[20].mxu0 }
0x11e8   :  { %v1242_v22 = vrot.slane %v1187_v10, 4  ;;  %v3270_v20 = vpop.f32.mrb[21].mxu0 }
0x11e9   :  { %v1190_v34 = vpop.f32.mrb[22].mxu0 }
0x11ea   :  { %v1244_v36 = vadd.f32 %v1242_v22, %v3914_v49  ;;  %v3271_v13 = vpop.f32.mrb[23].mxu0 }
0x11ec   :  { %v3023_v37 = vmul.f32 -1.442695, %v1244_v36 }
0x11ee   :  { %3584 = vpow2.f32 %v3023_v37 }
0x11ef   :  { %v1235_v39 = vpop.f32.mrb[32].mxu1 }
0x11f0   :  { %v1274_v40 = vrot.slane %v1235_v39, 6  ;;  %v3278_v41 = vpop.f32.mrb[33].mxu1 }
0x11f1   :  { %v1238_v42 = vpop.f32.mrb[34].mxu1 }
0x11f2   :  { %v1276_v44 = vadd.f32 %v1274_v40, %v3911_v45  ;;  %v3279_v46 = vpop.f32.mrb[35].mxu1 }
0x11f4   :  { %v3024_v47 = vmul.f32 -1.442695, %v1276_v44 }
0x11f6   :  { %3586 = vpow2.f32 %v3024_v47 }
0x11f7   :  { %3588 = vtanh.f32 %v1244_v36 }
0x11f8   :  { %v3585_v16 = vpop.eup %3584 }
0x11f9   :  { %v1249_v48 = vadd.f32 1.0, %v3585_v16 }
0x11fb   :  { %3590 = vrcp.f32 %v1249_v48 }
0x11fc   :  { %3592 = vtanh.f32 %v1276_v44 }
0x1200   :  { %v3587_v50 = vpop.eup %3586 }
0x1201   :  { %v1281_v52 = vadd.f32 1.0, %v3587_v50  ;;  %v3589_v53 = vpop.eup %3588 }
0x1203   :  { %3594 = vrcp.f32 %v1281_v52 }
0x1205   :  { %v3591_v54 = vpop.eup %3590 }
0x1206   :  { %v1252_v55 = vsel %vm3919_vm5, %v3589_v53, %v3591_v54  ;;  %v3593_v43 = vpop.eup %3592 }
0x1207   :  { %1258 = vrot.lane.b32.xlu0 %v1252_v55, %s3752_s3  ;;  %v1256_v0 = vmul.f32 %v1254_v62, %v1252_v55 }
0x120d   :  { %v3595_v56 = vpop.eup %3594 }
0x120e   :  { %v1284_v57 = vsel %vm3919_vm5, %v3593_v43, %v3595_v56 }
0x120f   :  { %1290 = vrot.lane.b32.xlu1 %v1284_v57, %s3752_s3  ;;  %v1288_v21 = vmul.f32 %v1286_v12, %v1284_v57 }
0x1279   :  { %v1259_v51 = vpop.permute.xlu0 %1258 }
0x127a   :  { %v1261_v58 = vmul.f32 %v1259_v51, %v1252_v55 }
0x127c   :  { %1263 = vrot.lane.b32.xlu0 %v1261_v58, %s3753_s20 }
0x1281   :  { %v1291_v59 = vpop.permute.xlu1 %1290 }
0x1282   :  { %v1293_v61 = vmul.f32 %v1291_v59, %v1284_v57 }
0x1284   :  { %1295 = vrot.lane.b32.xlu1 %v1293_v61, %s3753_s20 }
0x12ee   :  { %v1264_v2 = vpop.permute.xlu0 %1263 }
0x12ef   :  { %v4201_v5 = vadd.f32 %v1264_v2, %v1256_v0 }
0x12f1   :  { %3596 = vtanh.f32 %v4201_v5  ;;  %v1414_v59 = vrot.slane %v4201_v5, 6  ;;  %v3472_v5 = vld [vmem:[%s4704_s4 + $0x4] ss:$8 sps:$4 sm:$0xff]  }
0x12f2   :  { %1559 = vmatprep.subr.bf16.mxu0 %v3472_v5 }
0x12f6   :  { %v1296_v4 = vpop.permute.xlu1 %1295 }
0x12f7   :  { %v4205_v6 = vadd.f32 %v1296_v4, %v1288_v21 }
0x12f9   :  { %3598 = vtanh.f32 %v4205_v6  ;;  %v1443_v2 = vrot.slane %v4205_v6, 2  ;;  %v4254_v6 = vld [vmem:[%s4705_s5] ss:$8 sps:$4 sm:$0xff]  }
0x12fb   :  { %v3597_v14 = vpop.eup %3596 }
0x12fc   :  { %1269 = vrot.lane.b32.xlu0 %v3597_v14, %s3752_s3 }
0x1303   :  { %v3599_v17 = vpop.eup %3598 }
0x1304   :  { %1301 = vrot.lane.b32.xlu1 %v3599_v17, %s3752_s3  ;;  %v3470_v17 = vld [vmem:[%s4704_s4] ss:$8 sps:$4 sm:$0xff]  }
0x136e   :  { %v1270_v63 = vpop.permute.xlu0 %1269 }
0x136f   :  { %v1272_v15 = vmul.f32 %v1270_v63, %v1252_v55 }
0x1371   :  { %v1305_v30 = vpack.c.bf16 %v1272_v15, %v1272_v15  ;;  %v4214_v11 = vsel %vm136_vm1, %v1467_v27, %v1272_v15  ;;  %v3477_v15 = vld [vmem:[%s4704_s4 + $0x14] ss:$8 sps:$4 sm:$0xff]   ;;  %v3475_v27 = vld [vmem:[%s4704_s4 + $0x10] ss:$8 sps:$4 sm:$0xff]  }
0x1373   :  { %v1307_v31 = vrot.slane %v1305_v30, 2  ;;  %v4268_v30 = vld [vmem:[%s4705_s5 + $0x10] ss:$8 sps:$4 sm:$0xff]  }
0x1375   :  { %1308 = vrot.lane.b32.xlu0 %v1307_v31, %s3753_s20  ;;  %v3482_v31 = vld [vmem:[%s4704_s4 + $0x24] ss:$8 sps:$4 sm:$0xff]  }
0x1376   :  { %v1302_v9 = vpop.permute.xlu1 %1301 }
0x1377   :  { %v4217_v26 = vmul.f32 %v1302_v9, %v1284_v57  ;;  %v3480_v9 = vld [vmem:[%s4704_s4 + $0x20] ss:$8 sps:$4 sm:$0xff]  }
0x1379   :  { %v1353_v33 = vpack.c.bf16 %v4217_v26, %v4217_v26 }
0x137b   :  { %v1355_v10 = vrot.slane %v1353_v33, 1  ;;  %v4280_v33 = vld [vmem:[%s4705_s5 + $0x4] ss:$8 sps:$4 sm:$0xff]  }
0x137d   :  { %1356 = vrot.lane.b32.xlu1 %v1355_v10, %s3753_s20 }
0x13e7   :  { %v1309_v22 = vpop.permute.xlu0 %1308 }
0x13e8   :  { %3285 = vmatmul.mubr.msk.bf16.vlgmr.msra.gmra.mrb[24].mxu0 %vm202_vm6, %v1309_v22  ;;  %v3486_v22 = vld [vmem:[%s4704_s4 + $0x34] ss:$8 sps:$4 sm:$0xff]  }
0x13e9   :  { %1591 = vmatprep.mubr.bf16.mxu0 %v3751_v3  ;;  %1560 = vmatpush1.bf16.msra.mxu0 %v3470_v17 }
0x13ea   :  { %1561 = vmatprep.subr.bf16.mxu0 %v3477_v15 }
0x13ed   :  { %1562 = vmatpush1.bf16.msra.mxu0 %v3475_v27 }
0x13ee   :  { %1563 = vmatprep.subr.bf16.mxu0 %v3482_v31 }
0x13ef   :  { %v1357_v8 = vpop.permute.xlu1 %1356 }
0x13f0   :  { %3293 = vmatmul.mubr.msk.bf16.vlgmr.msra.gmra.mrb[36].mxu1 %vm202_vm6, %v1357_v8 }
0x13f1   :  { %3300 = vmatprep.mubr.msk.bf16.mxu1 %vm3750_vm0, %v3749_v1  ;;  %3297 = vmatpush3.bf16.msra.mxu1 %v4254_v6 }
0x13f2   :  { %3298 = vmatprep.subr.bf16.mxu1 %v3749_v1  ;;  %1564 = vmatpush1.bf16.msra.mxu0 %v3480_v9 }
0x13f3   :  { %1565 = vmatprep.subr.bf16.mxu0 %v3486_v22 }
0x13f5   :  { %3299 = vmatpush3.bf16.msra.mxu1 %v4268_v30 }
0x13f6   :  { %3304 = vmatprep.subr.bf16.mxu1 %v3749_v1 }
0x13f8   :  { %3301 = vmatmul.mubr.bf16.vlgmr.msra.gmra.mrb[40].mxu1 %v3751_v3 }
0x13f9   :  { %3305 = vmatpush3.bf16.msra.mxu1 %v4280_v33  ;;  %3308 = vmatprep.mubr.msk.bf16.mxu1 %vm3750_vm0, %v3749_v1 }
0x13fa   :  { %3306 = vmatprep.subr.bf16.mxu1 %v3749_v1 }
0x14bb   :  { %v1347_v7 = vpop.f32.mrb[24].mxu0 }
0x14bc   :  { %v1402_v20 = vrot.slane %v1347_v7, 2  ;;  %v3286_v34 = vpop.f32.mrb[25].mxu0  ;;  %v3484_v7 = vld [vmem:[%s4704_s4 + $0x30] ss:$8 sps:$4 sm:$0xff]  }
0x14bd   :  { %v1350_v36 = vpop.f32.mrb[26].mxu0  ;;  %1566 = vmatpush1.bf16.msra.mxu0 %v3484_v7 }
0x14be   :  { %v1404_v13 = vadd.f32 %v1402_v20, %v3914_v49  ;;  %v3287_v37 = vpop.f32.mrb[27].mxu0  ;;  %v4297_v20 = vld [vmem:[%s4705_s5 + $0x14] ss:$8 sps:$4 sm:$0xff]   ;;  %3312 = vmatprep.subr.bf16.mxu0 %v3749_v1 }
0x14bf   :  { %3307 = vmatpush3.bf16.msra.mxu1 %v4297_v20 }
0x14c0   :  { %v3027_v39 = vmul.f32 -1.442695, %v1404_v13  ;;  %3320 = vmatprep.subr.bf16.mxu1 %v3749_v1 }
0x14c2   :  { %3600 = vpow2.f32 %v3027_v39  ;;  %3309 = vmatmul.mubr.bf16.vlgmr.msra.gmra.mrb[44].mxu1 %v3751_v3 }
0x14c3   :  { %v1395_v40 = vpop.f32.mrb[36].mxu1  ;;  %3321 = vmatpush3.bf16.msra.mxu1 %v4280_v33  ;;  %3324 = vmatprep.mubr.msk.bf16.mxu1 %vm3750_vm0, %v3749_v1 }
0x14c4   :  { %v1433_v41 = vadd.f32 %v1395_v40, %v3911_v45  ;;  %v3294_v42 = vpop.f32.mrb[37].mxu1  ;;  %3322 = vmatprep.subr.bf16.mxu1 %v3749_v1 }
0x14c5   :  { %v1398_v44 = vpop.f32.mrb[38].mxu1 }
0x14c6   :  { %v3028_v46 = vmul.f32 -1.442695, %v1433_v41  ;;  %v3295_v47 = vpop.f32.mrb[39].mxu1 }
0x14c7   :  { %3323 = vmatpush3.bf16.msra.mxu1 %v4297_v20 }
0x14c8   :  { %3602 = vpow2.f32 %v3028_v46  ;;  %3336 = vmatprep.subr.bf16.mxu1 %v3749_v1 }
0x14c9   :  { %3604 = vtanh.f32 %v1404_v13  ;;  %v1473_v13 = vsel %vm1462_vm7, %v4077_v28, %v4034_v29 }
0x14cc   :  { %v3601_v16 = vpop.eup %3600 }
0x14cd   :  { %v1409_v48 = vadd.f32 1.0, %v3601_v16 }
0x14cf   :  { %3606 = vrcp.f32 %v1409_v48 }
0x14d0   :  { %3608 = vtanh.f32 %v1433_v41 }
0x14d2   :  { %v3603_v50 = vpop.eup %3602 }
0x14d3   :  { %v1438_v52 = vadd.f32 1.0, %v3603_v50  ;;  %v3605_v49 = vpop.eup %3604 }
0x14d5   :  { %3610 = vrcp.f32 %v1438_v52 }
0x14d9   :  { %v3607_v53 = vpop.eup %3606 }
0x14da   :  { %v1412_v54 = vsel %vm3919_vm5, %v3605_v49, %v3607_v53  ;;  %v3609_v45 = vpop.eup %3608 }
0x14db   :  { %1418 = vrot.lane.b32.xlu1 %v1412_v54, %s3752_s3  ;;  %v1416_v61 = vmul.f32 %v1414_v59, %v1412_v54 }
0x14df   :  { %v3611_v55 = vpop.eup %3610 }
0x14e0   :  { %v4234_v43 = vsel %vm3919_vm5, %v3609_v45, %v3611_v55  ;;  %v1503_v45 = vld [vmem:[%s4706_s6] sm:$0x3] }
0x14e1   :  { %1447 = vrot.lane.b32.xlu0 %v4234_v43, %s3752_s3  ;;  %v1445_v12 = vmul.f32 %v1443_v2, %v4234_v43  ;;  %v1508_v55 = vrot.slane %v1503_v45, %v49_v35 }
0x154d   :  { %v1419_v56 = vpop.permute.xlu1 %1418 }
0x154e   :  { %v1421_v57 = vmul.f32 %v1419_v56, %v1412_v54 }
0x1550   :  { %1423 = vrot.lane.b32.xlu1 %v1421_v57, %s3753_s20 }
0x1553   :  { %v1448_v51 = vpop.permute.xlu0 %1447 }
0x1554   :  { %v1450_v58 = vmul.f32 %v1448_v51, %v4234_v43 }
0x1556   :  { %1452 = vrot.lane.b32.xlu0 %v1450_v58, %s3753_s20 }
0x15c2   :  { %v1424_v62 = vpop.permute.xlu1 %1423 }
0x15c3   :  { %v1426_v0 = vadd.f32 %v1424_v62, %v1416_v61 }
0x15c5   :  { %3612 = vtanh.f32 %v1426_v0 }
0x15c8   :  { %v1453_v21 = vpop.permute.xlu0 %1452 }
0x15c9   :  { %v1455_v4 = vadd.f32 %v1453_v21, %v1445_v12 }
0x15cb   :  { %3614 = vtanh.f32 %v1455_v4 }
0x15cf   :  { %v3613_v14 = vpop.eup %3612 }
0x15d0   :  { %1429 = vrot.lane.b32.xlu1 %v3613_v14, %s3752_s3 }
0x15d5   :  { %v3615_v63 = vpop.eup %3614 }
0x15d6   :  { %1458 = vrot.lane.b32.xlu0 %v3615_v63, %s3752_s3 }
0x1642   :  { %v1430_v10 = vpop.permute.xlu1 %1429 }
0x1643   :  { %v1432_v8 = vmul.f32 %v1430_v10, %v1412_v54 }
0x1645   :  { %v1469_v34 = vsel %vm1465_vm8, %v4214_v11, %v1432_v8 }
0x1646   :  { %v3431_v36 = vpack.i.bf16 %v1469_v34, %v4075_v19  ;;  %v1474_v19 = vsel %vm136_vm1, %v1473_v13, %v3988_v24 }
0x1647   :  { %v1475_v39 = vsel %vm1465_vm8, %v1474_v19, %v3943_v25  ;;  %v1652_v25 = vpop.f32.mrb[40].mxu1 }
0x1648   :  { %3432 = vrot.lane.b32.xlu0 %v3431_v36, %s3753_s20  ;;  %v1459_v37 = vpop.permute.xlu0 %1458  ;;  %v3302_v16 = vpop.f32.mrb[41].mxu1 }
0x1649   :  { %v1461_v11 = vmul.f32 %v1459_v37, %v4234_v43  ;;  %v1655_v48 = vpop.f32.mrb[42].mxu1  ;;  %v1512_v43 = vrot.slane %v1503_v45, %v53_v38 }
0x164a   :  { %v3303_v50 = vpop.f32.mrb[43].mxu1 }
0x164b   :  { %v1470_v29 = vsel %vm1462_vm7, %v1461_v11, %v4217_v26  ;;  %v1700_v52 = vpop.f32.mrb[44].mxu1 }
0x164c   :  { %v1471_v28 = vsel %vm136_vm1, %v1470_v29, %v4166_v23  ;;  %v3310_v49 = vpop.f32.mrb[45].mxu1  ;;  %v1733_v58 = vrot.slane %v1700_v52, 2 }
0x164d   :  { %v1472_v3 = vsel %vm1465_vm8, %v1471_v28, %v4122_v18  ;;  %v1703_v53 = vpop.f32.mrb[46].mxu1 }
0x164e   :  { %v3436_v40 = vpack.i.bf16 %v1475_v39, %v1472_v3  ;;  %v3311_v54 = vpop.f32.mrb[47].mxu1 }
0x1650   :  { %3437 = vrot.lane.b32.xlu1 %v3436_v40, %s3752_s3 }
0x16ba   :  { %v3433_v24 = vpop.permute.xlu0 %3432 }
0x16bb   :  { %v3435_v42 = vunpack.i.h.bf16 %v3433_v24  ;;  %v3434_v26 = vunpack.i.l.bf16 %v3433_v24 }
0x16c2   :  { %v3438_v41 = vpop.permute.xlu1 %3437 }
0x16c3   :  { %v3440_v44 = vunpack.i.h.bf16 %v3438_v41  ;;  %v3439_v46 = vunpack.i.l.bf16 %v3438_v41 }
0x16c5   :  { %v1492_v23 = vsel %vm202_vm6, %v3434_v26, %v3439_v46  ;;  %v1493_v18 = vsel %vm202_vm6, %v3435_v42, %v3440_v44 }
0x16c6   :  { %v1494_v47 = vpack.c.bf16 %v1493_v18, %v1492_v23 }
0x16c8   :  { %3037 = vmatmul.mubr.msk.bf16.vlgmr.msra.gmra.mrb[28].mxu0 %vm1555_vm9, %v1494_v47 }
0x16c9   :  { %3313 = vmatpush3.bf16.msra.mxu0 %v4254_v6  ;;  %3316 = vmatprep.mubr.msk.bf16.mxu0 %vm3750_vm0, %v3749_v1 }
0x16ca   :  { %3314 = vmatprep.subr.bf16.mxu0 %v3749_v1 }
0x16cd   :  { %3315 = vmatpush3.bf16.msra.mxu0 %v4268_v30 }
0x16ce   :  { %3328 = vmatprep.subr.bf16.mxu0 %v3749_v1 }
0x179b   :  { %v1593_v56 = vpop.f32.mrb[28].mxu0 }
0x179c   :  { %v4344_v57 = vadd.f32 %v1593_v56, %v1508_v55  ;;  %v1595_v51 = vpop.f32.mrb[29].mxu0 }
0x179d   :  { %v4346_v59 = vadd.f32 %v1595_v51, %v1512_v43  ;;  %v1597_v61 = vpop.f32.mrb[30].mxu0 }
0x179e   :  { %v1706_v62 = vadd.f32 %v1652_v25, %v4344_v57  ;;  %v4349_v0 = vadd.f32 %v1597_v61, %v1508_v55  ;;  %v1599_v2 = vpop.f32.mrb[31].mxu0 }
0x179f   :  { %v4351_v12 = vadd.f32 %v1599_v2, %v1512_v43 }
0x17a0   :  { %v3042_v21 = vmul.f32 -1.442695, %v1706_v62 }
0x17a1   :  { %v1735_v35 = vadd.f32 %v1733_v58, %v4351_v12 }
0x17a2   :  { %3616 = vpow2.f32 %v3042_v21 }
0x17a3   :  { %v3043_v38 = vmul.f32 -1.442695, %v1735_v35 }
0x17a5   :  { %3618 = vpow2.f32 %v3043_v38 }
0x17a6   :  { %3620 = vtanh.f32 %v1706_v62 }
0x17ac   :  { %v3617_v4 = vpop.eup %3616 }
0x17ad   :  { %v1711_v14 = vadd.f32 1.0, %v3617_v4 }
0x17af   :  { %v3619_v17 = vpop.eup %3618  ;;  %3622 = vrcp.f32 %v1711_v14 }
0x17b0   :  { %v1740_v5 = vadd.f32 1.0, %v3619_v17  ;;  %3624 = vtanh.f32 %v1735_v35  ;;  %v3621_v63 = vpop.eup %3620 }
0x17b2   :  { %3626 = vrcp.f32 %v1740_v5 }
0x17b9   :  { %v3623_v15 = vpop.eup %3622 }
0x17ba   :  { %v1714_v27 = vsel %vm3919_vm5, %v3621_v63, %v3623_v15  ;;  %v3625_v31 = vpop.eup %3624 }
0x17bb   :  { %1717 = vrot.lane.b32.xlu0 %v1714_v27, %s3752_s3  ;;  %v1715_v36 = vmul.f32 0.0, %v1714_v27 }
0x17bc   :  { %v3627_v9 = vpop.eup %3626 }
0x17bd   :  { %v1743_v10 = vsel %vm3919_vm5, %v3625_v31, %v3627_v9 }
0x17be   :  { %1746 = vrot.lane.b32.xlu1 %v1743_v10, %s3752_s3  ;;  %v1744_v11 = vmul.f32 0.0, %v1743_v10 }
0x182d   :  { %v1718_v22 = vpop.permute.xlu0 %1717 }
0x182e   :  { %v1720_v8 = vmul.f32 %v1718_v22, %v1714_v27 }
0x1830   :  { %1722 = vrot.lane.b32.xlu0 %v1720_v8, %s3753_s20  ;;  %v1747_v7 = vpop.permute.xlu1 %1746 }
0x1831   :  { %v1749_v34 = vmul.f32 %v1747_v7, %v1743_v10 }
0x1833   :  { %1751 = vrot.lane.b32.xlu1 %v1749_v34, %s3753_s20 }
0x18a2   :  { %v1723_v13 = vpop.permute.xlu0 %1722 }
0x18a3   :  { %v4362_v37 = vadd.f32 %v1723_v13, %v1715_v36 }
0x18a5   :  { %3628 = vtanh.f32 %v4362_v37  ;;  %v1752_v19 = vpop.permute.xlu1 %1751 }
0x18a6   :  { %v4365_v29 = vadd.f32 %v1752_v19, %v1744_v11 }
0x18a8   :  { %3630 = vtanh.f32 %v4365_v29  ;;  %v1901_v22 = vrot.slane %v4365_v29, 2 }
0x18af   :  { %v3629_v28 = vpop.eup %3628 }
0x18b0   :  { %1728 = vrot.lane.b32.xlu0 %v3629_v28, %s3752_s3 }
0x18b2   :  { %v3631_v3 = vpop.eup %3630 }
0x18b3   :  { %1757 = vrot.lane.b32.xlu1 %v3631_v3, %s3752_s3 }
0x1922   :  { %v1729_v39 = vpop.permute.xlu0 %1728 }
0x1923   :  { %v4370_v40 = vmul.f32 %v1729_v39, %v1714_v27  ;;  %v1869_v27 = vrot.slane %v4362_v37, 6 }
0x1925   :  { %v1761_v24 = vpack.c.bf16 %v4370_v40, %v4370_v40  ;;  %v1758_v41 = vpop.permute.xlu1 %1757 }
0x1926   :  { %v4374_v42 = vmul.f32 %v1758_v41, %v1743_v10 }
0x1927   :  { %1763 = vrot.lane.b32.xlu0 %v1761_v24, %s3753_s20 }
0x1928   :  { %v1808_v26 = vpack.c.bf16 %v4374_v42, %v4374_v42 }
0x192a   :  { %v1810_v44 = vrot.slane %v1808_v26, 3 }
0x192c   :  { %1811 = vrot.lane.b32.xlu1 %v1810_v44, %s3753_s20 }
0x1999   :  { %v1764_v46 = vpop.permute.xlu0 %1763 }
0x199a   :  { %3317 = vmatmul.mubr.msk.bf16.vlgmr.msra.gmra.mrb[32].mxu0 %vm202_vm6, %v1764_v46 }
0x199b   :  { %3329 = vmatpush3.bf16.msra.mxu0 %v4254_v6  ;;  %3332 = vmatprep.mubr.msk.bf16.mxu0 %vm3750_vm0, %v3749_v1 }
0x199c   :  { %3330 = vmatprep.subr.bf16.mxu0 %v3749_v1 }
0x199e   :  { %v1812_v23 = vpop.permute.xlu1 %1811 }
0x199f   :  { %3325 = vmatmul.mubr.msk.bf16.vlgmr.msra.gmra.mrb[48].mxu1 %vm202_vm6, %v1812_v23  ;;  %3331 = vmatpush3.bf16.msra.mxu0 %v4268_v30 }
0x19a0   :  { %3337 = vmatpush3.bf16.msra.mxu1 %v4280_v33  ;;  %3340 = vmatprep.mubr.msk.bf16.mxu1 %vm3750_vm0, %v3749_v1 }
0x19a1   :  { %3338 = vmatprep.subr.bf16.mxu1 %v3749_v1  ;;  %3344 = vmatprep.subr.bf16.mxu0 %v3749_v1 }
0x19a4   :  { %3339 = vmatpush3.bf16.msra.mxu1 %v4297_v20 }
0x19a5   :  { %3352 = vmatprep.subr.bf16.mxu1 %v3749_v1 }
0x1a6d   :  { %v1802_v18 = vpop.f32.mrb[32].mxu0 }
0x1a6e   :  { %v1857_v47 = vrot.slane %v1802_v18, 6  ;;  %v3318_v25 = vpop.f32.mrb[33].mxu0 }
0x1a6f   :  { %v1805_v16 = vpop.f32.mrb[34].mxu0 }
0x1a70   :  { %v1859_v48 = vadd.f32 %v1857_v47, %v4344_v57  ;;  %v3319_v50 = vpop.f32.mrb[35].mxu0 }
0x1a72   :  { %v3046_v52 = vmul.f32 -1.442695, %v1859_v48  ;;  %v1850_v49 = vpop.f32.mrb[48].mxu1 }
0x1a73   :  { %v1889_v53 = vrot.slane %v1850_v49, 4  ;;  %v3326_v54 = vpop.f32.mrb[49].mxu1 }
0x1a74   :  { %3632 = vpow2.f32 %v3046_v52  ;;  %v1853_v45 = vpop.f32.mrb[50].mxu1 }
0x1a75   :  { %v1891_v55 = vadd.f32 %v1889_v53, %v4351_v12  ;;  %v3327_v43 = vpop.f32.mrb[51].mxu1 }
0x1a77   :  { %v3047_v56 = vmul.f32 -1.442695, %v1891_v55 }
0x1a79   :  { %3634 = vpow2.f32 %v3047_v56 }
0x1a7a   :  { %3636 = vtanh.f32 %v1859_v48 }
0x1a7e   :  { %v3633_v51 = vpop.eup %3632 }
0x1a7f   :  { %v1864_v58 = vadd.f32 1.0, %v3633_v51 }
0x1a81   :  { %3638 = vrcp.f32 %v1864_v58 }
0x1a82   :  { %3640 = vtanh.f32 %v1891_v55 }
0x1a83   :  { %v3635_v61 = vpop.eup %3634 }
0x1a84   :  { %v1896_v62 = vadd.f32 1.0, %v3635_v61  ;;  %v3637_v2 = vpop.eup %3636 }
0x1a86   :  { %3642 = vrcp.f32 %v1896_v62 }
0x1a8b   :  { %v3639_v21 = vpop.eup %3638 }
0x1a8c   :  { %v1867_v35 = vsel %vm3919_vm5, %v3637_v2, %v3639_v21  ;;  %v3641_v38 = vpop.eup %3640 }
0x1a8d   :  { %1873 = vrot.lane.b32.xlu0 %v1867_v35, %s3752_s3  ;;  %v1871_v31 = vmul.f32 %v1869_v27, %v1867_v35 }
0x1a90   :  { %v3643_v4 = vpop.eup %3642 }
0x1a91   :  { %v1899_v14 = vsel %vm3919_vm5, %v3641_v38, %v3643_v4 }
0x1a92   :  { %1905 = vrot.lane.b32.xlu1 %v1899_v14, %s3752_s3  ;;  %v1903_v8 = vmul.f32 %v1901_v22, %v1899_v14 }
0x1aff   :  { %v1874_v17 = vpop.permute.xlu0 %1873 }
0x1b00   :  { %v1876_v5 = vmul.f32 %v1874_v17, %v1867_v35 }
0x1b02   :  { %1878 = vrot.lane.b32.xlu0 %v1876_v5, %s3753_s20 }
0x1b04   :  { %v1906_v63 = vpop.permute.xlu1 %1905 }
0x1b05   :  { %v1908_v15 = vmul.f32 %v1906_v63, %v1899_v14 }
0x1b07   :  { %1910 = vrot.lane.b32.xlu1 %v1908_v15, %s3753_s20 }
0x1b74   :  { %v1879_v9 = vpop.permute.xlu0 %1878 }
0x1b75   :  { %v4405_v10 = vadd.f32 %v1879_v9, %v1871_v31 }
0x1b77   :  { %3644 = vtanh.f32 %v4405_v10  ;;  %v2029_v5 = vrot.slane %v4405_v10, 6 }
0x1b79   :  { %v1911_v7 = vpop.permute.xlu1 %1910 }
0x1b7a   :  { %v4409_v34 = vadd.f32 %v1911_v7, %v1903_v8 }
0x1b7c   :  { %3646 = vtanh.f32 %v4409_v34  ;;  %v2061_v31 = vrot.slane %v4409_v34, 2 }
0x1b81   :  { %v3645_v36 = vpop.eup %3644 }
0x1b82   :  { %1884 = vrot.lane.b32.xlu0 %v3645_v36, %s3752_s3 }
0x1b86   :  { %v3647_v13 = vpop.eup %3646 }
0x1b87   :  { %1916 = vrot.lane.b32.xlu1 %v3647_v13, %s3752_s3 }
0x1bf4   :  { %v1885_v37 = vpop.permute.xlu0 %1884 }
0x1bf5   :  { %v4414_v11 = vmul.f32 %v1885_v37, %v1867_v35 }
0x1bf7   :  { %v1920_v19 = vpack.c.bf16 %v4414_v11, %v4414_v11 }
0x1bf9   :  { %v1922_v29 = vrot.slane %v1920_v19, 1  ;;  %v1917_v28 = vpop.permute.xlu1 %1916 }
0x1bfa   :  { %v4418_v3 = vmul.f32 %v1917_v28, %v1899_v14 }
0x1bfb   :  { %1923 = vrot.lane.b32.xlu0 %v1922_v29, %s3753_s20 }
0x1bfc   :  { %v1968_v39 = vpack.c.bf16 %v4418_v3, %v4418_v3 }
0x1bfe   :  { %v1970_v24 = vrot.slane %v1968_v39, 2 }
0x1c00   :  { %1971 = vrot.lane.b32.xlu1 %v1970_v24, %s3753_s20 }
0x1c6d   :  { %v1924_v41 = vpop.permute.xlu0 %1923 }
0x1c6e   :  { %3333 = vmatmul.mubr.msk.bf16.vlgmr.msra.gmra.mrb[36].mxu0 %vm202_vm6, %v1924_v41 }
0x1c6f   :  { %3345 = vmatpush3.bf16.msra.mxu0 %v4254_v6  ;;  %3348 = vmatprep.mubr.msk.bf16.mxu0 %vm3750_vm0, %v3749_v1 }
0x1c70   :  { %3346 = vmatprep.subr.bf16.mxu0 %v3749_v1 }
0x1c72   :  { %v1972_v26 = vpop.permute.xlu1 %1971 }
0x1c73   :  { %3341 = vmatmul.mubr.msk.bf16.vlgmr.msra.gmra.mrb[52].mxu1 %vm202_vm6, %v1972_v26  ;;  %3347 = vmatpush3.bf16.msra.mxu0 %v4268_v30 }
0x1c74   :  { %3353 = vmatpush3.bf16.msra.mxu1 %v4280_v33  ;;  %3356 = vmatprep.mubr.msk.bf16.mxu1 %vm3750_vm0, %v3749_v1 }
0x1c75   :  { %3354 = vmatprep.subr.bf16.mxu1 %v3749_v1  ;;  %3360 = vmatprep.subr.bf16.mxu0 %v3749_v1 }
0x1c78   :  { %3355 = vmatpush3.bf16.msra.mxu1 %v4297_v20 }
0x1c79   :  { %3368 = vmatprep.subr.bf16.mxu1 %v3749_v1 }
0x1d41   :  { %v1962_v44 = vpop.f32.mrb[36].mxu0 }
0x1d42   :  { %v2017_v46 = vrot.slane %v1962_v44, 4  ;;  %v3334_v23 = vpop.f32.mrb[37].mxu0 }
0x1d43   :  { %v1965_v18 = vpop.f32.mrb[38].mxu0 }
0x1d44   :  { %v2019_v47 = vadd.f32 %v2017_v46, %v4344_v57  ;;  %v3335_v25 = vpop.f32.mrb[39].mxu0 }
0x1d46   :  { %v3050_v16 = vmul.f32 -1.442695, %v2019_v47  ;;  %v2010_v48 = vpop.f32.mrb[52].mxu1 }
0x1d47   :  { %v2049_v50 = vrot.slane %v2010_v48, 6  ;;  %v3342_v52 = vpop.f32.mrb[53].mxu1 }
0x1d48   :  { %3648 = vpow2.f32 %v3050_v16  ;;  %v2013_v49 = vpop.f32.mrb[54].mxu1 }
0x1d49   :  { %v2051_v53 = vadd.f32 %v2049_v50, %v4351_v12  ;;  %v3343_v54 = vpop.f32.mrb[55].mxu1 }
0x1d4b   :  { %v3051_v45 = vmul.f32 -1.442695, %v2051_v53 }
0x1d4d   :  { %3650 = vpow2.f32 %v3051_v45 }
0x1d4e   :  { %3652 = vtanh.f32 %v2019_v47 }
0x1d52   :  { %v3649_v55 = vpop.eup %3648 }
0x1d53   :  { %v2024_v43 = vadd.f32 1.0, %v3649_v55 }
0x1d55   :  { %3654 = vrcp.f32 %v2024_v43 }
0x1d56   :  { %3656 = vtanh.f32 %v2051_v53 }
0x1d57   :  { %v3651_v56 = vpop.eup %3650 }
0x1d58   :  { %v2056_v51 = vadd.f32 1.0, %v3651_v56  ;;  %v3653_v58 = vpop.eup %3652 }
0x1d5a   :  { %3658 = vrcp.f32 %v2056_v51 }
0x1d5f   :  { %v3655_v61 = vpop.eup %3654 }
0x1d60   :  { %v2027_v62 = vsel %vm3919_vm5, %v3653_v58, %v3655_v61  ;;  %v3657_v2 = vpop.eup %3656 }
0x1d61   :  { %2033 = vrot.lane.b32.xlu0 %v2027_v62, %s3752_s3  ;;  %v2031_v63 = vmul.f32 %v2029_v5, %v2027_v62 }
0x1d64   :  { %v3659_v21 = vpop.eup %3658 }
0x1d65   :  { %v2059_v35 = vsel %vm3919_vm5, %v3657_v2, %v3659_v21 }
0x1d66   :  { %2065 = vrot.lane.b32.xlu1 %v2059_v35, %s3752_s3  ;;  %v2063_v9 = vmul.f32 %v2061_v31, %v2059_v35 }
0x1dd3   :  { %v2034_v38 = vpop.permute.xlu0 %2033 }
0x1dd4   :  { %v2036_v4 = vmul.f32 %v2034_v38, %v2027_v62 }
0x1dd6   :  { %2038 = vrot.lane.b32.xlu0 %v2036_v4, %s3753_s20 }
0x1dd8   :  { %v2066_v14 = vpop.permute.xlu1 %2065 }
0x1dd9   :  { %v2068_v17 = vmul.f32 %v2066_v14, %v2059_v35 }
0x1ddb   :  { %2070 = vrot.lane.b32.xlu1 %v2068_v17, %s3753_s20 }
0x1e48   :  { %v2039_v15 = vpop.permute.xlu0 %2038 }
0x1e49   :  { %v4449_v27 = vadd.f32 %v2039_v15, %v2031_v63 }
0x1e4b   :  { %3660 = vtanh.f32 %v4449_v27  ;;  %v2189_v38 = vrot.slane %v4449_v27, 6 }
0x1e4d   :  { %v2071_v22 = vpop.permute.xlu1 %2070 }
0x1e4e   :  { %v4453_v8 = vadd.f32 %v2071_v22, %v2063_v9 }
0x1e50   :  { %3662 = vtanh.f32 %v4453_v8  ;;  %v2218_v14 = vrot.slane %v4453_v8, 2 }
0x1e55   :  { %v3661_v7 = vpop.eup %3660 }
0x1e56   :  { %2044 = vrot.lane.b32.xlu0 %v3661_v7, %s3752_s3 }
0x1e5a   :  { %v3663_v36 = vpop.eup %3662 }
0x1e5b   :  { %2076 = vrot.lane.b32.xlu1 %v3663_v36, %s3752_s3 }
0x1ec8   :  { %v2045_v10 = vpop.permute.xlu0 %2044 }
0x1ec9   :  { %v4458_v13 = vmul.f32 %v2045_v10, %v2027_v62 }
0x1ecb   :  { %v2080_v34 = vpack.c.bf16 %v4458_v13, %v4458_v13 }
0x1ecd   :  { %v2082_v37 = vrot.slane %v2080_v34, 2  ;;  %v2077_v19 = vpop.permute.xlu1 %2076 }
0x1ece   :  { %v4462_v29 = vmul.f32 %v2077_v19, %v2059_v35 }
0x1ecf   :  { %2083 = vrot.lane.b32.xlu0 %v2082_v37, %s3753_s20 }
0x1ed0   :  { %v2128_v28 = vpack.c.bf16 %v4462_v29, %v4462_v29 }
0x1ed2   :  { %v2130_v39 = vrot.slane %v2128_v28, 1 }
0x1ed4   :  { %2131 = vrot.lane.b32.xlu1 %v2130_v39, %s3753_s20 }
0x1f41   :  { %v2084_v24 = vpop.permute.xlu0 %2083 }
0x1f42   :  { %3349 = vmatmul.mubr.msk.bf16.vlgmr.msra.gmra.mrb[40].mxu0 %vm202_vm6, %v2084_v24 }
0x1f43   :  { %3361 = vmatpush3.bf16.msra.mxu0 %v4254_v6  ;;  %3364 = vmatprep.mubr.msk.bf16.mxu0 %vm3750_vm0, %v3749_v1 }
0x1f44   :  { %3362 = vmatprep.subr.bf16.mxu0 %v3749_v1 }
0x1f46   :  { %v2132_v41 = vpop.permute.xlu1 %2131 }
0x1f47   :  { %3357 = vmatmul.mubr.msk.bf16.vlgmr.msra.gmra.mrb[56].mxu1 %vm202_vm6, %v2132_v41  ;;  %3363 = vmatpush3.bf16.msra.mxu0 %v4268_v30 }
0x1f48   :  { %3369 = vmatpush3.bf16.msra.mxu1 %v4280_v33  ;;  %3372 = vmatprep.mubr.msk.bf16.mxu1 %vm3750_vm0, %v3749_v1 }
0x1f49   :  { %3370 = vmatprep.subr.bf16.mxu1 %v3749_v1  ;;  %3376 = vmatprep.subr.bf16.mxu0 %v3749_v1 }
0x1f4c   :  { %3371 = vmatpush3.bf16.msra.mxu1 %v4297_v20 }
0x1f4d   :  { %3384 = vmatprep.subr.bf16.mxu1 %v3749_v1 }
0x2015   :  { %v2122_v26 = vpop.f32.mrb[40].mxu0 }
0x2016   :  { %v2177_v44 = vrot.slane %v2122_v26, 2  ;;  %v3350_v46 = vpop.f32.mrb[41].mxu0 }
0x2017   :  { %v2125_v23 = vpop.f32.mrb[42].mxu0 }
0x2018   :  { %v2179_v18 = vadd.f32 %v2177_v44, %v4344_v57  ;;  %v3351_v47 = vpop.f32.mrb[43].mxu0 }
0x201a   :  { %v3054_v25 = vmul.f32 -1.442695, %v2179_v18  ;;  %v2170_v16 = vpop.f32.mrb[56].mxu1 }
0x201b   :  { %v2208_v48 = vadd.f32 %v2170_v16, %v4351_v12  ;;  %v3358_v50 = vpop.f32.mrb[57].mxu1 }
0x201c   :  { %3664 = vpow2.f32 %v3054_v25  ;;  %v2173_v52 = vpop.f32.mrb[58].mxu1 }
0x201d   :  { %v3055_v49 = vmul.f32 -1.442695, %v2208_v48  ;;  %v3359_v53 = vpop.f32.mrb[59].mxu1 }
0x201f   :  { %3666 = vpow2.f32 %v3055_v49 }
0x2020   :  { %3668 = vtanh.f32 %v2179_v18 }
0x2026   :  { %v3665_v54 = vpop.eup %3664 }
0x2027   :  { %v2184_v45 = vadd.f32 1.0, %v3665_v54 }
0x2029   :  { %v3667_v55 = vpop.eup %3666  ;;  %3670 = vrcp.f32 %v2184_v45 }
0x202a   :  { %v2213_v43 = vadd.f32 1.0, %v3667_v55  ;;  %3672 = vtanh.f32 %v2208_v48  ;;  %v3669_v57 = vpop.eup %3668 }
0x202c   :  { %3674 = vrcp.f32 %v2213_v43 }
0x2033   :  { %v3671_v56 = vpop.eup %3670 }
0x2034   :  { %v2187_v51 = vsel %vm3919_vm5, %v3669_v57, %v3671_v56  ;;  %v3673_v12 = vpop.eup %3672 }
0x2035   :  { %2193 = vrot.lane.b32.xlu0 %v2187_v51, %s3752_s3  ;;  %v2191_v4 = vmul.f32 %v2189_v38, %v2187_v51 }
0x2036   :  { %v3675_v58 = vpop.eup %3674 }
0x2037   :  { %v2216_v61 = vsel %vm3919_vm5, %v3673_v12, %v3675_v58 }
0x2038   :  { %2222 = vrot.lane.b32.xlu1 %v2216_v61, %s3752_s3  ;;  %v2220_v63 = vmul.f32 %v2218_v14, %v2216_v61 }
0x20a7   :  { %v2194_v62 = vpop.permute.xlu0 %2193 }
0x20a8   :  { %v2196_v2 = vmul.f32 %v2194_v62, %v2187_v51 }
0x20aa   :  { %2198 = vrot.lane.b32.xlu0 %v2196_v2, %s3753_s20  ;;  %v2223_v21 = vpop.permute.xlu1 %2222 }
0x20ab   :  { %v2225_v35 = vmul.f32 %v2223_v21, %v2216_v61 }
0x20ad   :  { %2227 = vrot.lane.b32.xlu1 %v2225_v35, %s3753_s20 }
0x211c   :  { %v2199_v17 = vpop.permute.xlu0 %2198 }
0x211d   :  { %v4494_v5 = vadd.f32 %v2199_v17, %v2191_v4 }
0x211f   :  { %3676 = vtanh.f32 %v4494_v5  ;;  %v2228_v15 = vpop.permute.xlu1 %2227  ;;  %v2342_v2 = vrot.slane %v4494_v5, 6 }
0x2120   :  { %v4497_v31 = vadd.f32 %v2228_v15, %v2220_v63 }
0x2122   :  { %3678 = vtanh.f32 %v4497_v31  ;;  %v2374_v35 = vrot.slane %v4497_v31, 2 }
0x2129   :  { %v3677_v9 = vpop.eup %3676 }
0x212a   :  { %2204 = vrot.lane.b32.xlu0 %v3677_v9, %s3752_s3 }
0x212c   :  { %v3679_v22 = vpop.eup %3678 }
0x212d   :  { %2233 = vrot.lane.b32.xlu1 %v3679_v22, %s3752_s3 }
0x219c   :  { %v2205_v27 = vpop.permute.xlu0 %2204 }
0x219d   :  { %v4502_v7 = vmul.f32 %v2205_v27, %v2187_v51 }
0x219f   :  { %v2237_v8 = vpack.c.bf16 %v4502_v7, %v4502_v7  ;;  %v2234_v36 = vpop.permute.xlu1 %2233 }
0x21a0   :  { %v4506_v10 = vmul.f32 %v2234_v36, %v2216_v61 }
0x21a1   :  { %v2239_v34 = vrot.slane %v2237_v8, 3 }
0x21a2   :  { %v2285_v37 = vpack.c.bf16 %v4506_v10, %v4506_v10 }
0x21a3   :  { %2240 = vrot.lane.b32.xlu1 %v2239_v34, %s3753_s20 }
0x21a4   :  { %2287 = vrot.lane.b32.xlu0 %v2285_v37, %s3753_s20 }
0x2215   :  { %v2241_v19 = vpop.permute.xlu1 %2240 }
0x2216   :  { %v2288_v28 = vpop.permute.xlu0 %2287  ;;  %3365 = vmatmul.mubr.msk.bf16.vlgmr.msra.gmra.mrb[44].mxu0 %vm202_vm6, %v2241_v19 }
0x2217   :  { %3373 = vmatmul.mubr.msk.bf16.vlgmr.msra.gmra.mrb[60].mxu1 %vm202_vm6, %v2288_v28  ;;  %3377 = vmatpush3.bf16.msra.mxu0 %v4254_v6 }
0x2218   :  { %3378 = vmatprep.subr.bf16.mxu0 %v3749_v1  ;;  %3385 = vmatpush3.bf16.msra.mxu1 %v4280_v33 }
0x2219   :  { %3380 = vmatprep.mubr.msk.bf16.mxu0 %vm3750_vm0, %v3749_v1  ;;  %3386 = vmatprep.subr.bf16.mxu1 %v3749_v1 }
0x221a   :  { %3388 = vmatprep.mubr.msk.bf16.mxu1 %vm3750_vm0, %v3749_v1 }
0x221b   :  { %3379 = vmatpush3.bf16.msra.mxu0 %v4268_v30 }
0x221c   :  { %3387 = vmatpush3.bf16.msra.mxu1 %v4297_v20  ;;  %3392 = vmatprep.subr.bf16.mxu0 %v3749_v1 }
0x221d   :  { %3400 = vmatprep.subr.bf16.mxu1 %v3749_v1 }
0x22e9   :  { %v2279_v39 = vpop.f32.mrb[44].mxu0 }
0x22ea   :  { %v2332_v24 = vadd.f32 %v2279_v39, %v4349_v0  ;;  %v3366_v41 = vpop.f32.mrb[45].mxu0  ;;  %v2326_v26 = vpop.f32.mrb[60].mxu1 }
0x22eb   :  { %v2362_v44 = vrot.slane %v2326_v26, 2  ;;  %v2282_v46 = vpop.f32.mrb[46].mxu0  ;;  %v3374_v23 = vpop.f32.mrb[61].mxu1 }
0x22ec   :  { %v3058_v18 = vmul.f32 -1.442695, %v2332_v24  ;;  %v3367_v47 = vpop.f32.mrb[47].mxu0  ;;  %v2329_v25 = vpop.f32.mrb[62].mxu1 }
0x22ed   :  { %v2364_v16 = vadd.f32 %v2362_v44, %v4346_v59  ;;  %v3375_v48 = vpop.f32.mrb[63].mxu1 }
0x22ee   :  { %3680 = vpow2.f32 %v3058_v18 }
0x22ef   :  { %v3059_v50 = vmul.f32 -1.442695, %v2364_v16 }
0x22f1   :  { %3682 = vpow2.f32 %v3059_v50 }
0x22f2   :  { %3684 = vtanh.f32 %v2332_v24 }
0x22f8   :  { %v3681_v52 = vpop.eup %3680 }
0x22f9   :  { %v2337_v49 = vadd.f32 1.0, %v3681_v52 }
0x22fb   :  { %v3683_v53 = vpop.eup %3682  ;;  %3686 = vrcp.f32 %v2337_v49 }
0x22fc   :  { %v2369_v54 = vadd.f32 1.0, %v3683_v53  ;;  %3688 = vtanh.f32 %v2364_v16  ;;  %v3685_v45 = vpop.eup %3684 }
0x22fe   :  { %3690 = vrcp.f32 %v2369_v54 }
0x2305   :  { %v3687_v55 = vpop.eup %3686 }
0x2306   :  { %v2340_v43 = vsel %vm3919_vm5, %v3685_v45, %v3687_v55  ;;  %v3689_v57 = vpop.eup %3688 }
0x2307   :  { %2346 = vrot.lane.b32.xlu0 %v2340_v43, %s3752_s3  ;;  %v2344_v21 = vmul.f32 %v2342_v2, %v2340_v43 }
0x2308   :  { %v3691_v56 = vpop.eup %3690 }
0x2309   :  { %v2372_v51 = vsel %vm3919_vm5, %v3689_v57, %v3691_v56 }
0x230a   :  { %2378 = vrot.lane.b32.xlu1 %v2372_v51, %s3752_s3  ;;  %v2376_v14 = vmul.f32 %v2374_v35, %v2372_v51 }
0x2379   :  { %v2347_v12 = vpop.permute.xlu0 %2346 }
0x237a   :  { %v2349_v58 = vmul.f32 %v2347_v12, %v2340_v43 }
0x237c   :  { %2351 = vrot.lane.b32.xlu0 %v2349_v58, %s3753_s20  ;;  %v2379_v61 = vpop.permute.xlu1 %2378 }
0x237d   :  { %v2381_v62 = vmul.f32 %v2379_v61, %v2372_v51 }
0x237f   :  { %2383 = vrot.lane.b32.xlu1 %v2381_v62, %s3753_s20 }
0x23ee   :  { %v2352_v38 = vpop.permute.xlu0 %2351 }
0x23ef   :  { %v4538_v4 = vadd.f32 %v2352_v38, %v2344_v21 }
0x23f1   :  { %3692 = vtanh.f32 %v4538_v4  ;;  %v2384_v17 = vpop.permute.xlu1 %2383  ;;  %v2501_v61 = vrot.slane %v4538_v4, 6 }
0x23f2   :  { %v4541_v63 = vadd.f32 %v2384_v17, %v2376_v14 }
0x23f4   :  { %3694 = vtanh.f32 %v4541_v63  ;;  %v2533_v35 = vrot.slane %v4541_v63, 2 }
0x23fb   :  { %v3693_v15 = vpop.eup %3692 }
0x23fc   :  { %2357 = vrot.lane.b32.xlu0 %v3693_v15, %s3752_s3 }
0x23fe   :  { %v3695_v9 = vpop.eup %3694 }
0x23ff   :  { %2389 = vrot.lane.b32.xlu1 %v3695_v9, %s3752_s3 }
0x246e   :  { %v2358_v5 = vpop.permute.xlu0 %2357 }
0x246f   :  { %v4546_v22 = vmul.f32 %v2358_v5, %v2340_v43 }
0x2471   :  { %v2393_v31 = vpack.c.bf16 %v4546_v22, %v4546_v22  ;;  %v2390_v27 = vpop.permute.xlu1 %2389 }
0x2472   :  { %v4550_v8 = vmul.f32 %v2390_v27, %v2372_v51 }
0x2473   :  { %2395 = vrot.lane.b32.xlu0 %v2393_v31, %s3753_s20 }
0x2474   :  { %v2440_v36 = vpack.c.bf16 %v4550_v8, %v4550_v8 }
0x2476   :  { %v2442_v34 = vrot.slane %v2440_v36, 3 }
0x2478   :  { %2443 = vrot.lane.b32.xlu1 %v2442_v34, %s3753_s20 }
0x24e5   :  { %v2396_v37 = vpop.permute.xlu0 %2395 }
0x24e6   :  { %3381 = vmatmul.mubr.msk.bf16.vlgmr.msra.gmra.mrb[48].mxu0 %vm202_vm6, %v2396_v37 }
0x24e7   :  { %3393 = vmatpush3.bf16.msra.mxu0 %v4254_v6  ;;  %3396 = vmatprep.mubr.msk.bf16.mxu0 %vm3750_vm0, %v3749_v1 }
0x24e8   :  { %3394 = vmatprep.subr.bf16.mxu0 %v3749_v1 }
0x24ea   :  { %v2444_v19 = vpop.permute.xlu1 %2443 }
0x24eb   :  { %3389 = vmatmul.mubr.msk.bf16.vlgmr.msra.gmra.mrb[64].mxu1 %vm202_vm6, %v2444_v19  ;;  %3395 = vmatpush3.bf16.msra.mxu0 %v4268_v30 }
0x24ec   :  { %3401 = vmatpush3.bf16.msra.mxu1 %v4280_v33  ;;  %3404 = vmatprep.mubr.msk.bf16.mxu1 %vm3750_vm0, %v3749_v1 }
0x24ed   :  { %3402 = vmatprep.subr.bf16.mxu1 %v3749_v1  ;;  %3408 = vmatprep.subr.bf16.mxu0 %v3749_v1 }
0x24f0   :  { %3403 = vmatpush3.bf16.msra.mxu1 %v4297_v20 }
0x24f1   :  { %3416 = vmatprep.subr.bf16.mxu1 %v3749_v1 }
0x25b9   :  { %v2434_v6 = vpop.f32.mrb[48].mxu0 }
0x25ba   :  { %v2489_v28 = vrot.slane %v2434_v6, 6  ;;  %v3382_v39 = vpop.f32.mrb[49].mxu0  ;;  %v3747_v6 = vld [vmem:[%s4705_s5] ss:$8 sps:$4 sm:$0xff]  }
0x25bb   :  { %v2437_v24 = vpop.f32.mrb[50].mxu0  ;;  %v3748_v39 = vld [vmem:[%s4705_s5 + $0x10] ss:$8 sps:$4 sm:$0xff]   ;;  %s3754_s5 = smov 96  }
0x25bc   :  { %v2491_v41 = vadd.f32 %v2489_v28, %v4349_v0  ;;  %v3383_v30 = vpop.f32.mrb[51].mxu0 }
0x25be   :  { %v3062_v26 = vmul.f32 -1.442695, %v2491_v41  ;;  %v2482_v44 = vpop.f32.mrb[64].mxu1 }
0x25bf   :  { %v2521_v46 = vrot.slane %v2482_v44, 4  ;;  %v3390_v23 = vpop.f32.mrb[65].mxu1 }
0x25c0   :  { %3696 = vpow2.f32 %v3062_v26  ;;  %v2485_v18 = vpop.f32.mrb[66].mxu1 }
0x25c1   :  { %v2523_v47 = vadd.f32 %v2521_v46, %v4346_v59  ;;  %v3391_v25 = vpop.f32.mrb[67].mxu1 }
0x25c3   :  { %v3063_v16 = vmul.f32 -1.442695, %v2523_v47 }
0x25c5   :  { %3698 = vpow2.f32 %v3063_v16 }
0x25c6   :  { %3700 = vtanh.f32 %v2491_v41 }
0x25ca   :  { %v3697_v48 = vpop.eup %3696 }
0x25cb   :  { %v2496_v50 = vadd.f32 1.0, %v3697_v48 }
0x25cd   :  { %3702 = vrcp.f32 %v2496_v50 }
0x25ce   :  { %3704 = vtanh.f32 %v2523_v47 }
0x25cf   :  { %v3699_v52 = vpop.eup %3698 }
0x25d0   :  { %v2528_v49 = vadd.f32 1.0, %v3699_v52  ;;  %v3701_v53 = vpop.eup %3700 }
0x25d2   :  { %3706 = vrcp.f32 %v2528_v49 }
0x25d7   :  { %v3703_v54 = vpop.eup %3702 }
0x25d8   :  { %v2499_v45 = vsel %vm3919_vm5, %v3701_v53, %v3703_v54  ;;  %v3705_v55 = vpop.eup %3704 }
0x25d9   :  { %2505 = vrot.lane.b32.xlu0 %v2499_v45, %s3752_s3  ;;  %v2503_v62 = vmul.f32 %v2501_v61, %v2499_v45 }
0x25dc   :  { %v3707_v43 = vpop.eup %3706 }
0x25dd   :  { %v2531_v57 = vsel %vm3919_vm5, %v3705_v55, %v3707_v43 }
0x25de   :  { %2537 = vrot.lane.b32.xlu1 %v2531_v57, %s3752_s3  ;;  %v2535_v38 = vmul.f32 %v2533_v35, %v2531_v57 }
0x264b   :  { %v2506_v56 = vpop.permute.xlu0 %2505 }
0x264c   :  { %v2508_v51 = vmul.f32 %v2506_v56, %v2499_v45 }
0x264e   :  { %2510 = vrot.lane.b32.xlu0 %v2508_v51, %s3753_s20 }
0x2650   :  { %v2538_v12 = vpop.permute.xlu1 %2537 }
0x2651   :  { %v2540_v58 = vmul.f32 %v2538_v12, %v2531_v57 }
0x2653   :  { %2542 = vrot.lane.b32.xlu1 %v2540_v58, %s3753_s20 }
0x26c0   :  { %v2511_v2 = vpop.permute.xlu0 %2510 }
0x26c1   :  { %v4581_v21 = vadd.f32 %v2511_v2, %v2503_v62 }
0x26c3   :  { %3708 = vtanh.f32 %v4581_v21  ;;  %v2661_v61 = vrot.slane %v4581_v21, 6 }
0x26c5   :  { %v2543_v14 = vpop.permute.xlu1 %2542 }
0x26c6   :  { %v4585_v17 = vadd.f32 %v2543_v14, %v2535_v38 }
0x26c8   :  { %3710 = vtanh.f32 %v4585_v17  ;;  %v2693_v38 = vrot.slane %v4585_v17, 2 }
0x26cd   :  { %v3709_v15 = vpop.eup %3708 }
0x26ce   :  { %2516 = vrot.lane.b32.xlu0 %v3709_v15, %s3752_s3 }
0x26d2   :  { %v3711_v9 = vpop.eup %3710 }
0x26d3   :  { %2548 = vrot.lane.b32.xlu1 %v3711_v9, %s3752_s3 }
0x2740   :  { %v2517_v4 = vpop.permute.xlu0 %2516 }
0x2741   :  { %v4590_v5 = vmul.f32 %v2517_v4, %v2499_v45 }
0x2743   :  { %v2552_v63 = vpack.c.bf16 %v4590_v5, %v4590_v5 }
0x2745   :  { %v2554_v31 = vrot.slane %v2552_v63, 1  ;;  %v2549_v27 = vpop.permute.xlu1 %2548 }
0x2746   :  { %v4594_v36 = vmul.f32 %v2549_v27, %v2531_v57 }
0x2747   :  { %2555 = vrot.lane.b32.xlu0 %v2554_v31, %s3753_s20 }
0x2748   :  { %v2600_v34 = vpack.c.bf16 %v4594_v36, %v4594_v36 }
0x274a   :  { %v2602_v37 = vrot.slane %v2600_v34, 2 }
0x274c   :  { %2603 = vrot.lane.b32.xlu1 %v2602_v37, %s3753_s20 }
0x27b9   :  { %v2556_v19 = vpop.permute.xlu0 %2555 }
0x27ba   :  { %3397 = vmatmul.mubr.msk.bf16.vlgmr.msra.gmra.mrb[52].mxu0 %vm202_vm6, %v2556_v19 }
0x27bb   :  { %3409 = vmatpush3.bf16.msra.mxu0 %v3747_v6  ;;  %3412 = vmatprep.mubr.msk.bf16.mxu0 %vm3750_vm0, %v3749_v1 }
0x27bc   :  { %3410 = vmatprep.subr.bf16.mxu0 %v3749_v1 }
0x27be   :  { %v2604_v28 = vpop.permute.xlu1 %2603 }
0x27bf   :  { %3405 = vmatmul.mubr.msk.bf16.vlgmr.msra.gmra.mrb[68].mxu1 %vm202_vm6, %v2604_v28  ;;  %3411 = vmatpush3.bf16.msra.mxu0 %v3748_v39 }
0x27c0   :  { %3417 = vmatpush3.bf16.msra.mxu1 %v4280_v33  ;;  %3420 = vmatprep.mubr.msk.bf16.mxu1 %vm3750_vm0, %v3749_v1 }
0x27c1   :  { %3418 = vmatprep.subr.bf16.mxu1 %v3749_v1 }
0x27c4   :  { %3419 = vmatpush3.bf16.msra.mxu1 %v4297_v20 }
0x288d   :  { %v2594_v24 = vpop.f32.mrb[52].mxu0 }
0x288e   :  { %v2649_v41 = vrot.slane %v2594_v24, 4  ;;  %v3398_v30 = vpop.f32.mrb[53].mxu0 }
0x288f   :  { %v2597_v26 = vpop.f32.mrb[54].mxu0 }
0x2890   :  { %v2651_v44 = vadd.f32 %v2649_v41, %v4349_v0  ;;  %v3399_v46 = vpop.f32.mrb[55].mxu0 }
0x2892   :  { %v3066_v23 = vmul.f32 -1.442695, %v2651_v44  ;;  %v2642_v18 = vpop.f32.mrb[68].mxu1 }
0x2893   :  { %v2681_v47 = vrot.slane %v2642_v18, 6  ;;  %v3406_v25 = vpop.f32.mrb[69].mxu1 }
0x2894   :  { %3712 = vpow2.f32 %v3066_v23  ;;  %v2645_v33 = vpop.f32.mrb[70].mxu1 }
0x2895   :  { %v2683_v16 = vadd.f32 %v2681_v47, %v4346_v59  ;;  %v3407_v48 = vpop.f32.mrb[71].mxu1 }
0x2897   :  { %v3067_v50 = vmul.f32 -1.442695, %v2683_v16 }
0x2899   :  { %3714 = vpow2.f32 %v3067_v50 }
0x289a   :  { %3716 = vtanh.f32 %v2651_v44 }
0x289e   :  { %v3713_v1 = vpop.eup %3712 }
0x289f   :  { %v2656_v20 = vadd.f32 1.0, %v3713_v1 }
0x28a1   :  { %3718 = vrcp.f32 %v2656_v20 }
0x28a2   :  { %3720 = vtanh.f32 %v2683_v16 }
0x28a3   :  { %v3715_v52 = vpop.eup %3714 }
0x28a4   :  { %v2688_v49 = vadd.f32 1.0, %v3715_v52  ;;  %v3717_v53 = vpop.eup %3716 }
0x28a6   :  { %3722 = vrcp.f32 %v2688_v49 }
0x28ab   :  { %v3719_v54 = vpop.eup %3718 }
0x28ac   :  { %v2659_v45 = vsel %vm3919_vm5, %v3717_v53, %v3719_v54  ;;  %v3721_v55 = vpop.eup %3720 }
0x28ad   :  { %2665 = vrot.lane.b32.xlu0 %v2659_v45, %s3752_s3  ;;  %v2663_v62 = vmul.f32 %v2661_v61, %v2659_v45 }
0x28b0   :  { %v3723_v43 = vpop.eup %3722 }
0x28b1   :  { %v2691_v57 = vsel %vm3919_vm5, %v3721_v55, %v3723_v43 }
0x28b2   :  { %2697 = vrot.lane.b32.xlu1 %v2691_v57, %s3752_s3  ;;  %v2695_v14 = vmul.f32 %v2693_v38, %v2691_v57 }
0x291f   :  { %v2666_v56 = vpop.permute.xlu0 %2665 }
0x2920   :  { %v2668_v51 = vmul.f32 %v2666_v56, %v2659_v45 }
0x2922   :  { %2670 = vrot.lane.b32.xlu0 %v2668_v51, %s3753_s20 }
0x2924   :  { %v2698_v12 = vpop.permute.xlu1 %2697 }
0x2925   :  { %v2700_v58 = vmul.f32 %v2698_v12, %v2691_v57 }
0x2927   :  { %2702 = vrot.lane.b32.xlu1 %v2700_v58, %s3753_s20 }
0x2994   :  { %v2671_v2 = vpop.permute.xlu0 %2670 }
0x2995   :  { %v4627_v35 = vadd.f32 %v2671_v2, %v2663_v62 }
0x2997   :  { %3724 = vtanh.f32 %v4627_v35  ;;  %v2821_v51 = vrot.slane %v4627_v35, 6  ;;  %v2891_v35 = vrot.slane %v4594_v36, 4 }
0x2999   :  { %v2703_v15 = vpop.permute.xlu1 %2702 }
0x299a   :  { %v4631_v9 = vadd.f32 %v2703_v15, %v2695_v14 }
0x299c   :  { %3726 = vtanh.f32 %v4631_v9  ;;  %v2850_v58 = vrot.slane %v4631_v9, 2  ;;  %v2886_v9 = vrot.slane %v4458_v13, 4  ;;  %v2878_v13 = vrot.slane %v4414_v11, 2 }
0x29a1   :  { %v3725_v4 = vpop.eup %3724 }
0x29a2   :  { %2676 = vrot.lane.b32.xlu0 %v3725_v4, %s3752_s3  ;;  %v2925_v4 = vrot.slane %v4418_v3, 4 }
0x29a6   :  { %v3727_v63 = vpop.eup %3726 }
0x29a7   :  { %2708 = vrot.lane.b32.xlu1 %v3727_v63, %s3752_s3 }
0x2a14   :  { %v2677_v21 = vpop.permute.xlu0 %2676 }
0x2a15   :  { %v4636_v31 = vmul.f32 %v2677_v21, %v2659_v45 }
0x2a17   :  { %v2712_v17 = vpack.c.bf16 %v4636_v31, %v4636_v31  ;;  %v2920_v63 = vrot.slane %v4636_v31, 4 }
0x2a19   :  { %v2714_v27 = vrot.slane %v2712_v17, 2  ;;  %v2709_v34 = vpop.permute.xlu1 %2708 }
0x2a1a   :  { %v4640_v37 = vmul.f32 %v2709_v34, %v2691_v57 }
0x2a1b   :  { %2715 = vrot.lane.b32.xlu0 %v2714_v27, %s3753_s20 }
0x2a1c   :  { %v2760_v19 = vpack.c.bf16 %v4640_v37, %v4640_v37 }
0x2a1e   :  { %v2762_v6 = vrot.slane %v2760_v19, 1 }
0x2a20   :  { %2763 = vrot.lane.b32.xlu1 %v2762_v6, %s3753_s20 }
0x2a8d   :  { %v2716_v28 = vpop.permute.xlu0 %2715 }
0x2a8e   :  { %3413 = vmatmul.mubr.msk.bf16.vlgmr.msra.gmra.mrb[56].mxu0 %vm202_vm6, %v2716_v28 }
0x2a92   :  { %v2764_v39 = vpop.permute.xlu1 %2763 }
0x2a93   :  { %3421 = vmatmul.mubr.msk.bf16.vlgmr.msra.gmra.mrb[72].mxu1 %vm202_vm6, %v2764_v39 }
0x2b61   :  { %v2754_v24 = vpop.f32.mrb[56].mxu0 }
0x2b62   :  { %v2809_v41 = vrot.slane %v2754_v24, 2  ;;  %v3414_v30 = vpop.f32.mrb[57].mxu0  ;;  %v3755_v24 = vmov 1983009808  }
0x2b63   :  { %v2757_v26 = vpop.f32.mrb[58].mxu0 }
0x2b64   :  { %v2811_v44 = vadd.f32 %v2809_v41, %v4349_v0  ;;  %v3415_v46 = vpop.f32.mrb[59].mxu0 }
0x2b65   :  { %v2901_v46 = vrot.slane %v4550_v8, 6 }
0x2b66   :  { %v3070_v23 = vmul.f32 -1.442695, %v2811_v44  ;;  %v2802_v18 = vpop.f32.mrb[72].mxu1 }
0x2b67   :  { %v2840_v47 = vadd.f32 %v2802_v18, %v4346_v59  ;;  %v3422_v25 = vpop.f32.mrb[73].mxu1 }
0x2b68   :  { %3728 = vpow2.f32 %v3070_v23  ;;  %v2805_v33 = vpop.f32.mrb[74].mxu1  ;;  %v2883_v23 = vrot.slane %v4640_v37, 2 }
0x2b69   :  { %v3071_v16 = vmul.f32 -1.442695, %v2840_v47  ;;  %v3423_v48 = vpop.f32.mrb[75].mxu1 }
0x2b6b   :  { %3730 = vpow2.f32 %v3071_v16 }
0x2b6c   :  { %3732 = vtanh.f32 %v2811_v44 }
0x2b72   :  { %v3729_v50 = vpop.eup %3728 }
0x2b73   :  { %v2816_v1 = vadd.f32 1.0, %v3729_v50 }
0x2b75   :  { %v3731_v20 = vpop.eup %3730  ;;  %3734 = vrcp.f32 %v2816_v1  ;;  %v2935_v1 = vrot.slane %v4374_v42, 6 }
0x2b76   :  { %v2845_v52 = vadd.f32 1.0, %v3731_v20  ;;  %3736 = vtanh.f32 %v2840_v47  ;;  %v3733_v0 = vpop.eup %3732  ;;  %v2917_v20 = vrot.slane %v4462_v29, 2 }
0x2b78   :  { %3738 = vrcp.f32 %v2845_v52 }
0x2b7f   :  { %v3735_v49 = vpop.eup %3734 }
0x2b80   :  { %v2819_v53 = vsel %vm3919_vm5, %v3733_v0, %v3735_v49  ;;  %v3737_v59 = vpop.eup %3736 }
0x2b81   :  { %2825 = vrot.lane.b32.xlu0 %v2819_v53, %s3752_s3  ;;  %v2823_v12 = vmul.f32 %v2821_v51, %v2819_v53 }
0x2b82   :  { %v3739_v54 = vpop.eup %3738 }
0x2b83   :  { %v2848_v45 = vsel %vm3919_vm5, %v3737_v59, %v3739_v54 }
0x2b84   :  { %2854 = vrot.lane.b32.xlu1 %v2848_v45, %s3752_s3  ;;  %v2852_v2 = vmul.f32 %v2850_v58, %v2848_v45 }
0x2bf3   :  { %v2826_v55 = vpop.permute.xlu0 %2825 }
0x2bf4   :  { %v2828_v43 = vmul.f32 %v2826_v55, %v2819_v53 }
0x2bf6   :  { %2830 = vrot.lane.b32.xlu0 %v2828_v43, %s3753_s20  ;;  %v2855_v57 = vpop.permute.xlu1 %2854 }
0x2bf7   :  { %v2857_v56 = vmul.f32 %v2855_v57, %v2848_v45 }
0x2bf9   :  { %2859 = vrot.lane.b32.xlu1 %v2857_v56, %s3753_s20 }
0x2c68   :  { %v2831_v61 = vpop.permute.xlu0 %2830 }
0x2c69   :  { %v2833_v62 = vadd.f32 %v2831_v61, %v2823_v12 }
0x2c6b   :  { %3740 = vtanh.f32 %v2833_v62  ;;  %v2860_v60 = vpop.permute.xlu1 %2859 }
0x2c6c   :  { %v2862_v38 = vadd.f32 %v2860_v60, %v2852_v2 }
0x2c6e   :  { %3742 = vtanh.f32 %v2862_v38 }
0x2c75   :  { %v3741_v14 = vpop.eup %3740 }
0x2c76   :  { %2836 = vrot.lane.b32.xlu0 %v3741_v14, %s3752_s3 }
0x2c78   :  { %v3743_v15 = vpop.eup %3742 }
0x2c79   :  { %2865 = vrot.lane.b32.xlu1 %v3743_v15, %s3752_s3 }
0x2c7a   :  { %2870 = vrot.lane.b32.xlu0 %v4370_v40, %s3753_s20  ;;  %v2896_v40 = vrot.slane %v4502_v7, 6 }
0x2c7d   :  { %2892 = vrot.lane.b32.xlu1 %v2891_v35, %s3752_s3 }
0x2c7e   :  { %2887 = vrot.lane.b32.xlu0 %v2886_v9, %s3753_s20 }
0x2c81   :  { %2908 = vrot.lane.b32.xlu1 %v4506_v10, %s3752_s3  ;;  %v2912_v10 = vrot.slane %v4590_v5, 2  ;;  %v2957_v5 = vunpack.c.l.s4 %v3755_v24 }
0x2c82   :  { %2904 = vrot.lane.b32.xlu0 %v4546_v22, %s3753_s20 }
0x2c83   :  { %v2958_v47 = vunpack.c.0.s8 %v2957_v5 }
0x2c85   :  { %2926 = vrot.lane.b32.xlu1 %v2925_v4, %s3752_s3  ;;  %v2961_v0 = vsub.s32 %v2958_v47, %v3898_v32 }
0x2c86   :  { %2921 = vrot.lane.b32.xlu0 %v2920_v63, %s3753_s20 }
0x2c89   :  { %2897 = vrot.lane.b32.xlu1 %v2896_v40, %s3754_s5 }
0x2c8a   :  { %2879 = vrot.lane.b32.xlu0 %v2878_v13, %s3754_s5 }
0x2c8e   :  { %2913 = vrot.lane.b32.xlu0 %v2912_v10, %s3754_s5 }
0x2ce8   :  { %v2837_v36 = vpop.permute.xlu0 %2836 }
0x2ce9   :  { %v2839_v21 = vmul.f32 %v2837_v36, %v2819_v53 }
0x2ceb   :  { %v2866_v22 = vpop.permute.xlu1 %2865  ;;  %v2930_v31 = vrot.slane %v2839_v21, 6 }
0x2cec   :  { %v2868_v3 = vmul.f32 %v2866_v22, %v2848_v45  ;;  %v2871_v17 = vpop.permute.xlu0 %2870 }
0x2cee   :  { %2874 = vrot.lane.b32.xlu1 %v2868_v3, %s3752_s3 }
0x2cef   :  { %v2893_v34 = vpop.permute.xlu1 %2892 }
0x2cf0   :  { %v2888_v27 = vpop.permute.xlu0 %2887 }
0x2cf1   :  { %v2941_v41 = vsel %vm202_vm6, %v2888_v27, %v2893_v34 }
0x2cf2   :  { %2931 = vrot.lane.b32.xlu1 %v2930_v31, %s3754_s5 }
0x2cf3   :  { %v2909_v19 = vpop.permute.xlu1 %2908 }
0x2cf4   :  { %v2905_v7 = vpop.permute.xlu0 %2904 }
0x2cf5   :  { %v2944_v25 = vsel %vm202_vm6, %v2905_v7, %v2909_v19 }
0x2cf7   :  { %v2927_v6 = vpop.permute.xlu1 %2926 }
0x2cf8   :  { %v2922_v11 = vpop.permute.xlu0 %2921 }
0x2cf9   :  { %v2947_v8 = vsel %vm202_vm6, %v2922_v11, %v2927_v6 }
0x2cfb   :  { %v2898_v39 = vpop.permute.xlu1 %2897 }
0x2cfc   :  { %v2880_v28 = vpop.permute.xlu0 %2879  ;;  %v2942_v30 = vsel %vm1555_vm9, %v2941_v41, %v2898_v39 }
0x2cfd   :  { %v2943_v16 = vsel %vm2939_vm10, %v2942_v30, %v2901_v46 }
0x2d00   :  { %v2914_v26 = vpop.permute.xlu0 %2913 }
0x2d01   :  { %v2945_v48 = vsel %vm1555_vm9, %v2944_v25, %v2914_v26 }
0x2d02   :  { %v2946_v53 = vsel %vm2939_vm10, %v2945_v48, %v2917_v20 }
0x2d60   :  { %v2875_v44 = vpop.permute.xlu1 %2874 }
0x2d61   :  { %v2937_v18 = vsel %vm202_vm6, %v2871_v17, %v2875_v44 }
0x2d62   :  { %v2938_v33 = vsel %vm1555_vm9, %v2937_v18, %v2880_v28 }
0x2d63   :  { %v2940_v50 = vsel %vm2939_vm10, %v2938_v33, %v2883_v23 }
0x2d64   :  { %v2954_v37 = vcombine.low %v2940_v50, %v2943_v16  ;;  %v2932_v52 = vpop.permute.xlu1 %2931 }
0x2d65   :  { %v2948_v49 = vsel %vm1555_vm9, %v2947_v8, %v2932_v52 }
0x2d66   :  { %v2949_v59 = vsel %vm2939_vm10, %v2948_v49, %v2935_v1  ;;  %v2962_v45 = vrot.slane %v2954_v37, %v2961_v0 }
0x2d67   :  { %v2955_v54 = vcombine.low %v2946_v53, %v2949_v59 }
0x2d69   :  { %v2969_v55 = vrot.slane %v2955_v54, %v2961_v0 }
0x2d6b   :  { %v2970_v43 = vcombine.low %v2962_v45, %v2969_v55 }
0x2d6d   :  { %2972 = vst [vmem:[%s4707_s7] sm:$0xff] %v2970_v43 }

</bundles_post_ra>
